<compile_context>
chip_gen: v7x
topology: tpu7x:2x2x1
jax: 0.10.0
libtpu: 0.0.40
codegen_flags: <defaults>
</compile_context>

<pallas_src>
import functools

import jax
import jax.numpy as jnp
from jax import lax
from jax.experimental import pallas as pl
from jax.experimental.pallas import tpu as pltpu


LABELS_PAD = 128  # lane-dense width for the label-score output


# ------------------------------ fused kernel --------------------------------

def _make_depparser_kernel(n, hidden_size, g_pad):
    """Build the fused DepParser kernel for fixed sentence length n, g_pad gold arcs."""
    H = hidden_size
    N = n + 1

    def sigmoid(x):
        # tanh-form sigmoid: exact same function, stays on the EUP (no VALU divide
        # inside the serial recurrence).
        return 0.5 * jnp.tanh(0.5 * x) + 0.5

    def gates_to_hc(g, c):
        # PyTorch LSTM gate order (i, f, g, o); g is (1, 4H).
        i = sigmoid(g[:, 0 * H:1 * H])
        f = sigmoid(g[:, 1 * H:2 * H])
        gg = jnp.tanh(g[:, 2 * H:3 * H])
        o = sigmoid(g[:, 3 * H:4 * H])
        c_new = f * c + i * gg
        h_new = o * jnp.tanh(c_new)
        return h_new, c_new

    def kernel(gl_ref,                                     # SMEM (g_pad, 2) int32
               x_ref,                                      # (n, 2*d_embed) f32
               wih0f, whh0f, b0f, wih0b, whh0b, b0b,       # LSTM layer 0 fwd/bwd
               wih1f, whh1f, b1f, wih1b, whh1b, b1b,       # LSTM layer 1 fwd/bwd
               fc1_wl, fc1_wr, fc1_b, fc2_w, fc2_b,        # arc scorer (fc1 split L/R)
               mfc1_wl, mfc1_wr, mfc1_b, mfc2_w, mfc2_b,   # label MLP (fc2 lane-padded)
               m_ref, l_ref,                               # outputs (N,N), (g_pad,128)
               xs1_ref, outf_ref, pf_ref, pb_ref):         # VMEM scratch
        # ------------------ 2-layer bidirectional LSTM (batch = 1) ------------------
        def run_layer(x_val, wihf, whhf, bf, wihb, whhb, bb, dst_ref, row_off):
            # Hoisted input projection: one batched matmul per direction, so the
            # serial per-timestep chain is only h @ W_hh.
            pf_ref[...] = jnp.dot(x_val, wihf[...],
                                  preferred_element_type=jnp.float32) + bf[...]
            pb_ref[...] = jnp.dot(x_val, wihb[...],
                                  preferred_element_type=jnp.float32) + bb[...]
            Wf = whhf[...]
            Wb = whhb[...]

            def step(t, carry):
                hf, cf, hb, cb = carry
                tb = n - 1 - t
                # Interleave the two independent direction chains per step.
                gf = pf_ref[pl.ds(t, 1), :] + jnp.dot(
                    hf, Wf, preferred_element_type=jnp.float32)
                gb = pb_ref[pl.ds(tb, 1), :] + jnp.dot(
                    hb, Wb, preferred_element_type=jnp.float32)
                hf, cf = gates_to_hc(gf, cf)
                hb, cb = gates_to_hc(gb, cb)
                # Direct per-step stores (no list + concat; bounded live ranges).
                dst_ref[pl.ds(t + row_off, 1), :H] = hf
                dst_ref[pl.ds(tb + row_off, 1), H:] = hb
                return hf, cf, hb, cb

            z = jnp.zeros((1, H), jnp.float32)
            lax.fori_loop(0, n, step, (z, z, z, z), unroll=True)

        # layer 0: x -> xs1 (n, 2H)
        run_layer(x_ref[...], wih0f, whh0f, b0f, wih0b, whh0b, b0b, xs1_ref, 0)
        # root row (zeros) + layer 1 output -> out_full (N, 2H), all in VMEM
        outf_ref[0:1, :] = jnp.zeros((1, 2 * H), jnp.float32)
        run_layer(xs1_ref[...], wih1f, whh1f, b1f, wih1b, whh1b, b1b, outf_ref, 1)

        out_full = outf_ref[...]                                          # (N, 2H)

        # ------------------ arc scorer: M[i,j] = fc2(tanh(fc1([out_i; out_j]))) -----
        # Decomposed fc1: no (N^2, 4H) tensor and no HBM round trip.
        A = jnp.dot(out_full, fc1_wl[...], preferred_element_type=jnp.float32)   # (N,H)
        Bm = jnp.dot(out_full, fc1_wr[...], preferred_element_type=jnp.float32)  # (N,H)
        b1 = fc1_b[...]                                                   # (1, H)
        w2 = fc2_w[...]                                                   # (1, H)
        cols = []
        for j in range(N):                                                # static N
            hcol = jnp.tanh(A + Bm[j:j + 1, :] + b1)                      # (N, H)
            cols.append(jnp.sum(hcol * w2, axis=-1, keepdims=True))       # (N,1)=M[:,j]
        m_ref[...] = jnp.concatenate(cols, axis=1) + fc2_b[...]           # (N, N)

        # ------------------ gold-arc label MLP --------------------------------------
        lrows = []
        rrows = []
        for i in range(g_pad):                                            # static g_pad
            w1 = gl_ref[i, 0]
            w2i = gl_ref[i, 1]
            lrows.append(outf_ref[pl.ds(w1, 1), :])
            rrows.append(outf_ref[pl.ds(w2i, 1), :])
        gl_l = jnp.concatenate(lrows, axis=0)                             # (g_pad, 2H)
        gl_r = jnp.concatenate(rrows, axis=0)                             # (g_pad, 2H)
        hid = jnp.tanh(
            jnp.dot(gl_l, mfc1_wl[...], preferred_element_type=jnp.float32)
            + jnp.dot(gl_r, mfc1_wr[...], preferred_element_type=jnp.float32)
            + mfc1_b[...])                                                # (g_pad, H)
        # Lane-dense (g_pad, 128) store; wrapper slices back to (G, labels_size).
        l_ref[...] = jnp.dot(hid, mfc2_w[...],
                             preferred_element_type=jnp.float32) + mfc2_b[...]

    return kernel


# ------------------------- parameters & forward pass ------------------------

def init_params(key, word_voc_size, pos_voc_size, labels_size, d_embed, hidden_size):
    keys = jax.random.split(key, 32)
    it = iter(keys)

    def rnd(shape, scale=0.1):
        return (scale * jax.random.normal(next(it), shape)).astype(jnp.float32)

    H = hidden_size
    p = {}
    p['w_emb'] = rnd((word_voc_size, d_embed))
    p['p_emb'] = rnd((pos_voc_size, d_embed))

    def lstm_dir(in_dim):
        wih_t = rnd((in_dim, 4 * H))   # W_ih^T
        whh_t = rnd((H, 4 * H))        # W_hh^T
        b = rnd((1, 4 * H))            # b_ih + b_hh folded together
        return [wih_t, whh_t, b]

    lstm = []
    lstm += lstm_dir(2 * d_embed)      # layer 0, forward
    lstm += lstm_dir(2 * d_embed)      # layer 0, backward
    lstm += lstm_dir(2 * H)            # layer 1, forward
    lstm += lstm_dir(2 * H)            # layer 1, backward
    p['lstm'] = tuple(lstm)

    p['fc1_wt'] = rnd((4 * H, H));  p['fc1_b'] = rnd((1, H))
    p['fc2_wt'] = rnd((H, 1));      p['fc2_b'] = rnd((1, 1))
    p['mlp_fc1_wt'] = rnd((4 * H, H));          p['mlp_fc1_b'] = rnd((1, H))
    p['mlp_fc2_wt'] = rnd((H, labels_size));    p['mlp_fc2_b'] = rnd((1, labels_size))
    return p


def _prep_fc_weights(params, H, labels_size):
    """Split fc1 / mlp_fc1 into (left, right) halves and pad the label head to
    LABELS_PAD lanes so the kernel's final store is lane-dense."""
    fc1_wl = params['fc1_wt'][:2 * H, :]
    fc1_wr = params['fc1_wt'][2 * H:, :]
    fc2_w = params['fc2_wt'].reshape(1, H)      # (H,1) -> row vector
    mfc1_wl = params['mlp_fc1_wt'][:2 * H, :]
    mfc1_wr = params['mlp_fc1_wt'][2 * H:, :]
    mfc2_w = jnp.zeros((H, LABELS_PAD), jnp.float32).at[:, :labels_size].set(
        params['mlp_fc2_wt'])
    mfc2_b = jnp.zeros((1, LABELS_PAD), jnp.float32).at[:, :labels_size].set(
        params['mlp_fc2_b'])
    return (fc1_wl, fc1_wr, params['fc1_b'], fc2_w, params['fc2_b'],
            mfc1_wl, mfc1_wr, params['mlp_fc1_b'], mfc2_w, mfc2_b)


@functools.partial(jax.jit, static_argnames=('hidden_size', 'labels_size'))
def dep_parser_forward(params, words, pos, gl_idx, hidden_size, labels_size):
    H = hidden_size
    n = words.shape[0]
    N = n + 1
    G = gl_idx.shape[0]
    G_pad = max(8, -(-G // 8) * 8)                     # sublane-aligned gold-arc count

    # Embedding lookups + concat (plain-JAX glue).
    e_w = jnp.take(params['w_emb'], words, axis=0)     # (n, d_embed)
    e_p = jnp.take(params['p_emb'], pos, axis=0)       # (n, d_embed)
    x = jnp.concatenate([e_w, e_p], axis=1)            # (n, 2*d_embed)

    gl_pad = jnp.zeros((G_pad, 2), jnp.int32)
    if G > 0:
        gl_pad = gl_pad.at[:G, :].set(gl_idx[:, :2])

    fc_weights = _prep_fc_weights(params, H, labels_size)
    kernel = _make_depparser_kernel(n, H, G_pad)

    vmem = pl.BlockSpec(memory_space=pltpu.MemorySpace.VMEM)
    smem = pl.BlockSpec(memory_space=pltpu.MemorySpace.SMEM)
    n_vmem_inputs = 1 + len(params['lstm']) + len(fc_weights)

    M, L_padded = pl.pallas_call(
        kernel,
        out_shape=(jax.ShapeDtypeStruct((N, N), jnp.float32),
                   jax.ShapeDtypeStruct((G_pad, LABELS_PAD), jnp.float32)),
        in_specs=[smem] + [vmem] * n_vmem_inputs,
        out_specs=(vmem, vmem),
        scratch_shapes=[
            pltpu.VMEM((n, 2 * H), jnp.float32),       # layer-0 output
            pltpu.VMEM((N, 2 * H), jnp.float32),       # root + layer-1 output
            pltpu.VMEM((n, 4 * H), jnp.float32),       # fwd input projection
            pltpu.VMEM((n, 4 * H), jnp.float32),       # bwd input projection
        ],
    )(gl_pad, x, *params['lstm'], *fc_weights)

    if G > 0:
        L = L_padded[:G, :labels_size]
    else:
        L = jnp.zeros((0, labels_size), jnp.float32)
    return M, L


# ------------------------- plain-JAX reference (for checking) ---------------

def _ref_lstm_dir(xs, wih_t, whh_t, b, H, reverse):
    n = xs.shape[0]
    h = jnp.zeros((1, H), jnp.float32)
    c = jnp.zeros((1, H), jnp.float32)
    order = range(n - 1, -1, -1) if reverse else range(n)
    outs = [None] * n
    for t in order:
        g = xs[t:t + 1] @ wih_t + h @ whh_t + b
        i = jax.nn.sigmoid(g[:, :H])
        f = jax.nn.sigmoid(g[:, H:2 * H])
        gg = jnp.tanh(g[:, 2 * H:3 * H])
        o = jax.nn.sigmoid(g[:, 3 * H:])
        c = f * c + i * gg
        h = o * jnp.tanh(c)
        outs[t] = h
    return jnp.concatenate(outs, axis=0)


def dep_parser_reference(params, words, pos, gl_idx, hidden_size, labels_size):
    H = hidden_size
    n = words.shape[0]
    e_w = jnp.take(params['w_emb'], words, axis=0)
    e_p = jnp.take(params['p_emb'], pos, axis=0)
    xs = jnp.concatenate([e_w, e_p], axis=1)
    (w0f, u0f, b0f, w0b, u0b, b0b, w1f, u1f, b1f, w1b, u1b, b1b) = params['lstm']
    l0 = jnp.concatenate([_ref_lstm_dir(xs, w0f, u0f, b0f, H, False),
                          _ref_lstm_dir(xs, w0b, u0b, b0b, H, True)], axis=1)
    l1 = jnp.concatenate([_ref_lstm_dir(l0, w1f, u1f, b1f, H, False),
                          _ref_lstm_dir(l0, w1b, u1b, b1b, H, True)], axis=1)
    out_full = jnp.concatenate([jnp.zeros((1, 2 * H), jnp.float32), l1], axis=0)
    N = n + 1
    left = jnp.repeat(out_full, N, axis=0)
    right = jnp.tile(out_full, (N, 1))
    arcs = jnp.concatenate([left, right], axis=1)
    h = jnp.tanh(arcs @ params['fc1_wt'] + params['fc1_b'])
    M = (h @ params['fc2_wt'] + params['fc2_b']).reshape(N, N)
    if gl_idx.shape[0] > 0:
        Ls = jnp.concatenate([out_full[gl_idx[:, 0]], out_full[gl_idx[:, 1]]], axis=1)
        hh = jnp.tanh(Ls @ params['mlp_fc1_wt'] + params['mlp_fc1_b'])
        L = hh @ params['mlp_fc2_wt'] + params['mlp_fc2_b']
    else:
        L = jnp.zeros((0, labels_size), jnp.float32)
    return M, L


# ----------------------------------- main -----------------------------------

if __name__ == "__main__":
    word_voc_size = 50
    pos_voc_size = 12
    labels_size = 5
    d_embed = 16
    hidden_size = 32
    n_words = 8

    key = jax.random.PRNGKey(0)
    kp, kw, kt = jax.random.split(key, 3)
    params = init_params(kp, word_voc_size, pos_voc_size, labels_size,
                         d_embed, hidden_size)

    words = jax.random.randint(kw, (n_words,), 0, word_voc_size, dtype=jnp.int32)
    pos = jax.random.randint(kt, (n_words,), 0, pos_voc_size, dtype=jnp.int32)
    # gold arcs: (w1, w2, label), indices into [0, n_words] (0 = root node).
    gl = [(0, 1, 2), (1, 2, 0), (2, 3, 1), (3, 5, 4), (4, 6, 1), (5, 7, 3)]
    gl_idx = jnp.asarray(gl, dtype=jnp.int32)

    M, L = dep_parser_forward(params, words, pos, gl_idx,
                              hidden_size=hidden_size, labels_size=labels_size)
    M = jax.block_until_ready(M)
    L = jax.block_until_ready(L)

    assert M.shape == (n_words + 1, n_words + 1)
    assert L.shape == (len(gl), labels_size)
    assert bool(jnp.all(jnp.isfinite(M))) and bool(jnp.all(jnp.isfinite(L)))

    # Check against a pure-JAX reference of the PyTorch forward.
    M_ref, L_ref = dep_parser_reference(params, words, pos, gl_idx,
                                        hidden_size, labels_size)
    assert bool(jnp.allclose(M, M_ref, atol=2e-2, rtol=2e-2)), "arc scores mismatch"
    assert bool(jnp.allclose(L, L_ref, atol=2e-2, rtol=2e-2)), "label scores mismatch"

    print("KERNEL_OK")
</pallas_src>

<mosaic_0001>
module attributes {stable_mosaic.version = 11 : i64} {
  func.func @kernel(%arg0: memref<8x2xi32, #tpu.memory_space<smem>>, %arg1: memref<8x32xf32, #tpu.memory_space<vmem>>, %arg2: memref<32x128xf32, #tpu.memory_space<vmem>>, %arg3: memref<32x128xf32, #tpu.memory_space<vmem>>, %arg4: memref<1x128xf32, #tpu.memory_space<vmem>>, %arg5: memref<32x128xf32, #tpu.memory_space<vmem>>, %arg6: memref<32x128xf32, #tpu.memory_space<vmem>>, %arg7: memref<1x128xf32, #tpu.memory_space<vmem>>, %arg8: memref<64x128xf32, #tpu.memory_space<vmem>>, %arg9: memref<32x128xf32, #tpu.memory_space<vmem>>, %arg10: memref<1x128xf32, #tpu.memory_space<vmem>>, %arg11: memref<64x128xf32, #tpu.memory_space<vmem>>, %arg12: memref<32x128xf32, #tpu.memory_space<vmem>>, %arg13: memref<1x128xf32, #tpu.memory_space<vmem>>, %arg14: memref<64x32xf32, #tpu.memory_space<vmem>>, %arg15: memref<64x32xf32, #tpu.memory_space<vmem>>, %arg16: memref<1x32xf32, #tpu.memory_space<vmem>>, %arg17: memref<1x32xf32, #tpu.memory_space<vmem>>, %arg18: memref<1x1xf32, #tpu.memory_space<vmem>>, %arg19: memref<64x32xf32, #tpu.memory_space<vmem>>, %arg20: memref<64x32xf32, #tpu.memory_space<vmem>>, %arg21: memref<1x32xf32, #tpu.memory_space<vmem>>, %arg22: memref<32x128xf32, #tpu.memory_space<vmem>>, %arg23: memref<1x128xf32, #tpu.memory_space<vmem>>, %arg24: memref<9x9xf32, #tpu.memory_space<vmem>>, %arg25: memref<8x128xf32, #tpu.memory_space<vmem>>, %arg26: memref<8x64xf32, #tpu.memory_space<vmem>>, %arg27: memref<9x64xf32, #tpu.memory_space<vmem>>, %arg28: memref<8x128xf32, #tpu.memory_space<vmem>>, %arg29: memref<8x128xf32, #tpu.memory_space<vmem>>) attributes {dimension_semantics = [], scalar_prefetch = 0 : i64, scratch_operands = 4 : i64, tpu.core_type = #tpu.core_type<tc>} {
    %c0 = arith.constant 0 : index
    %c0_0 = arith.constant 0 : index
    %0 = vector.load %arg1[%c0, %c0_0] : memref<8x32xf32, #tpu.memory_space<vmem>>, vector<8x32xf32>
    %c0_1 = arith.constant 0 : index
    %c0_2 = arith.constant 0 : index
    %1 = vector.load %arg2[%c0_1, %c0_2] : memref<32x128xf32, #tpu.memory_space<vmem>>, vector<32x128xf32>
    %cst = arith.constant dense<0.000000e+00> : vector<8x128xf32>
    %2 = tpu.matmul %0, %1, %cst {dimension_numbers = #tpu.dot_dimension_numbers<[1], [0], [0], [1], [0, 0, 1, 1], [], []>} : vector<8x32xf32>, vector<32x128xf32>, vector<8x128xf32> -> vector<8x128xf32>
    %c0_3 = arith.constant 0 : index
    %c0_4 = arith.constant 0 : index
    %3 = vector.load %arg4[%c0_3, %c0_4] : memref<1x128xf32, #tpu.memory_space<vmem>>, vector<1x128xf32>
    %4 = vector.broadcast %3 : vector<1x128xf32> to vector<8x128xf32>
    %5 = arith.addf %2, %4 : vector<8x128xf32>
    %c0_5 = arith.constant 0 : index
    %c0_6 = arith.constant 0 : index
    %6 = vector.load %arg28[%c0_5, %c0_6] : memref<8x128xf32, #tpu.memory_space<vmem>>, vector<8x128xf32>
    tpu.vector_store %arg28[%c0_5, %c0_6], %5 {strides = array<i32>} : memref<8x128xf32, #tpu.memory_space<vmem>>, vector<8x128xf32>,
    %c0_7 = arith.constant 0 : index
    %c0_8 = arith.constant 0 : index
    %7 = vector.load %arg5[%c0_7, %c0_8] : memref<32x128xf32, #tpu.memory_space<vmem>>, vector<32x128xf32>
    %cst_9 = arith.constant dense<0.000000e+00> : vector<8x128xf32>
    %8 = tpu.matmul %0, %7, %cst_9 {dimension_numbers = #tpu.dot_dimension_numbers<[1], [0], [0], [1], [0, 0, 1, 1], [], []>} : vector<8x32xf32>, vector<32x128xf32>, vector<8x128xf32> -> vector<8x128xf32>
    %c0_10 = arith.constant 0 : index
    %c0_11 = arith.constant 0 : index
    %9 = vector.load %arg7[%c0_10, %c0_11] : memref<1x128xf32, #tpu.memory_space<vmem>>, vector<1x128xf32>
    %10 = vector.broadcast %9 : vector<1x128xf32> to vector<8x128xf32>
    %11 = arith.addf %8, %10 : vector<8x128xf32>
    %c0_12 = arith.constant 0 : index
    %c0_13 = arith.constant 0 : index
    %12 = vector.load %arg29[%c0_12, %c0_13] : memref<8x128xf32, #tpu.memory_space<vmem>>, vector<8x128xf32>
    tpu.vector_store %arg29[%c0_12, %c0_13], %11 {strides = array<i32>} : memref<8x128xf32, #tpu.memory_space<vmem>>, vector<8x128xf32>,
    %c0_14 = arith.constant 0 : index
    %c0_15 = arith.constant 0 : index
    %13 = vector.load %arg3[%c0_14, %c0_15] : memref<32x128xf32, #tpu.memory_space<vmem>>, vector<32x128xf32>
    %c0_16 = arith.constant 0 : index
    %c0_17 = arith.constant 0 : index
    %14 = vector.load %arg6[%c0_16, %c0_17] : memref<32x128xf32, #tpu.memory_space<vmem>>, vector<32x128xf32>
    %cst_18 = arith.constant 0.000000e+00 : f32
    %15 = vector.broadcast %cst_18 : f32 to vector<1x32xf32>
    %c0_i32 = arith.constant 0 : i32
    %c7_i32 = arith.constant 7 : i32
    %16 = arith.subi %c7_i32, %c0_i32 : i32
    %17 = arith.index_cast %c0_i32 : i32 to index
    %c0_19 = arith.constant 0 : index
    %18 = vector.load %arg28[%17, %c0_19] : memref<8x128xf32, #tpu.memory_space<vmem>>, vector<1x128xf32>
    %cst_20 = arith.constant dense<0.000000e+00> : vector<1x128xf32>
    %19 = tpu.matmul %15, %13, %cst_20 {dimension_numbers = #tpu.dot_dimension_numbers<[1], [0], [0], [1], [0, 0, 1, 1], [], []>} : vector<1x32xf32>, vector<32x128xf32>, vector<1x128xf32> -> vector<1x128xf32>
    %20 = arith.addf %18, %19 : vector<1x128xf32>
    %21 = arith.index_cast %16 : i32 to index
    %c0_21 = arith.constant 0 : index
    %22 = vector.load %arg29[%21, %c0_21] : memref<8x128xf32, #tpu.memory_space<vmem>>, vector<1x128xf32>
    %cst_22 = arith.constant dense<0.000000e+00> : vector<1x128xf32>
    %23 = tpu.matmul %15, %14, %cst_22 {dimension_numbers = #tpu.dot_dimension_numbers<[1], [0], [0], [1], [0, 0, 1, 1], [], []>} : vector<1x32xf32>, vector<32x128xf32>, vector<1x128xf32> -> vector<1x128xf32>
    %24 = arith.addf %22, %23 : vector<1x128xf32>
    %25 = vector.extract_strided_slice %20 {offsets = [0, 0], sizes = [1, 32], strides = [1, 1]} : vector<1x128xf32> to vector<1x32xf32>
    %cst_23 = arith.constant 5.000000e-01 : f32
    %26 = vector.broadcast %cst_23 : f32 to vector<1x32xf32>
    %27 = arith.mulf %26, %25 : vector<1x32xf32>
    %28 = math.tanh %27 : vector<1x32xf32>
    %cst_24 = arith.constant 5.000000e-01 : f32
    %29 = vector.broadcast %cst_24 : f32 to vector<1x32xf32>
    %30 = arith.mulf %29, %28 : vector<1x32xf32>
    %cst_25 = arith.constant 5.000000e-01 : f32
    %31 = vector.broadcast %cst_25 : f32 to vector<1x32xf32>
    %32 = arith.addf %30, %31 : vector<1x32xf32>
    %33 = vector.extract_strided_slice %20 {offsets = [0, 32], sizes = [1, 32], strides = [1, 1]} : vector<1x128xf32> to vector<1x32xf32>
    %cst_26 = arith.constant 5.000000e-01 : f32
    %34 = vector.broadcast %cst_26 : f32 to vector<1x32xf32>
    %35 = arith.mulf %34, %33 : vector<1x32xf32>
    %36 = math.tanh %35 : vector<1x32xf32>
    %cst_27 = arith.constant 5.000000e-01 : f32
    %37 = vector.broadcast %cst_27 : f32 to vector<1x32xf32>
    %38 = arith.mulf %37, %36 : vector<1x32xf32>
    %cst_28 = arith.constant 5.000000e-01 : f32
    %39 = vector.broadcast %cst_28 : f32 to vector<1x32xf32>
    %40 = arith.addf %38, %39 : vector<1x32xf32>
    %41 = vector.extract_strided_slice %20 {offsets = [0, 64], sizes = [1, 32], strides = [1, 1]} : vector<1x128xf32> to vector<1x32xf32>
    %42 = math.tanh %41 : vector<1x32xf32>
    %43 = vector.extract_strided_slice %20 {offsets = [0, 96], sizes = [1, 32], strides = [1, 1]} : vector<1x128xf32> to vector<1x32xf32>
    %cst_29 = arith.constant 5.000000e-01 : f32
    %44 = vector.broadcast %cst_29 : f32 to vector<1x32xf32>
    %45 = arith.mulf %44, %43 : vector<1x32xf32>
    %46 = math.tanh %45 : vector<1x32xf32>
    %cst_30 = arith.constant 5.000000e-01 : f32
    %47 = vector.broadcast %cst_30 : f32 to vector<1x32xf32>
    %48 = arith.mulf %47, %46 : vector<1x32xf32>
    %cst_31 = arith.constant 5.000000e-01 : f32
    %49 = vector.broadcast %cst_31 : f32 to vector<1x32xf32>
    %50 = arith.addf %48, %49 : vector<1x32xf32>
    %51 = arith.mulf %40, %15 : vector<1x32xf32>
    %52 = arith.mulf %32, %42 : vector<1x32xf32>
    %53 = arith.addf %51, %52 : vector<1x32xf32>
    %54 = math.tanh %53 : vector<1x32xf32>
    %55 = arith.mulf %50, %54 : vector<1x32xf32>
    %56 = vector.extract_strided_slice %24 {offsets = [0, 0], sizes = [1, 32], strides = [1, 1]} : vector<1x128xf32> to vector<1x32xf32>
    %cst_32 = arith.constant 5.000000e-01 : f32
    %57 = vector.broadcast %cst_32 : f32 to vector<1x32xf32>
    %58 = arith.mulf %57, %56 : vector<1x32xf32>
    %59 = math.tanh %58 : vector<1x32xf32>
    %cst_33 = arith.constant 5.000000e-01 : f32
    %60 = vector.broadcast %cst_33 : f32 to vector<1x32xf32>
    %61 = arith.mulf %60, %59 : vector<1x32xf32>
    %cst_34 = arith.constant 5.000000e-01 : f32
    %62 = vector.broadcast %cst_34 : f32 to vector<1x32xf32>
    %63 = arith.addf %61, %62 : vector<1x32xf32>
    %64 = vector.extract_strided_slice %24 {offsets = [0, 32], sizes = [1, 32], strides = [1, 1]} : vector<1x128xf32> to vector<1x32xf32>
    %cst_35 = arith.constant 5.000000e-01 : f32
    %65 = vector.broadcast %cst_35 : f32 to vector<1x32xf32>
    %66 = arith.mulf %65, %64 : vector<1x32xf32>
    %67 = math.tanh %66 : vector<1x32xf32>
    %cst_36 = arith.constant 5.000000e-01 : f32
    %68 = vector.broadcast %cst_36 : f32 to vector<1x32xf32>
    %69 = arith.mulf %68, %67 : vector<1x32xf32>
    %cst_37 = arith.constant 5.000000e-01 : f32
    %70 = vector.broadcast %cst_37 : f32 to vector<1x32xf32>
    %71 = arith.addf %69, %70 : vector<1x32xf32>
    %72 = vector.extract_strided_slice %24 {offsets = [0, 64], sizes = [1, 32], strides = [1, 1]} : vector<1x128xf32> to vector<1x32xf32>
    %73 = math.tanh %72 : vector<1x32xf32>
    %74 = vector.extract_strided_slice %24 {offsets = [0, 96], sizes = [1, 32], strides = [1, 1]} : vector<1x128xf32> to vector<1x32xf32>
    %cst_38 = arith.constant 5.000000e-01 : f32
    %75 = vector.broadcast %cst_38 : f32 to vector<1x32xf32>
    %76 = arith.mulf %75, %74 : vector<1x32xf32>
    %77 = math.tanh %76 : vector<1x32xf32>
    %cst_39 = arith.constant 5.000000e-01 : f32
    %78 = vector.broadcast %cst_39 : f32 to vector<1x32xf32>
    %79 = arith.mulf %78, %77 : vector<1x32xf32>
    %cst_40 = arith.constant 5.000000e-01 : f32
    %80 = vector.broadcast %cst_40 : f32 to vector<1x32xf32>
    %81 = arith.addf %79, %80 : vector<1x32xf32>
    %82 = arith.mulf %71, %15 : vector<1x32xf32>
    %83 = arith.mulf %63, %73 : vector<1x32xf32>
    %84 = arith.addf %82, %83 : vector<1x32xf32>
    %85 = math.tanh %84 : vector<1x32xf32>
    %86 = arith.mulf %81, %85 : vector<1x32xf32>
    %c0_i32_41 = arith.constant 0 : i32
    %87 = arith.addi %c0_i32, %c0_i32_41 : i32
    %88 = arith.index_cast %87 : i32 to index
    %c0_42 = arith.constant 0 : index
    %89 = vector.load %arg26[%88, %c0_42] : memref<8x64xf32, #tpu.memory_space<vmem>>, vector<1x32xf32>
    tpu.vector_store %arg26[%88, %c0_42], %55 {strides = array<i32>} : memref<8x64xf32, #tpu.memory_space<vmem>>, vector<1x32xf32>,
    %c0_i32_43 = arith.constant 0 : i32
    %90 = arith.addi %16, %c0_i32_43 : i32
    %91 = arith.index_cast %90 : i32 to index
    %c32 = arith.constant 32 : index
    %92 = vector.load %arg26[%91, %c32] : memref<8x64xf32, #tpu.memory_space<vmem>>, vector<1x32xf32>
    tpu.vector_store %arg26[%91, %c32], %86 {strides = array<i32>} : memref<8x64xf32, #tpu.memory_space<vmem>>, vector<1x32xf32>,
    %c1_i32 = arith.constant 1 : i32
    %c7_i32_44 = arith.constant 7 : i32
    %93 = arith.subi %c7_i32_44, %c1_i32 : i32
    %94 = arith.index_cast %c1_i32 : i32 to index
    %c0_45 = arith.constant 0 : index
    %95 = vector.load %arg28[%94, %c0_45] : memref<8x128xf32, #tpu.memory_space<vmem>>, vector<1x128xf32>
    %cst_46 = arith.constant dense<0.000000e+00> : vector<1x128xf32>
    %96 = tpu.matmul %55, %13, %cst_46 {dimension_numbers = #tpu.dot_dimension_numbers<[1], [0], [0], [1], [0, 0, 1, 1], [], []>} : vector<1x32xf32>, vector<32x128xf32>, vector<1x128xf32> -> vector<1x128xf32>
    %97 = arith.addf %95, %96 : vector<1x128xf32>
    %98 = arith.index_cast %93 : i32 to index
    %c0_47 = arith.constant 0 : index
    %99 = vector.load %arg29[%98, %c0_47] : memref<8x128xf32, #tpu.memory_space<vmem>>, vector<1x128xf32>
    %cst_48 = arith.constant dense<0.000000e+00> : vector<1x128xf32>
    %100 = tpu.matmul %86, %14, %cst_48 {dimension_numbers = #tpu.dot_dimension_numbers<[1], [0], [0], [1], [0, 0, 1, 1], [], []>} : vector<1x32xf32>, vector<32x128xf32>, vector<1x128xf32> -> vector<1x128xf32>
    %101 = arith.addf %99, %100 : vector<1x128xf32>
    %102 = vector.extract_strided_slice %97 {offsets = [0, 0], sizes = [1, 32], strides = [1, 1]} : vector<1x128xf32> to vector<1x32xf32>
    %cst_49 = arith.constant 5.000000e-01 : f32
    %103 = vector.broadcast %cst_49 : f32 to vector<1x32xf32>
    %104 = arith.mulf %103, %102 : vector<1x32xf32>
    %105 = math.tanh %104 : vector<1x32xf32>
    %cst_50 = arith.constant 5.000000e-01 : f32
    %106 = vector.broadcast %cst_50 : f32 to vector<1x32xf32>
    %107 = arith.mulf %106, %105 : vector<1x32xf32>
    %cst_51 = arith.constant 5.000000e-01 : f32
    %108 = vector.broadcast %cst_51 : f32 to vector<1x32xf32>
    %109 = arith.addf %107, %108 : vector<1x32xf32>
    %110 = vector.extract_strided_slice %97 {offsets = [0, 32], sizes = [1, 32], strides = [1, 1]} : vector<1x128xf32> to vector<1x32xf32>
    %cst_52 = arith.constant 5.000000e-01 : f32
    %111 = vector.broadcast %cst_52 : f32 to vector<1x32xf32>
    %112 = arith.mulf %111, %110 : vector<1x32xf32>
    %113 = math.tanh %112 : vector<1x32xf32>
    %cst_53 = arith.constant 5.000000e-01 : f32
    %114 = vector.broadcast %cst_53 : f32 to vector<1x32xf32>
    %115 = arith.mulf %114, %113 : vector<1x32xf32>
    %cst_54 = arith.constant 5.000000e-01 : f32
    %116 = vector.broadcast %cst_54 : f32 to vector<1x32xf32>
    %117 = arith.addf %115, %116 : vector<1x32xf32>
    %118 = vector.extract_strided_slice %97 {offsets = [0, 64], sizes = [1, 32], strides = [1, 1]} : vector<1x128xf32> to vector<1x32xf32>
    %119 = math.tanh %118 : vector<1x32xf32>
    %120 = vector.extract_strided_slice %97 {offsets = [0, 96], sizes = [1, 32], strides = [1, 1]} : vector<1x128xf32> to vector<1x32xf32>
    %cst_55 = arith.constant 5.000000e-01 : f32
    %121 = vector.broadcast %cst_55 : f32 to vector<1x32xf32>
    %122 = arith.mulf %121, %120 : vector<1x32xf32>
    %123 = math.tanh %122 : vector<1x32xf32>
    %cst_56 = arith.constant 5.000000e-01 : f32
    %124 = vector.broadcast %cst_56 : f32 to vector<1x32xf32>
    %125 = arith.mulf %124, %123 : vector<1x32xf32>
    %cst_57 = arith.constant 5.000000e-01 : f32
    %126 = vector.broadcast %cst_57 : f32 to vector<1x32xf32>
    %127 = arith.addf %125, %126 : vector<1x32xf32>
    %128 = arith.mulf %117, %53 : vector<1x32xf32>
    %129 = arith.mulf %109, %119 : vector<1x32xf32>
    %130 = arith.addf %128, %129 : vector<1x32xf32>
    %131 = math.tanh %130 : vector<1x32xf32>
    %132 = arith.mulf %127, %131 : vector<1x32xf32>
    %133 = vector.extract_strided_slice %101 {offsets = [0, 0], sizes = [1, 32], strides = [1, 1]} : vector<1x128xf32> to vector<1x32xf32>
    %cst_58 = arith.constant 5.000000e-01 : f32
    %134 = vector.broadcast %cst_58 : f32 to vector<1x32xf32>
    %135 = arith.mulf %134, %133 : vector<1x32xf32>
    %136 = math.tanh %135 : vector<1x32xf32>
    %cst_59 = arith.constant 5.000000e-01 : f32
    %137 = vector.broadcast %cst_59 : f32 to vector<1x32xf32>
    %138 = arith.mulf %137, %136 : vector<1x32xf32>
    %cst_60 = arith.constant 5.000000e-01 : f32
    %139 = vector.broadcast %cst_60 : f32 to vector<1x32xf32>
    %140 = arith.addf %138, %139 : vector<1x32xf32>
    %141 = vector.extract_strided_slice %101 {offsets = [0, 32], sizes = [1, 32], strides = [1, 1]} : vector<1x128xf32> to vector<1x32xf32>
    %cst_61 = arith.constant 5.000000e-01 : f32
    %142 = vector.broadcast %cst_61 : f32 to vector<1x32xf32>
    %143 = arith.mulf %142, %141 : vector<1x32xf32>
    %144 = math.tanh %143 : vector<1x32xf32>
    %cst_62 = arith.constant 5.000000e-01 : f32
    %145 = vector.broadcast %cst_62 : f32 to vector<1x32xf32>
    %146 = arith.mulf %145, %144 : vector<1x32xf32>
    %cst_63 = arith.constant 5.000000e-01 : f32
    %147 = vector.broadcast %cst_63 : f32 to vector<1x32xf32>
    %148 = arith.addf %146, %147 : vector<1x32xf32>
    %149 = vector.extract_strided_slice %101 {offsets = [0, 64], sizes = [1, 32], strides = [1, 1]} : vector<1x128xf32> to vector<1x32xf32>
    %150 = math.tanh %149 : vector<1x32xf32>
    %151 = vector.extract_strided_slice %101 {offsets = [0, 96], sizes = [1, 32], strides = [1, 1]} : vector<1x128xf32> to vector<1x32xf32>
    %cst_64 = arith.constant 5.000000e-01 : f32
    %152 = vector.broadcast %cst_64 : f32 to vector<1x32xf32>
    %153 = arith.mulf %152, %151 : vector<1x32xf32>
    %154 = math.tanh %153 : vector<1x32xf32>
    %cst_65 = arith.constant 5.000000e-01 : f32
    %155 = vector.broadcast %cst_65 : f32 to vector<1x32xf32>
    %156 = arith.mulf %155, %154 : vector<1x32xf32>
    %cst_66 = arith.constant 5.000000e-01 : f32
    %157 = vector.broadcast %cst_66 : f32 to vector<1x32xf32>
    %158 = arith.addf %156, %157 : vector<1x32xf32>
    %159 = arith.mulf %148, %84 : vector<1x32xf32>
    %160 = arith.mulf %140, %150 : vector<1x32xf32>
    %161 = arith.addf %159, %160 : vector<1x32xf32>
    %162 = math.tanh %161 : vector<1x32xf32>
    %163 = arith.mulf %158, %162 : vector<1x32xf32>
    %c0_i32_67 = arith.constant 0 : i32
    %164 = arith.addi %c1_i32, %c0_i32_67 : i32
    %165 = arith.index_cast %164 : i32 to index
    %c0_68 = arith.constant 0 : index
    %166 = vector.load %arg26[%165, %c0_68] : memref<8x64xf32, #tpu.memory_space<vmem>>, vector<1x32xf32>
    tpu.vector_store %arg26[%165, %c0_68], %132 {strides = array<i32>} : memref<8x64xf32, #tpu.memory_space<vmem>>, vector<1x32xf32>,
    %c0_i32_69 = arith.constant 0 : i32
    %167 = arith.addi %93, %c0_i32_69 : i32
    %168 = arith.index_cast %167 : i32 to index
    %c32_70 = arith.constant 32 : index
    %169 = vector.load %arg26[%168, %c32_70] : memref<8x64xf32, #tpu.memory_space<vmem>>, vector<1x32xf32>
    tpu.vector_store %arg26[%168, %c32_70], %163 {strides = array<i32>} : memref<8x64xf32, #tpu.memory_space<vmem>>, vector<1x32xf32>,
    %c2_i32 = arith.constant 2 : i32
    %c7_i32_71 = arith.constant 7 : i32
    %170 = arith.subi %c7_i32_71, %c2_i32 : i32
    %171 = arith.index_cast %c2_i32 : i32 to index
    %c0_72 = arith.constant 0 : index
    %172 = vector.load %arg28[%171, %c0_72] : memref<8x128xf32, #tpu.memory_space<vmem>>, vector<1x128xf32>
    %cst_73 = arith.constant dense<0.000000e+00> : vector<1x128xf32>
    %173 = tpu.matmul %132, %13, %cst_73 {dimension_numbers = #tpu.dot_dimension_numbers<[1], [0], [0], [1], [0, 0, 1, 1], [], []>} : vector<1x32xf32>, vector<32x128xf32>, vector<1x128xf32> -> vector<1x128xf32>
    %174 = arith.addf %172, %173 : vector<1x128xf32>
    %175 = arith.index_cast %170 : i32 to index
    %c0_74 = arith.constant 0 : index
    %176 = vector.load %arg29[%175, %c0_74] : memref<8x128xf32, #tpu.memory_space<vmem>>, vector<1x128xf32>
    %cst_75 = arith.constant dense<0.000000e+00> : vector<1x128xf32>
    %177 = tpu.matmul %163, %14, %cst_75 {dimension_numbers = #tpu.dot_dimension_numbers<[1], [0], [0], [1], [0, 0, 1, 1], [], []>} : vector<1x32xf32>, vector<32x128xf32>, vector<1x128xf32> -> vector<1x128xf32>
    %178 = arith.addf %176, %177 : vector<1x128xf32>
    %179 = vector.extract_strided_slice %174 {offsets = [0, 0], sizes = [1, 32], strides = [1, 1]} : vector<1x128xf32> to vector<1x32xf32>
    %cst_76 = arith.constant 5.000000e-01 : f32
    %180 = vector.broadcast %cst_76 : f32 to vector<1x32xf32>
    %181 = arith.mulf %180, %179 : vector<1x32xf32>
    %182 = math.tanh %181 : vector<1x32xf32>
    %cst_77 = arith.constant 5.000000e-01 : f32
    %183 = vector.broadcast %cst_77 : f32 to vector<1x32xf32>
    %184 = arith.mulf %183, %182 : vector<1x32xf32>
    %cst_78 = arith.constant 5.000000e-01 : f32
    %185 = vector.broadcast %cst_78 : f32 to vector<1x32xf32>
    %186 = arith.addf %184, %185 : vector<1x32xf32>
    %187 = vector.extract_strided_slice %174 {offsets = [0, 32], sizes = [1, 32], strides = [1, 1]} : vector<1x128xf32> to vector<1x32xf32>
    %cst_79 = arith.constant 5.000000e-01 : f32
    %188 = vector.broadcast %cst_79 : f32 to vector<1x32xf32>
    %189 = arith.mulf %188, %187 : vector<1x32xf32>
    %190 = math.tanh %189 : vector<1x32xf32>
    %cst_80 = arith.constant 5.000000e-01 : f32
    %191 = vector.broadcast %cst_80 : f32 to vector<1x32xf32>
    %192 = arith.mulf %191, %190 : vector<1x32xf32>
    %cst_81 = arith.constant 5.000000e-01 : f32
    %193 = vector.broadcast %cst_81 : f32 to vector<1x32xf32>
    %194 = arith.addf %192, %193 : vector<1x32xf32>
    %195 = vector.extract_strided_slice %174 {offsets = [0, 64], sizes = [1, 32], strides = [1, 1]} : vector<1x128xf32> to vector<1x32xf32>
    %196 = math.tanh %195 : vector<1x32xf32>
    %197 = vector.extract_strided_slice %174 {offsets = [0, 96], sizes = [1, 32], strides = [1, 1]} : vector<1x128xf32> to vector<1x32xf32>
    %cst_82 = arith.constant 5.000000e-01 : f32
    %198 = vector.broadcast %cst_82 : f32 to vector<1x32xf32>
    %199 = arith.mulf %198, %197 : vector<1x32xf32>
    %200 = math.tanh %199 : vector<1x32xf32>
    %cst_83 = arith.constant 5.000000e-01 : f32
    %201 = vector.broadcast %cst_83 : f32 to vector<1x32xf32>
    %202 = arith.mulf %201, %200 : vector<1x32xf32>
    %cst_84 = arith.constant 5.000000e-01 : f32
    %203 = vector.broadcast %cst_84 : f32 to vector<1x32xf32>
    %204 = arith.addf %202, %203 : vector<1x32xf32>
    %205 = arith.mulf %194, %130 : vector<1x32xf32>
    %206 = arith.mulf %186, %196 : vector<1x32xf32>
    %207 = arith.addf %205, %206 : vector<1x32xf32>
    %208 = math.tanh %207 : vector<1x32xf32>
    %209 = arith.mulf %204, %208 : vector<1x32xf32>
    %210 = vector.extract_strided_slice %178 {offsets = [0, 0], sizes = [1, 32], strides = [1, 1]} : vector<1x128xf32> to vector<1x32xf32>
    %cst_85 = arith.constant 5.000000e-01 : f32
    %211 = vector.broadcast %cst_85 : f32 to vector<1x32xf32>
    %212 = arith.mulf %211, %210 : vector<1x32xf32>
    %213 = math.tanh %212 : vector<1x32xf32>
    %cst_86 = arith.constant 5.000000e-01 : f32
    %214 = vector.broadcast %cst_86 : f32 to vector<1x32xf32>
    %215 = arith.mulf %214, %213 : vector<1x32xf32>
    %cst_87 = arith.constant 5.000000e-01 : f32
    %216 = vector.broadcast %cst_87 : f32 to vector<1x32xf32>
    %217 = arith.addf %215, %216 : vector<1x32xf32>
    %218 = vector.extract_strided_slice %178 {offsets = [0, 32], sizes = [1, 32], strides = [1, 1]} : vector<1x128xf32> to vector<1x32xf32>
    %cst_88 = arith.constant 5.000000e-01 : f32
    %219 = vector.broadcast %cst_88 : f32 to vector<1x32xf32>
    %220 = arith.mulf %219, %218 : vector<1x32xf32>
    %221 = math.tanh %220 : vector<1x32xf32>
    %cst_89 = arith.constant 5.000000e-01 : f32
    %222 = vector.broadcast %cst_89 : f32 to vector<1x32xf32>
    %223 = arith.mulf %222, %221 : vector<1x32xf32>
    %cst_90 = arith.constant 5.000000e-01 : f32
    %224 = vector.broadcast %cst_90 : f32 to vector<1x32xf32>
    %225 = arith.addf %223, %224 : vector<1x32xf32>
    %226 = vector.extract_strided_slice %178 {offsets = [0, 64], sizes = [1, 32], strides = [1, 1]} : vector<1x128xf32> to vector<1x32xf32>
    %227 = math.tanh %226 : vector<1x32xf32>
    %228 = vector.extract_strided_slice %178 {offsets = [0, 96], sizes = [1, 32], strides = [1, 1]} : vector<1x128xf32> to vector<1x32xf32>
    %cst_91 = arith.constant 5.000000e-01 : f32
    %229 = vector.broadcast %cst_91 : f32 to vector<1x32xf32>
    %230 = arith.mulf %229, %228 : vector<1x32xf32>
    %231 = math.tanh %230 : vector<1x32xf32>
    %cst_92 = arith.constant 5.000000e-01 : f32
    %232 = vector.broadcast %cst_92 : f32 to vector<1x32xf32>
    %233 = arith.mulf %232, %231 : vector<1x32xf32>
    %cst_93 = arith.constant 5.000000e-01 : f32
    %234 = vector.broadcast %cst_93 : f32 to vector<1x32xf32>
    %235 = arith.addf %233, %234 : vector<1x32xf32>
    %236 = arith.mulf %225, %161 : vector<1x32xf32>
    %237 = arith.mulf %217, %227 : vector<1x32xf32>
    %238 = arith.addf %236, %237 : vector<1x32xf32>
    %239 = math.tanh %238 : vector<1x32xf32>
    %240 = arith.mulf %235, %239 : vector<1x32xf32>
    %c0_i32_94 = arith.constant 0 : i32
    %241 = arith.addi %c2_i32, %c0_i32_94 : i32
    %242 = arith.index_cast %241 : i32 to index
    %c0_95 = arith.constant 0 : index
    %243 = vector.load %arg26[%242, %c0_95] : memref<8x64xf32, #tpu.memory_space<vmem>>, vector<1x32xf32>
    tpu.vector_store %arg26[%242, %c0_95], %209 {strides = array<i32>} : memref<8x64xf32, #tpu.memory_space<vmem>>, vector<1x32xf32>,
    %c0_i32_96 = arith.constant 0 : i32
    %244 = arith.addi %170, %c0_i32_96 : i32
    %245 = arith.index_cast %244 : i32 to index
    %c32_97 = arith.constant 32 : index
    %246 = vector.load %arg26[%245, %c32_97] : memref<8x64xf32, #tpu.memory_space<vmem>>, vector<1x32xf32>
    tpu.vector_store %arg26[%245, %c32_97], %240 {strides = array<i32>} : memref<8x64xf32, #tpu.memory_space<vmem>>, vector<1x32xf32>,
    %c3_i32 = arith.constant 3 : i32
    %c7_i32_98 = arith.constant 7 : i32
    %247 = arith.subi %c7_i32_98, %c3_i32 : i32
    %248 = arith.index_cast %c3_i32 : i32 to index
    %c0_99 = arith.constant 0 : index
    %249 = vector.load %arg28[%248, %c0_99] : memref<8x128xf32, #tpu.memory_space<vmem>>, vector<1x128xf32>
    %cst_100 = arith.constant dense<0.000000e+00> : vector<1x128xf32>
    %250 = tpu.matmul %209, %13, %cst_100 {dimension_numbers = #tpu.dot_dimension_numbers<[1], [0], [0], [1], [0, 0, 1, 1], [], []>} : vector<1x32xf32>, vector<32x128xf32>, vector<1x128xf32> -> vector<1x128xf32>
    %251 = arith.addf %249, %250 : vector<1x128xf32>
    %252 = arith.index_cast %247 : i32 to index
    %c0_101 = arith.constant 0 : index
    %253 = vector.load %arg29[%252, %c0_101] : memref<8x128xf32, #tpu.memory_space<vmem>>, vector<1x128xf32>
    %cst_102 = arith.constant dense<0.000000e+00> : vector<1x128xf32>
    %254 = tpu.matmul %240, %14, %cst_102 {dimension_numbers = #tpu.dot_dimension_numbers<[1], [0], [0], [1], [0, 0, 1, 1], [], []>} : vector<1x32xf32>, vector<32x128xf32>, vector<1x128xf32> -> vector<1x128xf32>
    %255 = arith.addf %253, %254 : vector<1x128xf32>
    %256 = vector.extract_strided_slice %251 {offsets = [0, 0], sizes = [1, 32], strides = [1, 1]} : vector<1x128xf32> to vector<1x32xf32>
    %cst_103 = arith.constant 5.000000e-01 : f32
    %257 = vector.broadcast %cst_103 : f32 to vector<1x32xf32>
    %258 = arith.mulf %257, %256 : vector<1x32xf32>
    %259 = math.tanh %258 : vector<1x32xf32>
    %cst_104 = arith.constant 5.000000e-01 : f32
    %260 = vector.broadcast %cst_104 : f32 to vector<1x32xf32>
    %261 = arith.mulf %260, %259 : vector<1x32xf32>
    %cst_105 = arith.constant 5.000000e-01 : f32
    %262 = vector.broadcast %cst_105 : f32 to vector<1x32xf32>
    %263 = arith.addf %261, %262 : vector<1x32xf32>
    %264 = vector.extract_strided_slice %251 {offsets = [0, 32], sizes = [1, 32], strides = [1, 1]} : vector<1x128xf32> to vector<1x32xf32>
    %cst_106 = arith.constant 5.000000e-01 : f32
    %265 = vector.broadcast %cst_106 : f32 to vector<1x32xf32>
    %266 = arith.mulf %265, %264 : vector<1x32xf32>
    %267 = math.tanh %266 : vector<1x32xf32>
    %cst_107 = arith.constant 5.000000e-01 : f32
    %268 = vector.broadcast %cst_107 : f32 to vector<1x32xf32>
    %269 = arith.mulf %268, %267 : vector<1x32xf32>
    %cst_108 = arith.constant 5.000000e-01 : f32
    %270 = vector.broadcast %cst_108 : f32 to vector<1x32xf32>
    %271 = arith.addf %269, %270 : vector<1x32xf32>
    %272 = vector.extract_strided_slice %251 {offsets = [0, 64], sizes = [1, 32], strides = [1, 1]} : vector<1x128xf32> to vector<1x32xf32>
    %273 = math.tanh %272 : vector<1x32xf32>
    %274 = vector.extract_strided_slice %251 {offsets = [0, 96], sizes = [1, 32], strides = [1, 1]} : vector<1x128xf32> to vector<1x32xf32>
    %cst_109 = arith.constant 5.000000e-01 : f32
    %275 = vector.broadcast %cst_109 : f32 to vector<1x32xf32>
    %276 = arith.mulf %275, %274 : vector<1x32xf32>
    %277 = math.tanh %276 : vector<1x32xf32>
    %cst_110 = arith.constant 5.000000e-01 : f32
    %278 = vector.broadcast %cst_110 : f32 to vector<1x32xf32>
    %279 = arith.mulf %278, %277 : vector<1x32xf32>
    %cst_111 = arith.constant 5.000000e-01 : f32
    %280 = vector.broadcast %cst_111 : f32 to vector<1x32xf32>
    %281 = arith.addf %279, %280 : vector<1x32xf32>
    %282 = arith.mulf %271, %207 : vector<1x32xf32>
    %283 = arith.mulf %263, %273 : vector<1x32xf32>
    %284 = arith.addf %282, %283 : vector<1x32xf32>
    %285 = math.tanh %284 : vector<1x32xf32>
    %286 = arith.mulf %281, %285 : vector<1x32xf32>
    %287 = vector.extract_strided_slice %255 {offsets = [0, 0], sizes = [1, 32], strides = [1, 1]} : vector<1x128xf32> to vector<1x32xf32>
    %cst_112 = arith.constant 5.000000e-01 : f32
    %288 = vector.broadcast %cst_112 : f32 to vector<1x32xf32>
    %289 = arith.mulf %288, %287 : vector<1x32xf32>
    %290 = math.tanh %289 : vector<1x32xf32>
    %cst_113 = arith.constant 5.000000e-01 : f32
    %291 = vector.broadcast %cst_113 : f32 to vector<1x32xf32>
    %292 = arith.mulf %291, %290 : vector<1x32xf32>
    %cst_114 = arith.constant 5.000000e-01 : f32
    %293 = vector.broadcast %cst_114 : f32 to vector<1x32xf32>
    %294 = arith.addf %292, %293 : vector<1x32xf32>
    %295 = vector.extract_strided_slice %255 {offsets = [0, 32], sizes = [1, 32], strides = [1, 1]} : vector<1x128xf32> to vector<1x32xf32>
    %cst_115 = arith.constant 5.000000e-01 : f32
    %296 = vector.broadcast %cst_115 : f32 to vector<1x32xf32>
    %297 = arith.mulf %296, %295 : vector<1x32xf32>
    %298 = math.tanh %297 : vector<1x32xf32>
    %cst_116 = arith.constant 5.000000e-01 : f32
    %299 = vector.broadcast %cst_116 : f32 to vector<1x32xf32>
    %300 = arith.mulf %299, %298 : vector<1x32xf32>
    %cst_117 = arith.constant 5.000000e-01 : f32
    %301 = vector.broadcast %cst_117 : f32 to vector<1x32xf32>
    %302 = arith.addf %300, %301 : vector<1x32xf32>
    %303 = vector.extract_strided_slice %255 {offsets = [0, 64], sizes = [1, 32], strides = [1, 1]} : vector<1x128xf32> to vector<1x32xf32>
    %304 = math.tanh %303 : vector<1x32xf32>
    %305 = vector.extract_strided_slice %255 {offsets = [0, 96], sizes = [1, 32], strides = [1, 1]} : vector<1x128xf32> to vector<1x32xf32>
    %cst_118 = arith.constant 5.000000e-01 : f32
    %306 = vector.broadcast %cst_118 : f32 to vector<1x32xf32>
    %307 = arith.mulf %306, %305 : vector<1x32xf32>
    %308 = math.tanh %307 : vector<1x32xf32>
    %cst_119 = arith.constant 5.000000e-01 : f32
    %309 = vector.broadcast %cst_119 : f32 to vector<1x32xf32>
    %310 = arith.mulf %309, %308 : vector<1x32xf32>
    %cst_120 = arith.constant 5.000000e-01 : f32
    %311 = vector.broadcast %cst_120 : f32 to vector<1x32xf32>
    %312 = arith.addf %310, %311 : vector<1x32xf32>
    %313 = arith.mulf %302, %238 : vector<1x32xf32>
    %314 = arith.mulf %294, %304 : vector<1x32xf32>
    %315 = arith.addf %313, %314 : vector<1x32xf32>
    %316 = math.tanh %315 : vector<1x32xf32>
    %317 = arith.mulf %312, %316 : vector<1x32xf32>
    %c0_i32_121 = arith.constant 0 : i32
    %318 = arith.addi %c3_i32, %c0_i32_121 : i32
    %319 = arith.index_cast %318 : i32 to index
    %c0_122 = arith.constant 0 : index
    %320 = vector.load %arg26[%319, %c0_122] : memref<8x64xf32, #tpu.memory_space<vmem>>, vector<1x32xf32>
    tpu.vector_store %arg26[%319, %c0_122], %286 {strides = array<i32>} : memref<8x64xf32, #tpu.memory_space<vmem>>, vector<1x32xf32>,
    %c0_i32_123 = arith.constant 0 : i32
    %321 = arith.addi %247, %c0_i32_123 : i32
    %322 = arith.index_cast %321 : i32 to index
    %c32_124 = arith.constant 32 : index
    %323 = vector.load %arg26[%322, %c32_124] : memref<8x64xf32, #tpu.memory_space<vmem>>, vector<1x32xf32>
    tpu.vector_store %arg26[%322, %c32_124], %317 {strides = array<i32>} : memref<8x64xf32, #tpu.memory_space<vmem>>, vector<1x32xf32>,
    %c4_i32 = arith.constant 4 : i32
    %c7_i32_125 = arith.constant 7 : i32
    %324 = arith.subi %c7_i32_125, %c4_i32 : i32
    %325 = arith.index_cast %c4_i32 : i32 to index
    %c0_126 = arith.constant 0 : index
    %326 = vector.load %arg28[%325, %c0_126] : memref<8x128xf32, #tpu.memory_space<vmem>>, vector<1x128xf32>
    %cst_127 = arith.constant dense<0.000000e+00> : vector<1x128xf32>
    %327 = tpu.matmul %286, %13, %cst_127 {dimension_numbers = #tpu.dot_dimension_numbers<[1], [0], [0], [1], [0, 0, 1, 1], [], []>} : vector<1x32xf32>, vector<32x128xf32>, vector<1x128xf32> -> vector<1x128xf32>
    %328 = arith.addf %326, %327 : vector<1x128xf32>
    %329 = arith.index_cast %324 : i32 to index
    %c0_128 = arith.constant 0 : index
    %330 = vector.load %arg29[%329, %c0_128] : memref<8x128xf32, #tpu.memory_space<vmem>>, vector<1x128xf32>
    %cst_129 = arith.constant dense<0.000000e+00> : vector<1x128xf32>
    %331 = tpu.matmul %317, %14, %cst_129 {dimension_numbers = #tpu.dot_dimension_numbers<[1], [0], [0], [1], [0, 0, 1, 1], [], []>} : vector<1x32xf32>, vector<32x128xf32>, vector<1x128xf32> -> vector<1x128xf32>
    %332 = arith.addf %330, %331 : vector<1x128xf32>
    %333 = vector.extract_strided_slice %328 {offsets = [0, 0], sizes = [1, 32], strides = [1, 1]} : vector<1x128xf32> to vector<1x32xf32>
    %cst_130 = arith.constant 5.000000e-01 : f32
    %334 = vector.broadcast %cst_130 : f32 to vector<1x32xf32>
    %335 = arith.mulf %334, %333 : vector<1x32xf32>
    %336 = math.tanh %335 : vector<1x32xf32>
    %cst_131 = arith.constant 5.000000e-01 : f32
    %337 = vector.broadcast %cst_131 : f32 to vector<1x32xf32>
    %338 = arith.mulf %337, %336 : vector<1x32xf32>
    %cst_132 = arith.constant 5.000000e-01 : f32
    %339 = vector.broadcast %cst_132 : f32 to vector<1x32xf32>
    %340 = arith.addf %338, %339 : vector<1x32xf32>
    %341 = vector.extract_strided_slice %328 {offsets = [0, 32], sizes = [1, 32], strides = [1, 1]} : vector<1x128xf32> to vector<1x32xf32>
    %cst_133 = arith.constant 5.000000e-01 : f32
    %342 = vector.broadcast %cst_133 : f32 to vector<1x32xf32>
    %343 = arith.mulf %342, %341 : vector<1x32xf32>
    %344 = math.tanh %343 : vector<1x32xf32>
    %cst_134 = arith.constant 5.000000e-01 : f32
    %345 = vector.broadcast %cst_134 : f32 to vector<1x32xf32>
    %346 = arith.mulf %345, %344 : vector<1x32xf32>
    %cst_135 = arith.constant 5.000000e-01 : f32
    %347 = vector.broadcast %cst_135 : f32 to vector<1x32xf32>
    %348 = arith.addf %346, %347 : vector<1x32xf32>
    %349 = vector.extract_strided_slice %328 {offsets = [0, 64], sizes = [1, 32], strides = [1, 1]} : vector<1x128xf32> to vector<1x32xf32>
    %350 = math.tanh %349 : vector<1x32xf32>
    %351 = vector.extract_strided_slice %328 {offsets = [0, 96], sizes = [1, 32], strides = [1, 1]} : vector<1x128xf32> to vector<1x32xf32>
    %cst_136 = arith.constant 5.000000e-01 : f32
    %352 = vector.broadcast %cst_136 : f32 to vector<1x32xf32>
    %353 = arith.mulf %352, %351 : vector<1x32xf32>
    %354 = math.tanh %353 : vector<1x32xf32>
    %cst_137 = arith.constant 5.000000e-01 : f32
    %355 = vector.broadcast %cst_137 : f32 to vector<1x32xf32>
    %356 = arith.mulf %355, %354 : vector<1x32xf32>
    %cst_138 = arith.constant 5.000000e-01 : f32
    %357 = vector.broadcast %cst_138 : f32 to vector<1x32xf32>
    %358 = arith.addf %356, %357 : vector<1x32xf32>
    %359 = arith.mulf %348, %284 : vector<1x32xf32>
    %360 = arith.mulf %340, %350 : vector<1x32xf32>
    %361 = arith.addf %359, %360 : vector<1x32xf32>
    %362 = math.tanh %361 : vector<1x32xf32>
    %363 = arith.mulf %358, %362 : vector<1x32xf32>
    %364 = vector.extract_strided_slice %332 {offsets = [0, 0], sizes = [1, 32], strides = [1, 1]} : vector<1x128xf32> to vector<1x32xf32>
    %cst_139 = arith.constant 5.000000e-01 : f32
    %365 = vector.broadcast %cst_139 : f32 to vector<1x32xf32>
    %366 = arith.mulf %365, %364 : vector<1x32xf32>
    %367 = math.tanh %366 : vector<1x32xf32>
    %cst_140 = arith.constant 5.000000e-01 : f32
    %368 = vector.broadcast %cst_140 : f32 to vector<1x32xf32>
    %369 = arith.mulf %368, %367 : vector<1x32xf32>
    %cst_141 = arith.constant 5.000000e-01 : f32
    %370 = vector.broadcast %cst_141 : f32 to vector<1x32xf32>
    %371 = arith.addf %369, %370 : vector<1x32xf32>
    %372 = vector.extract_strided_slice %332 {offsets = [0, 32], sizes = [1, 32], strides = [1, 1]} : vector<1x128xf32> to vector<1x32xf32>
    %cst_142 = arith.constant 5.000000e-01 : f32
    %373 = vector.broadcast %cst_142 : f32 to vector<1x32xf32>
    %374 = arith.mulf %373, %372 : vector<1x32xf32>
    %375 = math.tanh %374 : vector<1x32xf32>
    %cst_143 = arith.constant 5.000000e-01 : f32
    %376 = vector.broadcast %cst_143 : f32 to vector<1x32xf32>
    %377 = arith.mulf %376, %375 : vector<1x32xf32>
    %cst_144 = arith.constant 5.000000e-01 : f32
    %378 = vector.broadcast %cst_144 : f32 to vector<1x32xf32>
    %379 = arith.addf %377, %378 : vector<1x32xf32>
    %380 = vector.extract_strided_slice %332 {offsets = [0, 64], sizes = [1, 32], strides = [1, 1]} : vector<1x128xf32> to vector<1x32xf32>
    %381 = math.tanh %380 : vector<1x32xf32>
    %382 = vector.extract_strided_slice %332 {offsets = [0, 96], sizes = [1, 32], strides = [1, 1]} : vector<1x128xf32> to vector<1x32xf32>
    %cst_145 = arith.constant 5.000000e-01 : f32
    %383 = vector.broadcast %cst_145 : f32 to vector<1x32xf32>
    %384 = arith.mulf %383, %382 : vector<1x32xf32>
    %385 = math.tanh %384 : vector<1x32xf32>
    %cst_146 = arith.constant 5.000000e-01 : f32
    %386 = vector.broadcast %cst_146 : f32 to vector<1x32xf32>
    %387 = arith.mulf %386, %385 : vector<1x32xf32>
    %cst_147 = arith.constant 5.000000e-01 : f32
    %388 = vector.broadcast %cst_147 : f32 to vector<1x32xf32>
    %389 = arith.addf %387, %388 : vector<1x32xf32>
    %390 = arith.mulf %379, %315 : vector<1x32xf32>
    %391 = arith.mulf %371, %381 : vector<1x32xf32>
    %392 = arith.addf %390, %391 : vector<1x32xf32>
    %393 = math.tanh %392 : vector<1x32xf32>
    %394 = arith.mulf %389, %393 : vector<1x32xf32>
    %c0_i32_148 = arith.constant 0 : i32
    %395 = arith.addi %c4_i32, %c0_i32_148 : i32
    %396 = arith.index_cast %395 : i32 to index
    %c0_149 = arith.constant 0 : index
    %397 = vector.load %arg26[%396, %c0_149] : memref<8x64xf32, #tpu.memory_space<vmem>>, vector<1x32xf32>
    tpu.vector_store %arg26[%396, %c0_149], %363 {strides = array<i32>} : memref<8x64xf32, #tpu.memory_space<vmem>>, vector<1x32xf32>,
    %c0_i32_150 = arith.constant 0 : i32
    %398 = arith.addi %324, %c0_i32_150 : i32
    %399 = arith.index_cast %398 : i32 to index
    %c32_151 = arith.constant 32 : index
    %400 = vector.load %arg26[%399, %c32_151] : memref<8x64xf32, #tpu.memory_space<vmem>>, vector<1x32xf32>
    tpu.vector_store %arg26[%399, %c32_151], %394 {strides = array<i32>} : memref<8x64xf32, #tpu.memory_space<vmem>>, vector<1x32xf32>,
    %c5_i32 = arith.constant 5 : i32
    %c7_i32_152 = arith.constant 7 : i32
    %401 = arith.subi %c7_i32_152, %c5_i32 : i32
    %402 = arith.index_cast %c5_i32 : i32 to index
    %c0_153 = arith.constant 0 : index
    %403 = vector.load %arg28[%402, %c0_153] : memref<8x128xf32, #tpu.memory_space<vmem>>, vector<1x128xf32>
    %cst_154 = arith.constant dense<0.000000e+00> : vector<1x128xf32>
    %404 = tpu.matmul %363, %13, %cst_154 {dimension_numbers = #tpu.dot_dimension_numbers<[1], [0], [0], [1], [0, 0, 1, 1], [], []>} : vector<1x32xf32>, vector<32x128xf32>, vector<1x128xf32> -> vector<1x128xf32>
    %405 = arith.addf %403, %404 : vector<1x128xf32>
    %406 = arith.index_cast %401 : i32 to index
    %c0_155 = arith.constant 0 : index
    %407 = vector.load %arg29[%406, %c0_155] : memref<8x128xf32, #tpu.memory_space<vmem>>, vector<1x128xf32>
    %cst_156 = arith.constant dense<0.000000e+00> : vector<1x128xf32>
    %408 = tpu.matmul %394, %14, %cst_156 {dimension_numbers = #tpu.dot_dimension_numbers<[1], [0], [0], [1], [0, 0, 1, 1], [], []>} : vector<1x32xf32>, vector<32x128xf32>, vector<1x128xf32> -> vector<1x128xf32>
    %409 = arith.addf %407, %408 : vector<1x128xf32>
    %410 = vector.extract_strided_slice %405 {offsets = [0, 0], sizes = [1, 32], strides = [1, 1]} : vector<1x128xf32> to vector<1x32xf32>
    %cst_157 = arith.constant 5.000000e-01 : f32
    %411 = vector.broadcast %cst_157 : f32 to vector<1x32xf32>
    %412 = arith.mulf %411, %410 : vector<1x32xf32>
    %413 = math.tanh %412 : vector<1x32xf32>
    %cst_158 = arith.constant 5.000000e-01 : f32
    %414 = vector.broadcast %cst_158 : f32 to vector<1x32xf32>
    %415 = arith.mulf %414, %413 : vector<1x32xf32>
    %cst_159 = arith.constant 5.000000e-01 : f32
    %416 = vector.broadcast %cst_159 : f32 to vector<1x32xf32>
    %417 = arith.addf %415, %416 : vector<1x32xf32>
    %418 = vector.extract_strided_slice %405 {offsets = [0, 32], sizes = [1, 32], strides = [1, 1]} : vector<1x128xf32> to vector<1x32xf32>
    %cst_160 = arith.constant 5.000000e-01 : f32
    %419 = vector.broadcast %cst_160 : f32 to vector<1x32xf32>
    %420 = arith.mulf %419, %418 : vector<1x32xf32>
    %421 = math.tanh %420 : vector<1x32xf32>
    %cst_161 = arith.constant 5.000000e-01 : f32
    %422 = vector.broadcast %cst_161 : f32 to vector<1x32xf32>
    %423 = arith.mulf %422, %421 : vector<1x32xf32>
    %cst_162 = arith.constant 5.000000e-01 : f32
    %424 = vector.broadcast %cst_162 : f32 to vector<1x32xf32>
    %425 = arith.addf %423, %424 : vector<1x32xf32>
    %426 = vector.extract_strided_slice %405 {offsets = [0, 64], sizes = [1, 32], strides = [1, 1]} : vector<1x128xf32> to vector<1x32xf32>
    %427 = math.tanh %426 : vector<1x32xf32>
    %428 = vector.extract_strided_slice %405 {offsets = [0, 96], sizes = [1, 32], strides = [1, 1]} : vector<1x128xf32> to vector<1x32xf32>
    %cst_163 = arith.constant 5.000000e-01 : f32
    %429 = vector.broadcast %cst_163 : f32 to vector<1x32xf32>
    %430 = arith.mulf %429, %428 : vector<1x32xf32>
    %431 = math.tanh %430 : vector<1x32xf32>
    %cst_164 = arith.constant 5.000000e-01 : f32
    %432 = vector.broadcast %cst_164 : f32 to vector<1x32xf32>
    %433 = arith.mulf %432, %431 : vector<1x32xf32>
    %cst_165 = arith.constant 5.000000e-01 : f32
    %434 = vector.broadcast %cst_165 : f32 to vector<1x32xf32>
    %435 = arith.addf %433, %434 : vector<1x32xf32>
    %436 = arith.mulf %425, %361 : vector<1x32xf32>
    %437 = arith.mulf %417, %427 : vector<1x32xf32>
    %438 = arith.addf %436, %437 : vector<1x32xf32>
    %439 = math.tanh %438 : vector<1x32xf32>
    %440 = arith.mulf %435, %439 : vector<1x32xf32>
    %441 = vector.extract_strided_slice %409 {offsets = [0, 0], sizes = [1, 32], strides = [1, 1]} : vector<1x128xf32> to vector<1x32xf32>
    %cst_166 = arith.constant 5.000000e-01 : f32
    %442 = vector.broadcast %cst_166 : f32 to vector<1x32xf32>
    %443 = arith.mulf %442, %441 : vector<1x32xf32>
    %444 = math.tanh %443 : vector<1x32xf32>
    %cst_167 = arith.constant 5.000000e-01 : f32
    %445 = vector.broadcast %cst_167 : f32 to vector<1x32xf32>
    %446 = arith.mulf %445, %444 : vector<1x32xf32>
    %cst_168 = arith.constant 5.000000e-01 : f32
    %447 = vector.broadcast %cst_168 : f32 to vector<1x32xf32>
    %448 = arith.addf %446, %447 : vector<1x32xf32>
    %449 = vector.extract_strided_slice %409 {offsets = [0, 32], sizes = [1, 32], strides = [1, 1]} : vector<1x128xf32> to vector<1x32xf32>
    %cst_169 = arith.constant 5.000000e-01 : f32
    %450 = vector.broadcast %cst_169 : f32 to vector<1x32xf32>
    %451 = arith.mulf %450, %449 : vector<1x32xf32>
    %452 = math.tanh %451 : vector<1x32xf32>
    %cst_170 = arith.constant 5.000000e-01 : f32
    %453 = vector.broadcast %cst_170 : f32 to vector<1x32xf32>
    %454 = arith.mulf %453, %452 : vector<1x32xf32>
    %cst_171 = arith.constant 5.000000e-01 : f32
    %455 = vector.broadcast %cst_171 : f32 to vector<1x32xf32>
    %456 = arith.addf %454, %455 : vector<1x32xf32>
    %457 = vector.extract_strided_slice %409 {offsets = [0, 64], sizes = [1, 32], strides = [1, 1]} : vector<1x128xf32> to vector<1x32xf32>
    %458 = math.tanh %457 : vector<1x32xf32>
    %459 = vector.extract_strided_slice %409 {offsets = [0, 96], sizes = [1, 32], strides = [1, 1]} : vector<1x128xf32> to vector<1x32xf32>
    %cst_172 = arith.constant 5.000000e-01 : f32
    %460 = vector.broadcast %cst_172 : f32 to vector<1x32xf32>
    %461 = arith.mulf %460, %459 : vector<1x32xf32>
    %462 = math.tanh %461 : vector<1x32xf32>
    %cst_173 = arith.constant 5.000000e-01 : f32
    %463 = vector.broadcast %cst_173 : f32 to vector<1x32xf32>
    %464 = arith.mulf %463, %462 : vector<1x32xf32>
    %cst_174 = arith.constant 5.000000e-01 : f32
    %465 = vector.broadcast %cst_174 : f32 to vector<1x32xf32>
    %466 = arith.addf %464, %465 : vector<1x32xf32>
    %467 = arith.mulf %456, %392 : vector<1x32xf32>
    %468 = arith.mulf %448, %458 : vector<1x32xf32>
    %469 = arith.addf %467, %468 : vector<1x32xf32>
    %470 = math.tanh %469 : vector<1x32xf32>
    %471 = arith.mulf %466, %470 : vector<1x32xf32>
    %c0_i32_175 = arith.constant 0 : i32
    %472 = arith.addi %c5_i32, %c0_i32_175 : i32
    %473 = arith.index_cast %472 : i32 to index
    %c0_176 = arith.constant 0 : index
    %474 = vector.load %arg26[%473, %c0_176] : memref<8x64xf32, #tpu.memory_space<vmem>>, vector<1x32xf32>
    tpu.vector_store %arg26[%473, %c0_176], %440 {strides = array<i32>} : memref<8x64xf32, #tpu.memory_space<vmem>>, vector<1x32xf32>,
    %c0_i32_177 = arith.constant 0 : i32
    %475 = arith.addi %401, %c0_i32_177 : i32
    %476 = arith.index_cast %475 : i32 to index
    %c32_178 = arith.constant 32 : index
    %477 = vector.load %arg26[%476, %c32_178] : memref<8x64xf32, #tpu.memory_space<vmem>>, vector<1x32xf32>
    tpu.vector_store %arg26[%476, %c32_178], %471 {strides = array<i32>} : memref<8x64xf32, #tpu.memory_space<vmem>>, vector<1x32xf32>,
    %c6_i32 = arith.constant 6 : i32
    %c7_i32_179 = arith.constant 7 : i32
    %478 = arith.subi %c7_i32_179, %c6_i32 : i32
    %479 = arith.index_cast %c6_i32 : i32 to index
    %c0_180 = arith.constant 0 : index
    %480 = vector.load %arg28[%479, %c0_180] : memref<8x128xf32, #tpu.memory_space<vmem>>, vector<1x128xf32>
    %cst_181 = arith.constant dense<0.000000e+00> : vector<1x128xf32>
    %481 = tpu.matmul %440, %13, %cst_181 {dimension_numbers = #tpu.dot_dimension_numbers<[1], [0], [0], [1], [0, 0, 1, 1], [], []>} : vector<1x32xf32>, vector<32x128xf32>, vector<1x128xf32> -> vector<1x128xf32>
    %482 = arith.addf %480, %481 : vector<1x128xf32>
    %483 = arith.index_cast %478 : i32 to index
    %c0_182 = arith.constant 0 : index
    %484 = vector.load %arg29[%483, %c0_182] : memref<8x128xf32, #tpu.memory_space<vmem>>, vector<1x128xf32>
    %cst_183 = arith.constant dense<0.000000e+00> : vector<1x128xf32>
    %485 = tpu.matmul %471, %14, %cst_183 {dimension_numbers = #tpu.dot_dimension_numbers<[1], [0], [0], [1], [0, 0, 1, 1], [], []>} : vector<1x32xf32>, vector<32x128xf32>, vector<1x128xf32> -> vector<1x128xf32>
    %486 = arith.addf %484, %485 : vector<1x128xf32>
    %487 = vector.extract_strided_slice %482 {offsets = [0, 0], sizes = [1, 32], strides = [1, 1]} : vector<1x128xf32> to vector<1x32xf32>
    %cst_184 = arith.constant 5.000000e-01 : f32
    %488 = vector.broadcast %cst_184 : f32 to vector<1x32xf32>
    %489 = arith.mulf %488, %487 : vector<1x32xf32>
    %490 = math.tanh %489 : vector<1x32xf32>
    %cst_185 = arith.constant 5.000000e-01 : f32
    %491 = vector.broadcast %cst_185 : f32 to vector<1x32xf32>
    %492 = arith.mulf %491, %490 : vector<1x32xf32>
    %cst_186 = arith.constant 5.000000e-01 : f32
    %493 = vector.broadcast %cst_186 : f32 to vector<1x32xf32>
    %494 = arith.addf %492, %493 : vector<1x32xf32>
    %495 = vector.extract_strided_slice %482 {offsets = [0, 32], sizes = [1, 32], strides = [1, 1]} : vector<1x128xf32> to vector<1x32xf32>
    %cst_187 = arith.constant 5.000000e-01 : f32
    %496 = vector.broadcast %cst_187 : f32 to vector<1x32xf32>
    %497 = arith.mulf %496, %495 : vector<1x32xf32>
    %498 = math.tanh %497 : vector<1x32xf32>
    %cst_188 = arith.constant 5.000000e-01 : f32
    %499 = vector.broadcast %cst_188 : f32 to vector<1x32xf32>
    %500 = arith.mulf %499, %498 : vector<1x32xf32>
    %cst_189 = arith.constant 5.000000e-01 : f32
    %501 = vector.broadcast %cst_189 : f32 to vector<1x32xf32>
    %502 = arith.addf %500, %501 : vector<1x32xf32>
    %503 = vector.extract_strided_slice %482 {offsets = [0, 64], sizes = [1, 32], strides = [1, 1]} : vector<1x128xf32> to vector<1x32xf32>
    %504 = math.tanh %503 : vector<1x32xf32>
    %505 = vector.extract_strided_slice %482 {offsets = [0, 96], sizes = [1, 32], strides = [1, 1]} : vector<1x128xf32> to vector<1x32xf32>
    %cst_190 = arith.constant 5.000000e-01 : f32
    %506 = vector.broadcast %cst_190 : f32 to vector<1x32xf32>
    %507 = arith.mulf %506, %505 : vector<1x32xf32>
    %508 = math.tanh %507 : vector<1x32xf32>
    %cst_191 = arith.constant 5.000000e-01 : f32
    %509 = vector.broadcast %cst_191 : f32 to vector<1x32xf32>
    %510 = arith.mulf %509, %508 : vector<1x32xf32>
    %cst_192 = arith.constant 5.000000e-01 : f32
    %511 = vector.broadcast %cst_192 : f32 to vector<1x32xf32>
    %512 = arith.addf %510, %511 : vector<1x32xf32>
    %513 = arith.mulf %502, %438 : vector<1x32xf32>
    %514 = arith.mulf %494, %504 : vector<1x32xf32>
    %515 = arith.addf %513, %514 : vector<1x32xf32>
    %516 = math.tanh %515 : vector<1x32xf32>
    %517 = arith.mulf %512, %516 : vector<1x32xf32>
    %518 = vector.extract_strided_slice %486 {offsets = [0, 0], sizes = [1, 32], strides = [1, 1]} : vector<1x128xf32> to vector<1x32xf32>
    %cst_193 = arith.constant 5.000000e-01 : f32
    %519 = vector.broadcast %cst_193 : f32 to vector<1x32xf32>
    %520 = arith.mulf %519, %518 : vector<1x32xf32>
    %521 = math.tanh %520 : vector<1x32xf32>
    %cst_194 = arith.constant 5.000000e-01 : f32
    %522 = vector.broadcast %cst_194 : f32 to vector<1x32xf32>
    %523 = arith.mulf %522, %521 : vector<1x32xf32>
    %cst_195 = arith.constant 5.000000e-01 : f32
    %524 = vector.broadcast %cst_195 : f32 to vector<1x32xf32>
    %525 = arith.addf %523, %524 : vector<1x32xf32>
    %526 = vector.extract_strided_slice %486 {offsets = [0, 32], sizes = [1, 32], strides = [1, 1]} : vector<1x128xf32> to vector<1x32xf32>
    %cst_196 = arith.constant 5.000000e-01 : f32
    %527 = vector.broadcast %cst_196 : f32 to vector<1x32xf32>
    %528 = arith.mulf %527, %526 : vector<1x32xf32>
    %529 = math.tanh %528 : vector<1x32xf32>
    %cst_197 = arith.constant 5.000000e-01 : f32
    %530 = vector.broadcast %cst_197 : f32 to vector<1x32xf32>
    %531 = arith.mulf %530, %529 : vector<1x32xf32>
    %cst_198 = arith.constant 5.000000e-01 : f32
    %532 = vector.broadcast %cst_198 : f32 to vector<1x32xf32>
    %533 = arith.addf %531, %532 : vector<1x32xf32>
    %534 = vector.extract_strided_slice %486 {offsets = [0, 64], sizes = [1, 32], strides = [1, 1]} : vector<1x128xf32> to vector<1x32xf32>
    %535 = math.tanh %534 : vector<1x32xf32>
    %536 = vector.extract_strided_slice %486 {offsets = [0, 96], sizes = [1, 32], strides = [1, 1]} : vector<1x128xf32> to vector<1x32xf32>
    %cst_199 = arith.constant 5.000000e-01 : f32
    %537 = vector.broadcast %cst_199 : f32 to vector<1x32xf32>
    %538 = arith.mulf %537, %536 : vector<1x32xf32>
    %539 = math.tanh %538 : vector<1x32xf32>
    %cst_200 = arith.constant 5.000000e-01 : f32
    %540 = vector.broadcast %cst_200 : f32 to vector<1x32xf32>
    %541 = arith.mulf %540, %539 : vector<1x32xf32>
    %cst_201 = arith.constant 5.000000e-01 : f32
    %542 = vector.broadcast %cst_201 : f32 to vector<1x32xf32>
    %543 = arith.addf %541, %542 : vector<1x32xf32>
    %544 = arith.mulf %533, %469 : vector<1x32xf32>
    %545 = arith.mulf %525, %535 : vector<1x32xf32>
    %546 = arith.addf %544, %545 : vector<1x32xf32>
    %547 = math.tanh %546 : vector<1x32xf32>
    %548 = arith.mulf %543, %547 : vector<1x32xf32>
    %c0_i32_202 = arith.constant 0 : i32
    %549 = arith.addi %c6_i32, %c0_i32_202 : i32
    %550 = arith.index_cast %549 : i32 to index
    %c0_203 = arith.constant 0 : index
    %551 = vector.load %arg26[%550, %c0_203] : memref<8x64xf32, #tpu.memory_space<vmem>>, vector<1x32xf32>
    tpu.vector_store %arg26[%550, %c0_203], %517 {strides = array<i32>} : memref<8x64xf32, #tpu.memory_space<vmem>>, vector<1x32xf32>,
    %c0_i32_204 = arith.constant 0 : i32
    %552 = arith.addi %478, %c0_i32_204 : i32
    %553 = arith.index_cast %552 : i32 to index
    %c32_205 = arith.constant 32 : index
    %554 = vector.load %arg26[%553, %c32_205] : memref<8x64xf32, #tpu.memory_space<vmem>>, vector<1x32xf32>
    tpu.vector_store %arg26[%553, %c32_205], %548 {strides = array<i32>} : memref<8x64xf32, #tpu.memory_space<vmem>>, vector<1x32xf32>,
    %c7_i32_206 = arith.constant 7 : i32
    %c7_i32_207 = arith.constant 7 : i32
    %555 = arith.subi %c7_i32_207, %c7_i32_206 : i32
    %556 = arith.index_cast %c7_i32_206 : i32 to index
    %c0_208 = arith.constant 0 : index
    %557 = vector.load %arg28[%556, %c0_208] : memref<8x128xf32, #tpu.memory_space<vmem>>, vector<1x128xf32>
    %cst_209 = arith.constant dense<0.000000e+00> : vector<1x128xf32>
    %558 = tpu.matmul %517, %13, %cst_209 {dimension_numbers = #tpu.dot_dimension_numbers<[1], [0], [0], [1], [0, 0, 1, 1], [], []>} : vector<1x32xf32>, vector<32x128xf32>, vector<1x128xf32> -> vector<1x128xf32>
    %559 = arith.addf %557, %558 : vector<1x128xf32>
    %560 = arith.index_cast %555 : i32 to index
    %c0_210 = arith.constant 0 : index
    %561 = vector.load %arg29[%560, %c0_210] : memref<8x128xf32, #tpu.memory_space<vmem>>, vector<1x128xf32>
    %cst_211 = arith.constant dense<0.000000e+00> : vector<1x128xf32>
    %562 = tpu.matmul %548, %14, %cst_211 {dimension_numbers = #tpu.dot_dimension_numbers<[1], [0], [0], [1], [0, 0, 1, 1], [], []>} : vector<1x32xf32>, vector<32x128xf32>, vector<1x128xf32> -> vector<1x128xf32>
    %563 = arith.addf %561, %562 : vector<1x128xf32>
    %564 = vector.extract_strided_slice %559 {offsets = [0, 0], sizes = [1, 32], strides = [1, 1]} : vector<1x128xf32> to vector<1x32xf32>
    %cst_212 = arith.constant 5.000000e-01 : f32
    %565 = vector.broadcast %cst_212 : f32 to vector<1x32xf32>
    %566 = arith.mulf %565, %564 : vector<1x32xf32>
    %567 = math.tanh %566 : vector<1x32xf32>
    %cst_213 = arith.constant 5.000000e-01 : f32
    %568 = vector.broadcast %cst_213 : f32 to vector<1x32xf32>
    %569 = arith.mulf %568, %567 : vector<1x32xf32>
    %cst_214 = arith.constant 5.000000e-01 : f32
    %570 = vector.broadcast %cst_214 : f32 to vector<1x32xf32>
    %571 = arith.addf %569, %570 : vector<1x32xf32>
    %572 = vector.extract_strided_slice %559 {offsets = [0, 32], sizes = [1, 32], strides = [1, 1]} : vector<1x128xf32> to vector<1x32xf32>
    %cst_215 = arith.constant 5.000000e-01 : f32
    %573 = vector.broadcast %cst_215 : f32 to vector<1x32xf32>
    %574 = arith.mulf %573, %572 : vector<1x32xf32>
    %575 = math.tanh %574 : vector<1x32xf32>
    %cst_216 = arith.constant 5.000000e-01 : f32
    %576 = vector.broadcast %cst_216 : f32 to vector<1x32xf32>
    %577 = arith.mulf %576, %575 : vector<1x32xf32>
    %cst_217 = arith.constant 5.000000e-01 : f32
    %578 = vector.broadcast %cst_217 : f32 to vector<1x32xf32>
    %579 = arith.addf %577, %578 : vector<1x32xf32>
    %580 = vector.extract_strided_slice %559 {offsets = [0, 64], sizes = [1, 32], strides = [1, 1]} : vector<1x128xf32> to vector<1x32xf32>
    %581 = math.tanh %580 : vector<1x32xf32>
    %582 = vector.extract_strided_slice %559 {offsets = [0, 96], sizes = [1, 32], strides = [1, 1]} : vector<1x128xf32> to vector<1x32xf32>
    %cst_218 = arith.constant 5.000000e-01 : f32
    %583 = vector.broadcast %cst_218 : f32 to vector<1x32xf32>
    %584 = arith.mulf %583, %582 : vector<1x32xf32>
    %585 = math.tanh %584 : vector<1x32xf32>
    %cst_219 = arith.constant 5.000000e-01 : f32
    %586 = vector.broadcast %cst_219 : f32 to vector<1x32xf32>
    %587 = arith.mulf %586, %585 : vector<1x32xf32>
    %cst_220 = arith.constant 5.000000e-01 : f32
    %588 = vector.broadcast %cst_220 : f32 to vector<1x32xf32>
    %589 = arith.addf %587, %588 : vector<1x32xf32>
    %590 = arith.mulf %579, %515 : vector<1x32xf32>
    %591 = arith.mulf %571, %581 : vector<1x32xf32>
    %592 = arith.addf %590, %591 : vector<1x32xf32>
    %593 = math.tanh %592 : vector<1x32xf32>
    %594 = arith.mulf %589, %593 : vector<1x32xf32>
    %595 = vector.extract_strided_slice %563 {offsets = [0, 0], sizes = [1, 32], strides = [1, 1]} : vector<1x128xf32> to vector<1x32xf32>
    %cst_221 = arith.constant 5.000000e-01 : f32
    %596 = vector.broadcast %cst_221 : f32 to vector<1x32xf32>
    %597 = arith.mulf %596, %595 : vector<1x32xf32>
    %598 = math.tanh %597 : vector<1x32xf32>
    %cst_222 = arith.constant 5.000000e-01 : f32
    %599 = vector.broadcast %cst_222 : f32 to vector<1x32xf32>
    %600 = arith.mulf %599, %598 : vector<1x32xf32>
    %cst_223 = arith.constant 5.000000e-01 : f32
    %601 = vector.broadcast %cst_223 : f32 to vector<1x32xf32>
    %602 = arith.addf %600, %601 : vector<1x32xf32>
    %603 = vector.extract_strided_slice %563 {offsets = [0, 32], sizes = [1, 32], strides = [1, 1]} : vector<1x128xf32> to vector<1x32xf32>
    %cst_224 = arith.constant 5.000000e-01 : f32
    %604 = vector.broadcast %cst_224 : f32 to vector<1x32xf32>
    %605 = arith.mulf %604, %603 : vector<1x32xf32>
    %606 = math.tanh %605 : vector<1x32xf32>
    %cst_225 = arith.constant 5.000000e-01 : f32
    %607 = vector.broadcast %cst_225 : f32 to vector<1x32xf32>
    %608 = arith.mulf %607, %606 : vector<1x32xf32>
    %cst_226 = arith.constant 5.000000e-01 : f32
    %609 = vector.broadcast %cst_226 : f32 to vector<1x32xf32>
    %610 = arith.addf %608, %609 : vector<1x32xf32>
    %611 = vector.extract_strided_slice %563 {offsets = [0, 64], sizes = [1, 32], strides = [1, 1]} : vector<1x128xf32> to vector<1x32xf32>
    %612 = math.tanh %611 : vector<1x32xf32>
    %613 = vector.extract_strided_slice %563 {offsets = [0, 96], sizes = [1, 32], strides = [1, 1]} : vector<1x128xf32> to vector<1x32xf32>
    %cst_227 = arith.constant 5.000000e-01 : f32
    %614 = vector.broadcast %cst_227 : f32 to vector<1x32xf32>
    %615 = arith.mulf %614, %613 : vector<1x32xf32>
    %616 = math.tanh %615 : vector<1x32xf32>
    %cst_228 = arith.constant 5.000000e-01 : f32
    %617 = vector.broadcast %cst_228 : f32 to vector<1x32xf32>
    %618 = arith.mulf %617, %616 : vector<1x32xf32>
    %cst_229 = arith.constant 5.000000e-01 : f32
    %619 = vector.broadcast %cst_229 : f32 to vector<1x32xf32>
    %620 = arith.addf %618, %619 : vector<1x32xf32>
    %621 = arith.mulf %610, %546 : vector<1x32xf32>
    %622 = arith.mulf %602, %612 : vector<1x32xf32>
    %623 = arith.addf %621, %622 : vector<1x32xf32>
    %624 = math.tanh %623 : vector<1x32xf32>
    %625 = arith.mulf %620, %624 : vector<1x32xf32>
    %c0_i32_230 = arith.constant 0 : i32
    %626 = arith.addi %c7_i32_206, %c0_i32_230 : i32
    %627 = arith.index_cast %626 : i32 to index
    %c0_231 = arith.constant 0 : index
    %628 = vector.load %arg26[%627, %c0_231] : memref<8x64xf32, #tpu.memory_space<vmem>>, vector<1x32xf32>
    tpu.vector_store %arg26[%627, %c0_231], %594 {strides = array<i32>} : memref<8x64xf32, #tpu.memory_space<vmem>>, vector<1x32xf32>,
    %c0_i32_232 = arith.constant 0 : i32
    %629 = arith.addi %555, %c0_i32_232 : i32
    %630 = arith.index_cast %629 : i32 to index
    %c32_233 = arith.constant 32 : index
    %631 = vector.load %arg26[%630, %c32_233] : memref<8x64xf32, #tpu.memory_space<vmem>>, vector<1x32xf32>
    tpu.vector_store %arg26[%630, %c32_233], %625 {strides = array<i32>} : memref<8x64xf32, #tpu.memory_space<vmem>>, vector<1x32xf32>,
    %c8_i32 = arith.constant 8 : i32
    %cst_234 = arith.constant 0.000000e+00 : f32
    %632 = vector.broadcast %cst_234 : f32 to vector<1x64xf32>
    %c0_235 = arith.constant 0 : index
    %c0_236 = arith.constant 0 : index
    %633 = vector.load %arg27[%c0_235, %c0_236] : memref<9x64xf32, #tpu.memory_space<vmem>>, vector<1x64xf32>
    tpu.vector_store %arg27[%c0_235, %c0_236], %632 {strides = array<i32>} : memref<9x64xf32, #tpu.memory_space<vmem>>, vector<1x64xf32>,
    %c0_237 = arith.constant 0 : index
    %c0_238 = arith.constant 0 : index
    %634 = vector.load %arg26[%c0_237, %c0_238] : memref<8x64xf32, #tpu.memory_space<vmem>>, vector<8x64xf32>
    %c0_239 = arith.constant 0 : index
    %c0_240 = arith.constant 0 : index
    %635 = vector.load %arg8[%c0_239, %c0_240] : memref<64x128xf32, #tpu.memory_space<vmem>>, vector<64x128xf32>
    %cst_241 = arith.constant dense<0.000000e+00> : vector<8x128xf32>
    %636 = tpu.matmul %634, %635, %cst_241 {dimension_numbers = #tpu.dot_dimension_numbers<[1], [0], [0], [1], [0, 0, 1, 1], [], []>} : vector<8x64xf32>, vector<64x128xf32>, vector<8x128xf32> -> vector<8x128xf32>
    %c0_242 = arith.constant 0 : index
    %c0_243 = arith.constant 0 : index
    %637 = vector.load %arg10[%c0_242, %c0_243] : memref<1x128xf32, #tpu.memory_space<vmem>>, vector<1x128xf32>
    %638 = vector.broadcast %637 : vector<1x128xf32> to vector<8x128xf32>
    %639 = arith.addf %636, %638 : vector<8x128xf32>
    %c0_244 = arith.constant 0 : index
    %c0_245 = arith.constant 0 : index
    %640 = vector.load %arg28[%c0_244, %c0_245] : memref<8x128xf32, #tpu.memory_space<vmem>>, vector<8x128xf32>
    tpu.vector_store %arg28[%c0_244, %c0_245], %639 {strides = array<i32>} : memref<8x128xf32, #tpu.memory_space<vmem>>, vector<8x128xf32>,
    %c0_246 = arith.constant 0 : index
    %c0_247 = arith.constant 0 : index
    %641 = vector.load %arg11[%c0_246, %c0_247] : memref<64x128xf32, #tpu.memory_space<vmem>>, vector<64x128xf32>
    %cst_248 = arith.constant dense<0.000000e+00> : vector<8x128xf32>
    %642 = tpu.matmul %634, %641, %cst_248 {dimension_numbers = #tpu.dot_dimension_numbers<[1], [0], [0], [1], [0, 0, 1, 1], [], []>} : vector<8x64xf32>, vector<64x128xf32>, vector<8x128xf32> -> vector<8x128xf32>
    %c0_249 = arith.constant 0 : index
    %c0_250 = arith.constant 0 : index
    %643 = vector.load %arg13[%c0_249, %c0_250] : memref<1x128xf32, #tpu.memory_space<vmem>>, vector<1x128xf32>
    %644 = vector.broadcast %643 : vector<1x128xf32> to vector<8x128xf32>
    %645 = arith.addf %642, %644 : vector<8x128xf32>
    %c0_251 = arith.constant 0 : index
    %c0_252 = arith.constant 0 : index
    %646 = vector.load %arg29[%c0_251, %c0_252] : memref<8x128xf32, #tpu.memory_space<vmem>>, vector<8x128xf32>
    tpu.vector_store %arg29[%c0_251, %c0_252], %645 {strides = array<i32>} : memref<8x128xf32, #tpu.memory_space<vmem>>, vector<8x128xf32>,
    %c0_253 = arith.constant 0 : index
    %c0_254 = arith.constant 0 : index
    %647 = vector.load %arg9[%c0_253, %c0_254] : memref<32x128xf32, #tpu.memory_space<vmem>>, vector<32x128xf32>
    %c0_255 = arith.constant 0 : index
    %c0_256 = arith.constant 0 : index
    %648 = vector.load %arg12[%c0_255, %c0_256] : memref<32x128xf32, #tpu.memory_space<vmem>>, vector<32x128xf32>
    %cst_257 = arith.constant 0.000000e+00 : f32
    %649 = vector.broadcast %cst_257 : f32 to vector<1x32xf32>
    %c0_i32_258 = arith.constant 0 : i32
    %c7_i32_259 = arith.constant 7 : i32
    %650 = arith.subi %c7_i32_259, %c0_i32_258 : i32
    %651 = arith.index_cast %c0_i32_258 : i32 to index
    %c0_260 = arith.constant 0 : index
    %652 = vector.load %arg28[%651, %c0_260] : memref<8x128xf32, #tpu.memory_space<vmem>>, vector<1x128xf32>
    %cst_261 = arith.constant dense<0.000000e+00> : vector<1x128xf32>
    %653 = tpu.matmul %649, %647, %cst_261 {dimension_numbers = #tpu.dot_dimension_numbers<[1], [0], [0], [1], [0, 0, 1, 1], [], []>} : vector<1x32xf32>, vector<32x128xf32>, vector<1x128xf32> -> vector<1x128xf32>
    %654 = arith.addf %652, %653 : vector<1x128xf32>
    %655 = arith.index_cast %650 : i32 to index
    %c0_262 = arith.constant 0 : index
    %656 = vector.load %arg29[%655, %c0_262] : memref<8x128xf32, #tpu.memory_space<vmem>>, vector<1x128xf32>
    %cst_263 = arith.constant dense<0.000000e+00> : vector<1x128xf32>
    %657 = tpu.matmul %649, %648, %cst_263 {dimension_numbers = #tpu.dot_dimension_numbers<[1], [0], [0], [1], [0, 0, 1, 1], [], []>} : vector<1x32xf32>, vector<32x128xf32>, vector<1x128xf32> -> vector<1x128xf32>
    %658 = arith.addf %656, %657 : vector<1x128xf32>
    %659 = vector.extract_strided_slice %654 {offsets = [0, 0], sizes = [1, 32], strides = [1, 1]} : vector<1x128xf32> to vector<1x32xf32>
    %cst_264 = arith.constant 5.000000e-01 : f32
    %660 = vector.broadcast %cst_264 : f32 to vector<1x32xf32>
    %661 = arith.mulf %660, %659 : vector<1x32xf32>
    %662 = math.tanh %661 : vector<1x32xf32>
    %cst_265 = arith.constant 5.000000e-01 : f32
    %663 = vector.broadcast %cst_265 : f32 to vector<1x32xf32>
    %664 = arith.mulf %663, %662 : vector<1x32xf32>
    %cst_266 = arith.constant 5.000000e-01 : f32
    %665 = vector.broadcast %cst_266 : f32 to vector<1x32xf32>
    %666 = arith.addf %664, %665 : vector<1x32xf32>
    %667 = vector.extract_strided_slice %654 {offsets = [0, 32], sizes = [1, 32], strides = [1, 1]} : vector<1x128xf32> to vector<1x32xf32>
    %cst_267 = arith.constant 5.000000e-01 : f32
    %668 = vector.broadcast %cst_267 : f32 to vector<1x32xf32>
    %669 = arith.mulf %668, %667 : vector<1x32xf32>
    %670 = math.tanh %669 : vector<1x32xf32>
    %cst_268 = arith.constant 5.000000e-01 : f32
    %671 = vector.broadcast %cst_268 : f32 to vector<1x32xf32>
    %672 = arith.mulf %671, %670 : vector<1x32xf32>
    %cst_269 = arith.constant 5.000000e-01 : f32
    %673 = vector.broadcast %cst_269 : f32 to vector<1x32xf32>
    %674 = arith.addf %672, %673 : vector<1x32xf32>
    %675 = vector.extract_strided_slice %654 {offsets = [0, 64], sizes = [1, 32], strides = [1, 1]} : vector<1x128xf32> to vector<1x32xf32>
    %676 = math.tanh %675 : vector<1x32xf32>
    %677 = vector.extract_strided_slice %654 {offsets = [0, 96], sizes = [1, 32], strides = [1, 1]} : vector<1x128xf32> to vector<1x32xf32>
    %cst_270 = arith.constant 5.000000e-01 : f32
    %678 = vector.broadcast %cst_270 : f32 to vector<1x32xf32>
    %679 = arith.mulf %678, %677 : vector<1x32xf32>
    %680 = math.tanh %679 : vector<1x32xf32>
    %cst_271 = arith.constant 5.000000e-01 : f32
    %681 = vector.broadcast %cst_271 : f32 to vector<1x32xf32>
    %682 = arith.mulf %681, %680 : vector<1x32xf32>
    %cst_272 = arith.constant 5.000000e-01 : f32
    %683 = vector.broadcast %cst_272 : f32 to vector<1x32xf32>
    %684 = arith.addf %682, %683 : vector<1x32xf32>
    %685 = arith.mulf %674, %649 : vector<1x32xf32>
    %686 = arith.mulf %666, %676 : vector<1x32xf32>
    %687 = arith.addf %685, %686 : vector<1x32xf32>
    %688 = math.tanh %687 : vector<1x32xf32>
    %689 = arith.mulf %684, %688 : vector<1x32xf32>
    %690 = vector.extract_strided_slice %658 {offsets = [0, 0], sizes = [1, 32], strides = [1, 1]} : vector<1x128xf32> to vector<1x32xf32>
    %cst_273 = arith.constant 5.000000e-01 : f32
    %691 = vector.broadcast %cst_273 : f32 to vector<1x32xf32>
    %692 = arith.mulf %691, %690 : vector<1x32xf32>
    %693 = math.tanh %692 : vector<1x32xf32>
    %cst_274 = arith.constant 5.000000e-01 : f32
    %694 = vector.broadcast %cst_274 : f32 to vector<1x32xf32>
    %695 = arith.mulf %694, %693 : vector<1x32xf32>
    %cst_275 = arith.constant 5.000000e-01 : f32
    %696 = vector.broadcast %cst_275 : f32 to vector<1x32xf32>
    %697 = arith.addf %695, %696 : vector<1x32xf32>
    %698 = vector.extract_strided_slice %658 {offsets = [0, 32], sizes = [1, 32], strides = [1, 1]} : vector<1x128xf32> to vector<1x32xf32>
    %cst_276 = arith.constant 5.000000e-01 : f32
    %699 = vector.broadcast %cst_276 : f32 to vector<1x32xf32>
    %700 = arith.mulf %699, %698 : vector<1x32xf32>
    %701 = math.tanh %700 : vector<1x32xf32>
    %cst_277 = arith.constant 5.000000e-01 : f32
    %702 = vector.broadcast %cst_277 : f32 to vector<1x32xf32>
    %703 = arith.mulf %702, %701 : vector<1x32xf32>
    %cst_278 = arith.constant 5.000000e-01 : f32
    %704 = vector.broadcast %cst_278 : f32 to vector<1x32xf32>
    %705 = arith.addf %703, %704 : vector<1x32xf32>
    %706 = vector.extract_strided_slice %658 {offsets = [0, 64], sizes = [1, 32], strides = [1, 1]} : vector<1x128xf32> to vector<1x32xf32>
    %707 = math.tanh %706 : vector<1x32xf32>
    %708 = vector.extract_strided_slice %658 {offsets = [0, 96], sizes = [1, 32], strides = [1, 1]} : vector<1x128xf32> to vector<1x32xf32>
    %cst_279 = arith.constant 5.000000e-01 : f32
    %709 = vector.broadcast %cst_279 : f32 to vector<1x32xf32>
    %710 = arith.mulf %709, %708 : vector<1x32xf32>
    %711 = math.tanh %710 : vector<1x32xf32>
    %cst_280 = arith.constant 5.000000e-01 : f32
    %712 = vector.broadcast %cst_280 : f32 to vector<1x32xf32>
    %713 = arith.mulf %712, %711 : vector<1x32xf32>
    %cst_281 = arith.constant 5.000000e-01 : f32
    %714 = vector.broadcast %cst_281 : f32 to vector<1x32xf32>
    %715 = arith.addf %713, %714 : vector<1x32xf32>
    %716 = arith.mulf %705, %649 : vector<1x32xf32>
    %717 = arith.mulf %697, %707 : vector<1x32xf32>
    %718 = arith.addf %716, %717 : vector<1x32xf32>
    %719 = math.tanh %718 : vector<1x32xf32>
    %720 = arith.mulf %715, %719 : vector<1x32xf32>
    %c1_i32_282 = arith.constant 1 : i32
    %721 = arith.addi %c0_i32_258, %c1_i32_282 : i32
    %722 = arith.index_cast %721 : i32 to index
    %c0_283 = arith.constant 0 : index
    %723 = vector.load %arg27[%722, %c0_283] : memref<9x64xf32, #tpu.memory_space<vmem>>, vector<1x32xf32>
    tpu.vector_store %arg27[%722, %c0_283], %689 {strides = array<i32>} : memref<9x64xf32, #tpu.memory_space<vmem>>, vector<1x32xf32>,
    %c1_i32_284 = arith.constant 1 : i32
    %724 = arith.addi %650, %c1_i32_284 : i32
    %725 = arith.index_cast %724 : i32 to index
    %c32_285 = arith.constant 32 : index
    %726 = vector.load %arg27[%725, %c32_285] : memref<9x64xf32, #tpu.memory_space<vmem>>, vector<1x32xf32>
    tpu.vector_store %arg27[%725, %c32_285], %720 {strides = array<i32>} : memref<9x64xf32, #tpu.memory_space<vmem>>, vector<1x32xf32>,
    %c1_i32_286 = arith.constant 1 : i32
    %c7_i32_287 = arith.constant 7 : i32
    %727 = arith.subi %c7_i32_287, %c1_i32_286 : i32
    %728 = arith.index_cast %c1_i32_286 : i32 to index
    %c0_288 = arith.constant 0 : index
    %729 = vector.load %arg28[%728, %c0_288] : memref<8x128xf32, #tpu.memory_space<vmem>>, vector<1x128xf32>
    %cst_289 = arith.constant dense<0.000000e+00> : vector<1x128xf32>
    %730 = tpu.matmul %689, %647, %cst_289 {dimension_numbers = #tpu.dot_dimension_numbers<[1], [0], [0], [1], [0, 0, 1, 1], [], []>} : vector<1x32xf32>, vector<32x128xf32>, vector<1x128xf32> -> vector<1x128xf32>
    %731 = arith.addf %729, %730 : vector<1x128xf32>
    %732 = arith.index_cast %727 : i32 to index
    %c0_290 = arith.constant 0 : index
    %733 = vector.load %arg29[%732, %c0_290] : memref<8x128xf32, #tpu.memory_space<vmem>>, vector<1x128xf32>
    %cst_291 = arith.constant dense<0.000000e+00> : vector<1x128xf32>
    %734 = tpu.matmul %720, %648, %cst_291 {dimension_numbers = #tpu.dot_dimension_numbers<[1], [0], [0], [1], [0, 0, 1, 1], [], []>} : vector<1x32xf32>, vector<32x128xf32>, vector<1x128xf32> -> vector<1x128xf32>
    %735 = arith.addf %733, %734 : vector<1x128xf32>
    %736 = vector.extract_strided_slice %731 {offsets = [0, 0], sizes = [1, 32], strides = [1, 1]} : vector<1x128xf32> to vector<1x32xf32>
    %cst_292 = arith.constant 5.000000e-01 : f32
    %737 = vector.broadcast %cst_292 : f32 to vector<1x32xf32>
    %738 = arith.mulf %737, %736 : vector<1x32xf32>
    %739 = math.tanh %738 : vector<1x32xf32>
    %cst_293 = arith.constant 5.000000e-01 : f32
    %740 = vector.broadcast %cst_293 : f32 to vector<1x32xf32>
    %741 = arith.mulf %740, %739 : vector<1x32xf32>
    %cst_294 = arith.constant 5.000000e-01 : f32
    %742 = vector.broadcast %cst_294 : f32 to vector<1x32xf32>
    %743 = arith.addf %741, %742 : vector<1x32xf32>
    %744 = vector.extract_strided_slice %731 {offsets = [0, 32], sizes = [1, 32], strides = [1, 1]} : vector<1x128xf32> to vector<1x32xf32>
    %cst_295 = arith.constant 5.000000e-01 : f32
    %745 = vector.broadcast %cst_295 : f32 to vector<1x32xf32>
    %746 = arith.mulf %745, %744 : vector<1x32xf32>
    %747 = math.tanh %746 : vector<1x32xf32>
    %cst_296 = arith.constant 5.000000e-01 : f32
    %748 = vector.broadcast %cst_296 : f32 to vector<1x32xf32>
    %749 = arith.mulf %748, %747 : vector<1x32xf32>
    %cst_297 = arith.constant 5.000000e-01 : f32
    %750 = vector.broadcast %cst_297 : f32 to vector<1x32xf32>
    %751 = arith.addf %749, %750 : vector<1x32xf32>
    %752 = vector.extract_strided_slice %731 {offsets = [0, 64], sizes = [1, 32], strides = [1, 1]} : vector<1x128xf32> to vector<1x32xf32>
    %753 = math.tanh %752 : vector<1x32xf32>
    %754 = vector.extract_strided_slice %731 {offsets = [0, 96], sizes = [1, 32], strides = [1, 1]} : vector<1x128xf32> to vector<1x32xf32>
    %cst_298 = arith.constant 5.000000e-01 : f32
    %755 = vector.broadcast %cst_298 : f32 to vector<1x32xf32>
    %756 = arith.mulf %755, %754 : vector<1x32xf32>
    %757 = math.tanh %756 : vector<1x32xf32>
    %cst_299 = arith.constant 5.000000e-01 : f32
    %758 = vector.broadcast %cst_299 : f32 to vector<1x32xf32>
    %759 = arith.mulf %758, %757 : vector<1x32xf32>
    %cst_300 = arith.constant 5.000000e-01 : f32
    %760 = vector.broadcast %cst_300 : f32 to vector<1x32xf32>
    %761 = arith.addf %759, %760 : vector<1x32xf32>
    %762 = arith.mulf %751, %687 : vector<1x32xf32>
    %763 = arith.mulf %743, %753 : vector<1x32xf32>
    %764 = arith.addf %762, %763 : vector<1x32xf32>
    %765 = math.tanh %764 : vector<1x32xf32>
    %766 = arith.mulf %761, %765 : vector<1x32xf32>
    %767 = vector.extract_strided_slice %735 {offsets = [0, 0], sizes = [1, 32], strides = [1, 1]} : vector<1x128xf32> to vector<1x32xf32>
    %cst_301 = arith.constant 5.000000e-01 : f32
    %768 = vector.broadcast %cst_301 : f32 to vector<1x32xf32>
    %769 = arith.mulf %768, %767 : vector<1x32xf32>
    %770 = math.tanh %769 : vector<1x32xf32>
    %cst_302 = arith.constant 5.000000e-01 : f32
    %771 = vector.broadcast %cst_302 : f32 to vector<1x32xf32>
    %772 = arith.mulf %771, %770 : vector<1x32xf32>
    %cst_303 = arith.constant 5.000000e-01 : f32
    %773 = vector.broadcast %cst_303 : f32 to vector<1x32xf32>
    %774 = arith.addf %772, %773 : vector<1x32xf32>
    %775 = vector.extract_strided_slice %735 {offsets = [0, 32], sizes = [1, 32], strides = [1, 1]} : vector<1x128xf32> to vector<1x32xf32>
    %cst_304 = arith.constant 5.000000e-01 : f32
    %776 = vector.broadcast %cst_304 : f32 to vector<1x32xf32>
    %777 = arith.mulf %776, %775 : vector<1x32xf32>
    %778 = math.tanh %777 : vector<1x32xf32>
    %cst_305 = arith.constant 5.000000e-01 : f32
    %779 = vector.broadcast %cst_305 : f32 to vector<1x32xf32>
    %780 = arith.mulf %779, %778 : vector<1x32xf32>
    %cst_306 = arith.constant 5.000000e-01 : f32
    %781 = vector.broadcast %cst_306 : f32 to vector<1x32xf32>
    %782 = arith.addf %780, %781 : vector<1x32xf32>
    %783 = vector.extract_strided_slice %735 {offsets = [0, 64], sizes = [1, 32], strides = [1, 1]} : vector<1x128xf32> to vector<1x32xf32>
    %784 = math.tanh %783 : vector<1x32xf32>
    %785 = vector.extract_strided_slice %735 {offsets = [0, 96], sizes = [1, 32], strides = [1, 1]} : vector<1x128xf32> to vector<1x32xf32>
    %cst_307 = arith.constant 5.000000e-01 : f32
    %786 = vector.broadcast %cst_307 : f32 to vector<1x32xf32>
    %787 = arith.mulf %786, %785 : vector<1x32xf32>
    %788 = math.tanh %787 : vector<1x32xf32>
    %cst_308 = arith.constant 5.000000e-01 : f32
    %789 = vector.broadcast %cst_308 : f32 to vector<1x32xf32>
    %790 = arith.mulf %789, %788 : vector<1x32xf32>
    %cst_309 = arith.constant 5.000000e-01 : f32
    %791 = vector.broadcast %cst_309 : f32 to vector<1x32xf32>
    %792 = arith.addf %790, %791 : vector<1x32xf32>
    %793 = arith.mulf %782, %718 : vector<1x32xf32>
    %794 = arith.mulf %774, %784 : vector<1x32xf32>
    %795 = arith.addf %793, %794 : vector<1x32xf32>
    %796 = math.tanh %795 : vector<1x32xf32>
    %797 = arith.mulf %792, %796 : vector<1x32xf32>
    %c1_i32_310 = arith.constant 1 : i32
    %798 = arith.addi %c1_i32_286, %c1_i32_310 : i32
    %799 = arith.index_cast %798 : i32 to index
    %c0_311 = arith.constant 0 : index
    %800 = vector.load %arg27[%799, %c0_311] : memref<9x64xf32, #tpu.memory_space<vmem>>, vector<1x32xf32>
    tpu.vector_store %arg27[%799, %c0_311], %766 {strides = array<i32>} : memref<9x64xf32, #tpu.memory_space<vmem>>, vector<1x32xf32>,
    %c1_i32_312 = arith.constant 1 : i32
    %801 = arith.addi %727, %c1_i32_312 : i32
    %802 = arith.index_cast %801 : i32 to index
    %c32_313 = arith.constant 32 : index
    %803 = vector.load %arg27[%802, %c32_313] : memref<9x64xf32, #tpu.memory_space<vmem>>, vector<1x32xf32>
    tpu.vector_store %arg27[%802, %c32_313], %797 {strides = array<i32>} : memref<9x64xf32, #tpu.memory_space<vmem>>, vector<1x32xf32>,
    %c2_i32_314 = arith.constant 2 : i32
    %c7_i32_315 = arith.constant 7 : i32
    %804 = arith.subi %c7_i32_315, %c2_i32_314 : i32
    %805 = arith.index_cast %c2_i32_314 : i32 to index
    %c0_316 = arith.constant 0 : index
    %806 = vector.load %arg28[%805, %c0_316] : memref<8x128xf32, #tpu.memory_space<vmem>>, vector<1x128xf32>
    %cst_317 = arith.constant dense<0.000000e+00> : vector<1x128xf32>
    %807 = tpu.matmul %766, %647, %cst_317 {dimension_numbers = #tpu.dot_dimension_numbers<[1], [0], [0], [1], [0, 0, 1, 1], [], []>} : vector<1x32xf32>, vector<32x128xf32>, vector<1x128xf32> -> vector<1x128xf32>
    %808 = arith.addf %806, %807 : vector<1x128xf32>
    %809 = arith.index_cast %804 : i32 to index
    %c0_318 = arith.constant 0 : index
    %810 = vector.load %arg29[%809, %c0_318] : memref<8x128xf32, #tpu.memory_space<vmem>>, vector<1x128xf32>
    %cst_319 = arith.constant dense<0.000000e+00> : vector<1x128xf32>
    %811 = tpu.matmul %797, %648, %cst_319 {dimension_numbers = #tpu.dot_dimension_numbers<[1], [0], [0], [1], [0, 0, 1, 1], [], []>} : vector<1x32xf32>, vector<32x128xf32>, vector<1x128xf32> -> vector<1x128xf32>
    %812 = arith.addf %810, %811 : vector<1x128xf32>
    %813 = vector.extract_strided_slice %808 {offsets = [0, 0], sizes = [1, 32], strides = [1, 1]} : vector<1x128xf32> to vector<1x32xf32>
    %cst_320 = arith.constant 5.000000e-01 : f32
    %814 = vector.broadcast %cst_320 : f32 to vector<1x32xf32>
    %815 = arith.mulf %814, %813 : vector<1x32xf32>
    %816 = math.tanh %815 : vector<1x32xf32>
    %cst_321 = arith.constant 5.000000e-01 : f32
    %817 = vector.broadcast %cst_321 : f32 to vector<1x32xf32>
    %818 = arith.mulf %817, %816 : vector<1x32xf32>
    %cst_322 = arith.constant 5.000000e-01 : f32
    %819 = vector.broadcast %cst_322 : f32 to vector<1x32xf32>
    %820 = arith.addf %818, %819 : vector<1x32xf32>
    %821 = vector.extract_strided_slice %808 {offsets = [0, 32], sizes = [1, 32], strides = [1, 1]} : vector<1x128xf32> to vector<1x32xf32>
    %cst_323 = arith.constant 5.000000e-01 : f32
    %822 = vector.broadcast %cst_323 : f32 to vector<1x32xf32>
    %823 = arith.mulf %822, %821 : vector<1x32xf32>
    %824 = math.tanh %823 : vector<1x32xf32>
    %cst_324 = arith.constant 5.000000e-01 : f32
    %825 = vector.broadcast %cst_324 : f32 to vector<1x32xf32>
    %826 = arith.mulf %825, %824 : vector<1x32xf32>
    %cst_325 = arith.constant 5.000000e-01 : f32
    %827 = vector.broadcast %cst_325 : f32 to vector<1x32xf32>
    %828 = arith.addf %826, %827 : vector<1x32xf32>
    %829 = vector.extract_strided_slice %808 {offsets = [0, 64], sizes = [1, 32], strides = [1, 1]} : vector<1x128xf32> to vector<1x32xf32>
    %830 = math.tanh %829 : vector<1x32xf32>
    %831 = vector.extract_strided_slice %808 {offsets = [0, 96], sizes = [1, 32], strides = [1, 1]} : vector<1x128xf32> to vector<1x32xf32>
    %cst_326 = arith.constant 5.000000e-01 : f32
    %832 = vector.broadcast %cst_326 : f32 to vector<1x32xf32>
    %833 = arith.mulf %832, %831 : vector<1x32xf32>
    %834 = math.tanh %833 : vector<1x32xf32>
    %cst_327 = arith.constant 5.000000e-01 : f32
    %835 = vector.broadcast %cst_327 : f32 to vector<1x32xf32>
    %836 = arith.mulf %835, %834 : vector<1x32xf32>
    %cst_328 = arith.constant 5.000000e-01 : f32
    %837 = vector.broadcast %cst_328 : f32 to vector<1x32xf32>
    %838 = arith.addf %836, %837 : vector<1x32xf32>
    %839 = arith.mulf %828, %764 : vector<1x32xf32>
    %840 = arith.mulf %820, %830 : vector<1x32xf32>
    %841 = arith.addf %839, %840 : vector<1x32xf32>
    %842 = math.tanh %841 : vector<1x32xf32>
    %843 = arith.mulf %838, %842 : vector<1x32xf32>
    %844 = vector.extract_strided_slice %812 {offsets = [0, 0], sizes = [1, 32], strides = [1, 1]} : vector<1x128xf32> to vector<1x32xf32>
    %cst_329 = arith.constant 5.000000e-01 : f32
    %845 = vector.broadcast %cst_329 : f32 to vector<1x32xf32>
    %846 = arith.mulf %845, %844 : vector<1x32xf32>
    %847 = math.tanh %846 : vector<1x32xf32>
    %cst_330 = arith.constant 5.000000e-01 : f32
    %848 = vector.broadcast %cst_330 : f32 to vector<1x32xf32>
    %849 = arith.mulf %848, %847 : vector<1x32xf32>
    %cst_331 = arith.constant 5.000000e-01 : f32
    %850 = vector.broadcast %cst_331 : f32 to vector<1x32xf32>
    %851 = arith.addf %849, %850 : vector<1x32xf32>
    %852 = vector.extract_strided_slice %812 {offsets = [0, 32], sizes = [1, 32], strides = [1, 1]} : vector<1x128xf32> to vector<1x32xf32>
    %cst_332 = arith.constant 5.000000e-01 : f32
    %853 = vector.broadcast %cst_332 : f32 to vector<1x32xf32>
    %854 = arith.mulf %853, %852 : vector<1x32xf32>
    %855 = math.tanh %854 : vector<1x32xf32>
    %cst_333 = arith.constant 5.000000e-01 : f32
    %856 = vector.broadcast %cst_333 : f32 to vector<1x32xf32>
    %857 = arith.mulf %856, %855 : vector<1x32xf32>
    %cst_334 = arith.constant 5.000000e-01 : f32
    %858 = vector.broadcast %cst_334 : f32 to vector<1x32xf32>
    %859 = arith.addf %857, %858 : vector<1x32xf32>
    %860 = vector.extract_strided_slice %812 {offsets = [0, 64], sizes = [1, 32], strides = [1, 1]} : vector<1x128xf32> to vector<1x32xf32>
    %861 = math.tanh %860 : vector<1x32xf32>
    %862 = vector.extract_strided_slice %812 {offsets = [0, 96], sizes = [1, 32], strides = [1, 1]} : vector<1x128xf32> to vector<1x32xf32>
    %cst_335 = arith.constant 5.000000e-01 : f32
    %863 = vector.broadcast %cst_335 : f32 to vector<1x32xf32>
    %864 = arith.mulf %863, %862 : vector<1x32xf32>
    %865 = math.tanh %864 : vector<1x32xf32>
    %cst_336 = arith.constant 5.000000e-01 : f32
    %866 = vector.broadcast %cst_336 : f32 to vector<1x32xf32>
    %867 = arith.mulf %866, %865 : vector<1x32xf32>
    %cst_337 = arith.constant 5.000000e-01 : f32
    %868 = vector.broadcast %cst_337 : f32 to vector<1x32xf32>
    %869 = arith.addf %867, %868 : vector<1x32xf32>
    %870 = arith.mulf %859, %795 : vector<1x32xf32>
    %871 = arith.mulf %851, %861 : vector<1x32xf32>
    %872 = arith.addf %870, %871 : vector<1x32xf32>
    %873 = math.tanh %872 : vector<1x32xf32>
    %874 = arith.mulf %869, %873 : vector<1x32xf32>
    %c1_i32_338 = arith.constant 1 : i32
    %875 = arith.addi %c2_i32_314, %c1_i32_338 : i32
    %876 = arith.index_cast %875 : i32 to index
    %c0_339 = arith.constant 0 : index
    %877 = vector.load %arg27[%876, %c0_339] : memref<9x64xf32, #tpu.memory_space<vmem>>, vector<1x32xf32>
    tpu.vector_store %arg27[%876, %c0_339], %843 {strides = array<i32>} : memref<9x64xf32, #tpu.memory_space<vmem>>, vector<1x32xf32>,
    %c1_i32_340 = arith.constant 1 : i32
    %878 = arith.addi %804, %c1_i32_340 : i32
    %879 = arith.index_cast %878 : i32 to index
    %c32_341 = arith.constant 32 : index
    %880 = vector.load %arg27[%879, %c32_341] : memref<9x64xf32, #tpu.memory_space<vmem>>, vector<1x32xf32>
    tpu.vector_store %arg27[%879, %c32_341], %874 {strides = array<i32>} : memref<9x64xf32, #tpu.memory_space<vmem>>, vector<1x32xf32>,
    %c3_i32_342 = arith.constant 3 : i32
    %c7_i32_343 = arith.constant 7 : i32
    %881 = arith.subi %c7_i32_343, %c3_i32_342 : i32
    %882 = arith.index_cast %c3_i32_342 : i32 to index
    %c0_344 = arith.constant 0 : index
    %883 = vector.load %arg28[%882, %c0_344] : memref<8x128xf32, #tpu.memory_space<vmem>>, vector<1x128xf32>
    %cst_345 = arith.constant dense<0.000000e+00> : vector<1x128xf32>
    %884 = tpu.matmul %843, %647, %cst_345 {dimension_numbers = #tpu.dot_dimension_numbers<[1], [0], [0], [1], [0, 0, 1, 1], [], []>} : vector<1x32xf32>, vector<32x128xf32>, vector<1x128xf32> -> vector<1x128xf32>
    %885 = arith.addf %883, %884 : vector<1x128xf32>
    %886 = arith.index_cast %881 : i32 to index
    %c0_346 = arith.constant 0 : index
    %887 = vector.load %arg29[%886, %c0_346] : memref<8x128xf32, #tpu.memory_space<vmem>>, vector<1x128xf32>
    %cst_347 = arith.constant dense<0.000000e+00> : vector<1x128xf32>
    %888 = tpu.matmul %874, %648, %cst_347 {dimension_numbers = #tpu.dot_dimension_numbers<[1], [0], [0], [1], [0, 0, 1, 1], [], []>} : vector<1x32xf32>, vector<32x128xf32>, vector<1x128xf32> -> vector<1x128xf32>
    %889 = arith.addf %887, %888 : vector<1x128xf32>
    %890 = vector.extract_strided_slice %885 {offsets = [0, 0], sizes = [1, 32], strides = [1, 1]} : vector<1x128xf32> to vector<1x32xf32>
    %cst_348 = arith.constant 5.000000e-01 : f32
    %891 = vector.broadcast %cst_348 : f32 to vector<1x32xf32>
    %892 = arith.mulf %891, %890 : vector<1x32xf32>
    %893 = math.tanh %892 : vector<1x32xf32>
    %cst_349 = arith.constant 5.000000e-01 : f32
    %894 = vector.broadcast %cst_349 : f32 to vector<1x32xf32>
    %895 = arith.mulf %894, %893 : vector<1x32xf32>
    %cst_350 = arith.constant 5.000000e-01 : f32
    %896 = vector.broadcast %cst_350 : f32 to vector<1x32xf32>
    %897 = arith.addf %895, %896 : vector<1x32xf32>
    %898 = vector.extract_strided_slice %885 {offsets = [0, 32], sizes = [1, 32], strides = [1, 1]} : vector<1x128xf32> to vector<1x32xf32>
    %cst_351 = arith.constant 5.000000e-01 : f32
    %899 = vector.broadcast %cst_351 : f32 to vector<1x32xf32>
    %900 = arith.mulf %899, %898 : vector<1x32xf32>
    %901 = math.tanh %900 : vector<1x32xf32>
    %cst_352 = arith.constant 5.000000e-01 : f32
    %902 = vector.broadcast %cst_352 : f32 to vector<1x32xf32>
    %903 = arith.mulf %902, %901 : vector<1x32xf32>
    %cst_353 = arith.constant 5.000000e-01 : f32
    %904 = vector.broadcast %cst_353 : f32 to vector<1x32xf32>
    %905 = arith.addf %903, %904 : vector<1x32xf32>
    %906 = vector.extract_strided_slice %885 {offsets = [0, 64], sizes = [1, 32], strides = [1, 1]} : vector<1x128xf32> to vector<1x32xf32>
    %907 = math.tanh %906 : vector<1x32xf32>
    %908 = vector.extract_strided_slice %885 {offsets = [0, 96], sizes = [1, 32], strides = [1, 1]} : vector<1x128xf32> to vector<1x32xf32>
    %cst_354 = arith.constant 5.000000e-01 : f32
    %909 = vector.broadcast %cst_354 : f32 to vector<1x32xf32>
    %910 = arith.mulf %909, %908 : vector<1x32xf32>
    %911 = math.tanh %910 : vector<1x32xf32>
    %cst_355 = arith.constant 5.000000e-01 : f32
    %912 = vector.broadcast %cst_355 : f32 to vector<1x32xf32>
    %913 = arith.mulf %912, %911 : vector<1x32xf32>
    %cst_356 = arith.constant 5.000000e-01 : f32
    %914 = vector.broadcast %cst_356 : f32 to vector<1x32xf32>
    %915 = arith.addf %913, %914 : vector<1x32xf32>
    %916 = arith.mulf %905, %841 : vector<1x32xf32>
    %917 = arith.mulf %897, %907 : vector<1x32xf32>
    %918 = arith.addf %916, %917 : vector<1x32xf32>
    %919 = math.tanh %918 : vector<1x32xf32>
    %920 = arith.mulf %915, %919 : vector<1x32xf32>
    %921 = vector.extract_strided_slice %889 {offsets = [0, 0], sizes = [1, 32], strides = [1, 1]} : vector<1x128xf32> to vector<1x32xf32>
    %cst_357 = arith.constant 5.000000e-01 : f32
    %922 = vector.broadcast %cst_357 : f32 to vector<1x32xf32>
    %923 = arith.mulf %922, %921 : vector<1x32xf32>
    %924 = math.tanh %923 : vector<1x32xf32>
    %cst_358 = arith.constant 5.000000e-01 : f32
    %925 = vector.broadcast %cst_358 : f32 to vector<1x32xf32>
    %926 = arith.mulf %925, %924 : vector<1x32xf32>
    %cst_359 = arith.constant 5.000000e-01 : f32
    %927 = vector.broadcast %cst_359 : f32 to vector<1x32xf32>
    %928 = arith.addf %926, %927 : vector<1x32xf32>
    %929 = vector.extract_strided_slice %889 {offsets = [0, 32], sizes = [1, 32], strides = [1, 1]} : vector<1x128xf32> to vector<1x32xf32>
    %cst_360 = arith.constant 5.000000e-01 : f32
    %930 = vector.broadcast %cst_360 : f32 to vector<1x32xf32>
    %931 = arith.mulf %930, %929 : vector<1x32xf32>
    %932 = math.tanh %931 : vector<1x32xf32>
    %cst_361 = arith.constant 5.000000e-01 : f32
    %933 = vector.broadcast %cst_361 : f32 to vector<1x32xf32>
    %934 = arith.mulf %933, %932 : vector<1x32xf32>
    %cst_362 = arith.constant 5.000000e-01 : f32
    %935 = vector.broadcast %cst_362 : f32 to vector<1x32xf32>
    %936 = arith.addf %934, %935 : vector<1x32xf32>
    %937 = vector.extract_strided_slice %889 {offsets = [0, 64], sizes = [1, 32], strides = [1, 1]} : vector<1x128xf32> to vector<1x32xf32>
    %938 = math.tanh %937 : vector<1x32xf32>
    %939 = vector.extract_strided_slice %889 {offsets = [0, 96], sizes = [1, 32], strides = [1, 1]} : vector<1x128xf32> to vector<1x32xf32>
    %cst_363 = arith.constant 5.000000e-01 : f32
    %940 = vector.broadcast %cst_363 : f32 to vector<1x32xf32>
    %941 = arith.mulf %940, %939 : vector<1x32xf32>
    %942 = math.tanh %941 : vector<1x32xf32>
    %cst_364 = arith.constant 5.000000e-01 : f32
    %943 = vector.broadcast %cst_364 : f32 to vector<1x32xf32>
    %944 = arith.mulf %943, %942 : vector<1x32xf32>
    %cst_365 = arith.constant 5.000000e-01 : f32
    %945 = vector.broadcast %cst_365 : f32 to vector<1x32xf32>
    %946 = arith.addf %944, %945 : vector<1x32xf32>
    %947 = arith.mulf %936, %872 : vector<1x32xf32>
    %948 = arith.mulf %928, %938 : vector<1x32xf32>
    %949 = arith.addf %947, %948 : vector<1x32xf32>
    %950 = math.tanh %949 : vector<1x32xf32>
    %951 = arith.mulf %946, %950 : vector<1x32xf32>
    %c1_i32_366 = arith.constant 1 : i32
    %952 = arith.addi %c3_i32_342, %c1_i32_366 : i32
    %953 = arith.index_cast %952 : i32 to index
    %c0_367 = arith.constant 0 : index
    %954 = vector.load %arg27[%953, %c0_367] : memref<9x64xf32, #tpu.memory_space<vmem>>, vector<1x32xf32>
    tpu.vector_store %arg27[%953, %c0_367], %920 {strides = array<i32>} : memref<9x64xf32, #tpu.memory_space<vmem>>, vector<1x32xf32>,
    %c1_i32_368 = arith.constant 1 : i32
    %955 = arith.addi %881, %c1_i32_368 : i32
    %956 = arith.index_cast %955 : i32 to index
    %c32_369 = arith.constant 32 : index
    %957 = vector.load %arg27[%956, %c32_369] : memref<9x64xf32, #tpu.memory_space<vmem>>, vector<1x32xf32>
    tpu.vector_store %arg27[%956, %c32_369], %951 {strides = array<i32>} : memref<9x64xf32, #tpu.memory_space<vmem>>, vector<1x32xf32>,
    %c4_i32_370 = arith.constant 4 : i32
    %c7_i32_371 = arith.constant 7 : i32
    %958 = arith.subi %c7_i32_371, %c4_i32_370 : i32
    %959 = arith.index_cast %c4_i32_370 : i32 to index
    %c0_372 = arith.constant 0 : index
    %960 = vector.load %arg28[%959, %c0_372] : memref<8x128xf32, #tpu.memory_space<vmem>>, vector<1x128xf32>
    %cst_373 = arith.constant dense<0.000000e+00> : vector<1x128xf32>
    %961 = tpu.matmul %920, %647, %cst_373 {dimension_numbers = #tpu.dot_dimension_numbers<[1], [0], [0], [1], [0, 0, 1, 1], [], []>} : vector<1x32xf32>, vector<32x128xf32>, vector<1x128xf32> -> vector<1x128xf32>
    %962 = arith.addf %960, %961 : vector<1x128xf32>
    %963 = arith.index_cast %958 : i32 to index
    %c0_374 = arith.constant 0 : index
    %964 = vector.load %arg29[%963, %c0_374] : memref<8x128xf32, #tpu.memory_space<vmem>>, vector<1x128xf32>
    %cst_375 = arith.constant dense<0.000000e+00> : vector<1x128xf32>
    %965 = tpu.matmul %951, %648, %cst_375 {dimension_numbers = #tpu.dot_dimension_numbers<[1], [0], [0], [1], [0, 0, 1, 1], [], []>} : vector<1x32xf32>, vector<32x128xf32>, vector<1x128xf32> -> vector<1x128xf32>
    %966 = arith.addf %964, %965 : vector<1x128xf32>
    %967 = vector.extract_strided_slice %962 {offsets = [0, 0], sizes = [1, 32], strides = [1, 1]} : vector<1x128xf32> to vector<1x32xf32>
    %cst_376 = arith.constant 5.000000e-01 : f32
    %968 = vector.broadcast %cst_376 : f32 to vector<1x32xf32>
    %969 = arith.mulf %968, %967 : vector<1x32xf32>
    %970 = math.tanh %969 : vector<1x32xf32>
    %cst_377 = arith.constant 5.000000e-01 : f32
    %971 = vector.broadcast %cst_377 : f32 to vector<1x32xf32>
    %972 = arith.mulf %971, %970 : vector<1x32xf32>
    %cst_378 = arith.constant 5.000000e-01 : f32
    %973 = vector.broadcast %cst_378 : f32 to vector<1x32xf32>
    %974 = arith.addf %972, %973 : vector<1x32xf32>
    %975 = vector.extract_strided_slice %962 {offsets = [0, 32], sizes = [1, 32], strides = [1, 1]} : vector<1x128xf32> to vector<1x32xf32>
    %cst_379 = arith.constant 5.000000e-01 : f32
    %976 = vector.broadcast %cst_379 : f32 to vector<1x32xf32>
    %977 = arith.mulf %976, %975 : vector<1x32xf32>
    %978 = math.tanh %977 : vector<1x32xf32>
    %cst_380 = arith.constant 5.000000e-01 : f32
    %979 = vector.broadcast %cst_380 : f32 to vector<1x32xf32>
    %980 = arith.mulf %979, %978 : vector<1x32xf32>
    %cst_381 = arith.constant 5.000000e-01 : f32
    %981 = vector.broadcast %cst_381 : f32 to vector<1x32xf32>
    %982 = arith.addf %980, %981 : vector<1x32xf32>
    %983 = vector.extract_strided_slice %962 {offsets = [0, 64], sizes = [1, 32], strides = [1, 1]} : vector<1x128xf32> to vector<1x32xf32>
    %984 = math.tanh %983 : vector<1x32xf32>
    %985 = vector.extract_strided_slice %962 {offsets = [0, 96], sizes = [1, 32], strides = [1, 1]} : vector<1x128xf32> to vector<1x32xf32>
    %cst_382 = arith.constant 5.000000e-01 : f32
    %986 = vector.broadcast %cst_382 : f32 to vector<1x32xf32>
    %987 = arith.mulf %986, %985 : vector<1x32xf32>
    %988 = math.tanh %987 : vector<1x32xf32>
    %cst_383 = arith.constant 5.000000e-01 : f32
    %989 = vector.broadcast %cst_383 : f32 to vector<1x32xf32>
    %990 = arith.mulf %989, %988 : vector<1x32xf32>
    %cst_384 = arith.constant 5.000000e-01 : f32
    %991 = vector.broadcast %cst_384 : f32 to vector<1x32xf32>
    %992 = arith.addf %990, %991 : vector<1x32xf32>
    %993 = arith.mulf %982, %918 : vector<1x32xf32>
    %994 = arith.mulf %974, %984 : vector<1x32xf32>
    %995 = arith.addf %993, %994 : vector<1x32xf32>
    %996 = math.tanh %995 : vector<1x32xf32>
    %997 = arith.mulf %992, %996 : vector<1x32xf32>
    %998 = vector.extract_strided_slice %966 {offsets = [0, 0], sizes = [1, 32], strides = [1, 1]} : vector<1x128xf32> to vector<1x32xf32>
    %cst_385 = arith.constant 5.000000e-01 : f32
    %999 = vector.broadcast %cst_385 : f32 to vector<1x32xf32>
    %1000 = arith.mulf %999, %998 : vector<1x32xf32>
    %1001 = math.tanh %1000 : vector<1x32xf32>
    %cst_386 = arith.constant 5.000000e-01 : f32
    %1002 = vector.broadcast %cst_386 : f32 to vector<1x32xf32>
    %1003 = arith.mulf %1002, %1001 : vector<1x32xf32>
    %cst_387 = arith.constant 5.000000e-01 : f32
    %1004 = vector.broadcast %cst_387 : f32 to vector<1x32xf32>
    %1005 = arith.addf %1003, %1004 : vector<1x32xf32>
    %1006 = vector.extract_strided_slice %966 {offsets = [0, 32], sizes = [1, 32], strides = [1, 1]} : vector<1x128xf32> to vector<1x32xf32>
    %cst_388 = arith.constant 5.000000e-01 : f32
    %1007 = vector.broadcast %cst_388 : f32 to vector<1x32xf32>
    %1008 = arith.mulf %1007, %1006 : vector<1x32xf32>
    %1009 = math.tanh %1008 : vector<1x32xf32>
    %cst_389 = arith.constant 5.000000e-01 : f32
    %1010 = vector.broadcast %cst_389 : f32 to vector<1x32xf32>
    %1011 = arith.mulf %1010, %1009 : vector<1x32xf32>
    %cst_390 = arith.constant 5.000000e-01 : f32
    %1012 = vector.broadcast %cst_390 : f32 to vector<1x32xf32>
    %1013 = arith.addf %1011, %1012 : vector<1x32xf32>
    %1014 = vector.extract_strided_slice %966 {offsets = [0, 64], sizes = [1, 32], strides = [1, 1]} : vector<1x128xf32> to vector<1x32xf32>
    %1015 = math.tanh %1014 : vector<1x32xf32>
    %1016 = vector.extract_strided_slice %966 {offsets = [0, 96], sizes = [1, 32], strides = [1, 1]} : vector<1x128xf32> to vector<1x32xf32>
    %cst_391 = arith.constant 5.000000e-01 : f32
    %1017 = vector.broadcast %cst_391 : f32 to vector<1x32xf32>
    %1018 = arith.mulf %1017, %1016 : vector<1x32xf32>
    %1019 = math.tanh %1018 : vector<1x32xf32>
    %cst_392 = arith.constant 5.000000e-01 : f32
    %1020 = vector.broadcast %cst_392 : f32 to vector<1x32xf32>
    %1021 = arith.mulf %1020, %1019 : vector<1x32xf32>
    %cst_393 = arith.constant 5.000000e-01 : f32
    %1022 = vector.broadcast %cst_393 : f32 to vector<1x32xf32>
    %1023 = arith.addf %1021, %1022 : vector<1x32xf32>
    %1024 = arith.mulf %1013, %949 : vector<1x32xf32>
    %1025 = arith.mulf %1005, %1015 : vector<1x32xf32>
    %1026 = arith.addf %1024, %1025 : vector<1x32xf32>
    %1027 = math.tanh %1026 : vector<1x32xf32>
    %1028 = arith.mulf %1023, %1027 : vector<1x32xf32>
    %c1_i32_394 = arith.constant 1 : i32
    %1029 = arith.addi %c4_i32_370, %c1_i32_394 : i32
    %1030 = arith.index_cast %1029 : i32 to index
    %c0_395 = arith.constant 0 : index
    %1031 = vector.load %arg27[%1030, %c0_395] : memref<9x64xf32, #tpu.memory_space<vmem>>, vector<1x32xf32>
    tpu.vector_store %arg27[%1030, %c0_395], %997 {strides = array<i32>} : memref<9x64xf32, #tpu.memory_space<vmem>>, vector<1x32xf32>,
    %c1_i32_396 = arith.constant 1 : i32
    %1032 = arith.addi %958, %c1_i32_396 : i32
    %1033 = arith.index_cast %1032 : i32 to index
    %c32_397 = arith.constant 32 : index
    %1034 = vector.load %arg27[%1033, %c32_397] : memref<9x64xf32, #tpu.memory_space<vmem>>, vector<1x32xf32>
    tpu.vector_store %arg27[%1033, %c32_397], %1028 {strides = array<i32>} : memref<9x64xf32, #tpu.memory_space<vmem>>, vector<1x32xf32>,
    %c5_i32_398 = arith.constant 5 : i32
    %c7_i32_399 = arith.constant 7 : i32
    %1035 = arith.subi %c7_i32_399, %c5_i32_398 : i32
    %1036 = arith.index_cast %c5_i32_398 : i32 to index
    %c0_400 = arith.constant 0 : index
    %1037 = vector.load %arg28[%1036, %c0_400] : memref<8x128xf32, #tpu.memory_space<vmem>>, vector<1x128xf32>
    %cst_401 = arith.constant dense<0.000000e+00> : vector<1x128xf32>
    %1038 = tpu.matmul %997, %647, %cst_401 {dimension_numbers = #tpu.dot_dimension_numbers<[1], [0], [0], [1], [0, 0, 1, 1], [], []>} : vector<1x32xf32>, vector<32x128xf32>, vector<1x128xf32> -> vector<1x128xf32>
    %1039 = arith.addf %1037, %1038 : vector<1x128xf32>
    %1040 = arith.index_cast %1035 : i32 to index
    %c0_402 = arith.constant 0 : index
    %1041 = vector.load %arg29[%1040, %c0_402] : memref<8x128xf32, #tpu.memory_space<vmem>>, vector<1x128xf32>
    %cst_403 = arith.constant dense<0.000000e+00> : vector<1x128xf32>
    %1042 = tpu.matmul %1028, %648, %cst_403 {dimension_numbers = #tpu.dot_dimension_numbers<[1], [0], [0], [1], [0, 0, 1, 1], [], []>} : vector<1x32xf32>, vector<32x128xf32>, vector<1x128xf32> -> vector<1x128xf32>
    %1043 = arith.addf %1041, %1042 : vector<1x128xf32>
    %1044 = vector.extract_strided_slice %1039 {offsets = [0, 0], sizes = [1, 32], strides = [1, 1]} : vector<1x128xf32> to vector<1x32xf32>
    %cst_404 = arith.constant 5.000000e-01 : f32
    %1045 = vector.broadcast %cst_404 : f32 to vector<1x32xf32>
    %1046 = arith.mulf %1045, %1044 : vector<1x32xf32>
    %1047 = math.tanh %1046 : vector<1x32xf32>
    %cst_405 = arith.constant 5.000000e-01 : f32
    %1048 = vector.broadcast %cst_405 : f32 to vector<1x32xf32>
    %1049 = arith.mulf %1048, %1047 : vector<1x32xf32>
    %cst_406 = arith.constant 5.000000e-01 : f32
    %1050 = vector.broadcast %cst_406 : f32 to vector<1x32xf32>
    %1051 = arith.addf %1049, %1050 : vector<1x32xf32>
    %1052 = vector.extract_strided_slice %1039 {offsets = [0, 32], sizes = [1, 32], strides = [1, 1]} : vector<1x128xf32> to vector<1x32xf32>
    %cst_407 = arith.constant 5.000000e-01 : f32
    %1053 = vector.broadcast %cst_407 : f32 to vector<1x32xf32>
    %1054 = arith.mulf %1053, %1052 : vector<1x32xf32>
    %1055 = math.tanh %1054 : vector<1x32xf32>
    %cst_408 = arith.constant 5.000000e-01 : f32
    %1056 = vector.broadcast %cst_408 : f32 to vector<1x32xf32>
    %1057 = arith.mulf %1056, %1055 : vector<1x32xf32>
    %cst_409 = arith.constant 5.000000e-01 : f32
    %1058 = vector.broadcast %cst_409 : f32 to vector<1x32xf32>
    %1059 = arith.addf %1057, %1058 : vector<1x32xf32>
    %1060 = vector.extract_strided_slice %1039 {offsets = [0, 64], sizes = [1, 32], strides = [1, 1]} : vector<1x128xf32> to vector<1x32xf32>
    %1061 = math.tanh %1060 : vector<1x32xf32>
    %1062 = vector.extract_strided_slice %1039 {offsets = [0, 96], sizes = [1, 32], strides = [1, 1]} : vector<1x128xf32> to vector<1x32xf32>
    %cst_410 = arith.constant 5.000000e-01 : f32
    %1063 = vector.broadcast %cst_410 : f32 to vector<1x32xf32>
    %1064 = arith.mulf %1063, %1062 : vector<1x32xf32>
    %1065 = math.tanh %1064 : vector<1x32xf32>
    %cst_411 = arith.constant 5.000000e-01 : f32
    %1066 = vector.broadcast %cst_411 : f32 to vector<1x32xf32>
    %1067 = arith.mulf %1066, %1065 : vector<1x32xf32>
    %cst_412 = arith.constant 5.000000e-01 : f32
    %1068 = vector.broadcast %cst_412 : f32 to vector<1x32xf32>
    %1069 = arith.addf %1067, %1068 : vector<1x32xf32>
    %1070 = arith.mulf %1059, %995 : vector<1x32xf32>
    %1071 = arith.mulf %1051, %1061 : vector<1x32xf32>
    %1072 = arith.addf %1070, %1071 : vector<1x32xf32>
    %1073 = math.tanh %1072 : vector<1x32xf32>
    %1074 = arith.mulf %1069, %1073 : vector<1x32xf32>
    %1075 = vector.extract_strided_slice %1043 {offsets = [0, 0], sizes = [1, 32], strides = [1, 1]} : vector<1x128xf32> to vector<1x32xf32>
    %cst_413 = arith.constant 5.000000e-01 : f32
    %1076 = vector.broadcast %cst_413 : f32 to vector<1x32xf32>
    %1077 = arith.mulf %1076, %1075 : vector<1x32xf32>
    %1078 = math.tanh %1077 : vector<1x32xf32>
    %cst_414 = arith.constant 5.000000e-01 : f32
    %1079 = vector.broadcast %cst_414 : f32 to vector<1x32xf32>
    %1080 = arith.mulf %1079, %1078 : vector<1x32xf32>
    %cst_415 = arith.constant 5.000000e-01 : f32
    %1081 = vector.broadcast %cst_415 : f32 to vector<1x32xf32>
    %1082 = arith.addf %1080, %1081 : vector<1x32xf32>
    %1083 = vector.extract_strided_slice %1043 {offsets = [0, 32], sizes = [1, 32], strides = [1, 1]} : vector<1x128xf32> to vector<1x32xf32>
    %cst_416 = arith.constant 5.000000e-01 : f32
    %1084 = vector.broadcast %cst_416 : f32 to vector<1x32xf32>
    %1085 = arith.mulf %1084, %1083 : vector<1x32xf32>
    %1086 = math.tanh %1085 : vector<1x32xf32>
    %cst_417 = arith.constant 5.000000e-01 : f32
    %1087 = vector.broadcast %cst_417 : f32 to vector<1x32xf32>
    %1088 = arith.mulf %1087, %1086 : vector<1x32xf32>
    %cst_418 = arith.constant 5.000000e-01 : f32
    %1089 = vector.broadcast %cst_418 : f32 to vector<1x32xf32>
    %1090 = arith.addf %1088, %1089 : vector<1x32xf32>
    %1091 = vector.extract_strided_slice %1043 {offsets = [0, 64], sizes = [1, 32], strides = [1, 1]} : vector<1x128xf32> to vector<1x32xf32>
    %1092 = math.tanh %1091 : vector<1x32xf32>
    %1093 = vector.extract_strided_slice %1043 {offsets = [0, 96], sizes = [1, 32], strides = [1, 1]} : vector<1x128xf32> to vector<1x32xf32>
    %cst_419 = arith.constant 5.000000e-01 : f32
    %1094 = vector.broadcast %cst_419 : f32 to vector<1x32xf32>
    %1095 = arith.mulf %1094, %1093 : vector<1x32xf32>
    %1096 = math.tanh %1095 : vector<1x32xf32>
    %cst_420 = arith.constant 5.000000e-01 : f32
    %1097 = vector.broadcast %cst_420 : f32 to vector<1x32xf32>
    %1098 = arith.mulf %1097, %1096 : vector<1x32xf32>
    %cst_421 = arith.constant 5.000000e-01 : f32
    %1099 = vector.broadcast %cst_421 : f32 to vector<1x32xf32>
    %1100 = arith.addf %1098, %1099 : vector<1x32xf32>
    %1101 = arith.mulf %1090, %1026 : vector<1x32xf32>
    %1102 = arith.mulf %1082, %1092 : vector<1x32xf32>
    %1103 = arith.addf %1101, %1102 : vector<1x32xf32>
    %1104 = math.tanh %1103 : vector<1x32xf32>
    %1105 = arith.mulf %1100, %1104 : vector<1x32xf32>
    %c1_i32_422 = arith.constant 1 : i32
    %1106 = arith.addi %c5_i32_398, %c1_i32_422 : i32
    %1107 = arith.index_cast %1106 : i32 to index
    %c0_423 = arith.constant 0 : index
    %1108 = vector.load %arg27[%1107, %c0_423] : memref<9x64xf32, #tpu.memory_space<vmem>>, vector<1x32xf32>
    tpu.vector_store %arg27[%1107, %c0_423], %1074 {strides = array<i32>} : memref<9x64xf32, #tpu.memory_space<vmem>>, vector<1x32xf32>,
    %c1_i32_424 = arith.constant 1 : i32
    %1109 = arith.addi %1035, %c1_i32_424 : i32
    %1110 = arith.index_cast %1109 : i32 to index
    %c32_425 = arith.constant 32 : index
    %1111 = vector.load %arg27[%1110, %c32_425] : memref<9x64xf32, #tpu.memory_space<vmem>>, vector<1x32xf32>
    tpu.vector_store %arg27[%1110, %c32_425], %1105 {strides = array<i32>} : memref<9x64xf32, #tpu.memory_space<vmem>>, vector<1x32xf32>,
    %c6_i32_426 = arith.constant 6 : i32
    %c7_i32_427 = arith.constant 7 : i32
    %1112 = arith.subi %c7_i32_427, %c6_i32_426 : i32
    %1113 = arith.index_cast %c6_i32_426 : i32 to index
    %c0_428 = arith.constant 0 : index
    %1114 = vector.load %arg28[%1113, %c0_428] : memref<8x128xf32, #tpu.memory_space<vmem>>, vector<1x128xf32>
    %cst_429 = arith.constant dense<0.000000e+00> : vector<1x128xf32>
    %1115 = tpu.matmul %1074, %647, %cst_429 {dimension_numbers = #tpu.dot_dimension_numbers<[1], [0], [0], [1], [0, 0, 1, 1], [], []>} : vector<1x32xf32>, vector<32x128xf32>, vector<1x128xf32> -> vector<1x128xf32>
    %1116 = arith.addf %1114, %1115 : vector<1x128xf32>
    %1117 = arith.index_cast %1112 : i32 to index
    %c0_430 = arith.constant 0 : index
    %1118 = vector.load %arg29[%1117, %c0_430] : memref<8x128xf32, #tpu.memory_space<vmem>>, vector<1x128xf32>
    %cst_431 = arith.constant dense<0.000000e+00> : vector<1x128xf32>
    %1119 = tpu.matmul %1105, %648, %cst_431 {dimension_numbers = #tpu.dot_dimension_numbers<[1], [0], [0], [1], [0, 0, 1, 1], [], []>} : vector<1x32xf32>, vector<32x128xf32>, vector<1x128xf32> -> vector<1x128xf32>
    %1120 = arith.addf %1118, %1119 : vector<1x128xf32>
    %1121 = vector.extract_strided_slice %1116 {offsets = [0, 0], sizes = [1, 32], strides = [1, 1]} : vector<1x128xf32> to vector<1x32xf32>
    %cst_432 = arith.constant 5.000000e-01 : f32
    %1122 = vector.broadcast %cst_432 : f32 to vector<1x32xf32>
    %1123 = arith.mulf %1122, %1121 : vector<1x32xf32>
    %1124 = math.tanh %1123 : vector<1x32xf32>
    %cst_433 = arith.constant 5.000000e-01 : f32
    %1125 = vector.broadcast %cst_433 : f32 to vector<1x32xf32>
    %1126 = arith.mulf %1125, %1124 : vector<1x32xf32>
    %cst_434 = arith.constant 5.000000e-01 : f32
    %1127 = vector.broadcast %cst_434 : f32 to vector<1x32xf32>
    %1128 = arith.addf %1126, %1127 : vector<1x32xf32>
    %1129 = vector.extract_strided_slice %1116 {offsets = [0, 32], sizes = [1, 32], strides = [1, 1]} : vector<1x128xf32> to vector<1x32xf32>
    %cst_435 = arith.constant 5.000000e-01 : f32
    %1130 = vector.broadcast %cst_435 : f32 to vector<1x32xf32>
    %1131 = arith.mulf %1130, %1129 : vector<1x32xf32>
    %1132 = math.tanh %1131 : vector<1x32xf32>
    %cst_436 = arith.constant 5.000000e-01 : f32
    %1133 = vector.broadcast %cst_436 : f32 to vector<1x32xf32>
    %1134 = arith.mulf %1133, %1132 : vector<1x32xf32>
    %cst_437 = arith.constant 5.000000e-01 : f32
    %1135 = vector.broadcast %cst_437 : f32 to vector<1x32xf32>
    %1136 = arith.addf %1134, %1135 : vector<1x32xf32>
    %1137 = vector.extract_strided_slice %1116 {offsets = [0, 64], sizes = [1, 32], strides = [1, 1]} : vector<1x128xf32> to vector<1x32xf32>
    %1138 = math.tanh %1137 : vector<1x32xf32>
    %1139 = vector.extract_strided_slice %1116 {offsets = [0, 96], sizes = [1, 32], strides = [1, 1]} : vector<1x128xf32> to vector<1x32xf32>
    %cst_438 = arith.constant 5.000000e-01 : f32
    %1140 = vector.broadcast %cst_438 : f32 to vector<1x32xf32>
    %1141 = arith.mulf %1140, %1139 : vector<1x32xf32>
    %1142 = math.tanh %1141 : vector<1x32xf32>
    %cst_439 = arith.constant 5.000000e-01 : f32
    %1143 = vector.broadcast %cst_439 : f32 to vector<1x32xf32>
    %1144 = arith.mulf %1143, %1142 : vector<1x32xf32>
    %cst_440 = arith.constant 5.000000e-01 : f32
    %1145 = vector.broadcast %cst_440 : f32 to vector<1x32xf32>
    %1146 = arith.addf %1144, %1145 : vector<1x32xf32>
    %1147 = arith.mulf %1136, %1072 : vector<1x32xf32>
    %1148 = arith.mulf %1128, %1138 : vector<1x32xf32>
    %1149 = arith.addf %1147, %1148 : vector<1x32xf32>
    %1150 = math.tanh %1149 : vector<1x32xf32>
    %1151 = arith.mulf %1146, %1150 : vector<1x32xf32>
    %1152 = vector.extract_strided_slice %1120 {offsets = [0, 0], sizes = [1, 32], strides = [1, 1]} : vector<1x128xf32> to vector<1x32xf32>
    %cst_441 = arith.constant 5.000000e-01 : f32
    %1153 = vector.broadcast %cst_441 : f32 to vector<1x32xf32>
    %1154 = arith.mulf %1153, %1152 : vector<1x32xf32>
    %1155 = math.tanh %1154 : vector<1x32xf32>
    %cst_442 = arith.constant 5.000000e-01 : f32
    %1156 = vector.broadcast %cst_442 : f32 to vector<1x32xf32>
    %1157 = arith.mulf %1156, %1155 : vector<1x32xf32>
    %cst_443 = arith.constant 5.000000e-01 : f32
    %1158 = vector.broadcast %cst_443 : f32 to vector<1x32xf32>
    %1159 = arith.addf %1157, %1158 : vector<1x32xf32>
    %1160 = vector.extract_strided_slice %1120 {offsets = [0, 32], sizes = [1, 32], strides = [1, 1]} : vector<1x128xf32> to vector<1x32xf32>
    %cst_444 = arith.constant 5.000000e-01 : f32
    %1161 = vector.broadcast %cst_444 : f32 to vector<1x32xf32>
    %1162 = arith.mulf %1161, %1160 : vector<1x32xf32>
    %1163 = math.tanh %1162 : vector<1x32xf32>
    %cst_445 = arith.constant 5.000000e-01 : f32
    %1164 = vector.broadcast %cst_445 : f32 to vector<1x32xf32>
    %1165 = arith.mulf %1164, %1163 : vector<1x32xf32>
    %cst_446 = arith.constant 5.000000e-01 : f32
    %1166 = vector.broadcast %cst_446 : f32 to vector<1x32xf32>
    %1167 = arith.addf %1165, %1166 : vector<1x32xf32>
    %1168 = vector.extract_strided_slice %1120 {offsets = [0, 64], sizes = [1, 32], strides = [1, 1]} : vector<1x128xf32> to vector<1x32xf32>
    %1169 = math.tanh %1168 : vector<1x32xf32>
    %1170 = vector.extract_strided_slice %1120 {offsets = [0, 96], sizes = [1, 32], strides = [1, 1]} : vector<1x128xf32> to vector<1x32xf32>
    %cst_447 = arith.constant 5.000000e-01 : f32
    %1171 = vector.broadcast %cst_447 : f32 to vector<1x32xf32>
    %1172 = arith.mulf %1171, %1170 : vector<1x32xf32>
    %1173 = math.tanh %1172 : vector<1x32xf32>
    %cst_448 = arith.constant 5.000000e-01 : f32
    %1174 = vector.broadcast %cst_448 : f32 to vector<1x32xf32>
    %1175 = arith.mulf %1174, %1173 : vector<1x32xf32>
    %cst_449 = arith.constant 5.000000e-01 : f32
    %1176 = vector.broadcast %cst_449 : f32 to vector<1x32xf32>
    %1177 = arith.addf %1175, %1176 : vector<1x32xf32>
    %1178 = arith.mulf %1167, %1103 : vector<1x32xf32>
    %1179 = arith.mulf %1159, %1169 : vector<1x32xf32>
    %1180 = arith.addf %1178, %1179 : vector<1x32xf32>
    %1181 = math.tanh %1180 : vector<1x32xf32>
    %1182 = arith.mulf %1177, %1181 : vector<1x32xf32>
    %c1_i32_450 = arith.constant 1 : i32
    %1183 = arith.addi %c6_i32_426, %c1_i32_450 : i32
    %1184 = arith.index_cast %1183 : i32 to index
    %c0_451 = arith.constant 0 : index
    %1185 = vector.load %arg27[%1184, %c0_451] : memref<9x64xf32, #tpu.memory_space<vmem>>, vector<1x32xf32>
    tpu.vector_store %arg27[%1184, %c0_451], %1151 {strides = array<i32>} : memref<9x64xf32, #tpu.memory_space<vmem>>, vector<1x32xf32>,
    %c1_i32_452 = arith.constant 1 : i32
    %1186 = arith.addi %1112, %c1_i32_452 : i32
    %1187 = arith.index_cast %1186 : i32 to index
    %c32_453 = arith.constant 32 : index
    %1188 = vector.load %arg27[%1187, %c32_453] : memref<9x64xf32, #tpu.memory_space<vmem>>, vector<1x32xf32>
    tpu.vector_store %arg27[%1187, %c32_453], %1182 {strides = array<i32>} : memref<9x64xf32, #tpu.memory_space<vmem>>, vector<1x32xf32>,
    %c7_i32_454 = arith.constant 7 : i32
    %c7_i32_455 = arith.constant 7 : i32
    %1189 = arith.subi %c7_i32_455, %c7_i32_454 : i32
    %1190 = arith.index_cast %c7_i32_454 : i32 to index
    %c0_456 = arith.constant 0 : index
    %1191 = vector.load %arg28[%1190, %c0_456] : memref<8x128xf32, #tpu.memory_space<vmem>>, vector<1x128xf32>
    %cst_457 = arith.constant dense<0.000000e+00> : vector<1x128xf32>
    %1192 = tpu.matmul %1151, %647, %cst_457 {dimension_numbers = #tpu.dot_dimension_numbers<[1], [0], [0], [1], [0, 0, 1, 1], [], []>} : vector<1x32xf32>, vector<32x128xf32>, vector<1x128xf32> -> vector<1x128xf32>
    %1193 = arith.addf %1191, %1192 : vector<1x128xf32>
    %1194 = arith.index_cast %1189 : i32 to index
    %c0_458 = arith.constant 0 : index
    %1195 = vector.load %arg29[%1194, %c0_458] : memref<8x128xf32, #tpu.memory_space<vmem>>, vector<1x128xf32>
    %cst_459 = arith.constant dense<0.000000e+00> : vector<1x128xf32>
    %1196 = tpu.matmul %1182, %648, %cst_459 {dimension_numbers = #tpu.dot_dimension_numbers<[1], [0], [0], [1], [0, 0, 1, 1], [], []>} : vector<1x32xf32>, vector<32x128xf32>, vector<1x128xf32> -> vector<1x128xf32>
    %1197 = arith.addf %1195, %1196 : vector<1x128xf32>
    %1198 = vector.extract_strided_slice %1193 {offsets = [0, 0], sizes = [1, 32], strides = [1, 1]} : vector<1x128xf32> to vector<1x32xf32>
    %cst_460 = arith.constant 5.000000e-01 : f32
    %1199 = vector.broadcast %cst_460 : f32 to vector<1x32xf32>
    %1200 = arith.mulf %1199, %1198 : vector<1x32xf32>
    %1201 = math.tanh %1200 : vector<1x32xf32>
    %cst_461 = arith.constant 5.000000e-01 : f32
    %1202 = vector.broadcast %cst_461 : f32 to vector<1x32xf32>
    %1203 = arith.mulf %1202, %1201 : vector<1x32xf32>
    %cst_462 = arith.constant 5.000000e-01 : f32
    %1204 = vector.broadcast %cst_462 : f32 to vector<1x32xf32>
    %1205 = arith.addf %1203, %1204 : vector<1x32xf32>
    %1206 = vector.extract_strided_slice %1193 {offsets = [0, 32], sizes = [1, 32], strides = [1, 1]} : vector<1x128xf32> to vector<1x32xf32>
    %cst_463 = arith.constant 5.000000e-01 : f32
    %1207 = vector.broadcast %cst_463 : f32 to vector<1x32xf32>
    %1208 = arith.mulf %1207, %1206 : vector<1x32xf32>
    %1209 = math.tanh %1208 : vector<1x32xf32>
    %cst_464 = arith.constant 5.000000e-01 : f32
    %1210 = vector.broadcast %cst_464 : f32 to vector<1x32xf32>
    %1211 = arith.mulf %1210, %1209 : vector<1x32xf32>
    %cst_465 = arith.constant 5.000000e-01 : f32
    %1212 = vector.broadcast %cst_465 : f32 to vector<1x32xf32>
    %1213 = arith.addf %1211, %1212 : vector<1x32xf32>
    %1214 = vector.extract_strided_slice %1193 {offsets = [0, 64], sizes = [1, 32], strides = [1, 1]} : vector<1x128xf32> to vector<1x32xf32>
    %1215 = math.tanh %1214 : vector<1x32xf32>
    %1216 = vector.extract_strided_slice %1193 {offsets = [0, 96], sizes = [1, 32], strides = [1, 1]} : vector<1x128xf32> to vector<1x32xf32>
    %cst_466 = arith.constant 5.000000e-01 : f32
    %1217 = vector.broadcast %cst_466 : f32 to vector<1x32xf32>
    %1218 = arith.mulf %1217, %1216 : vector<1x32xf32>
    %1219 = math.tanh %1218 : vector<1x32xf32>
    %cst_467 = arith.constant 5.000000e-01 : f32
    %1220 = vector.broadcast %cst_467 : f32 to vector<1x32xf32>
    %1221 = arith.mulf %1220, %1219 : vector<1x32xf32>
    %cst_468 = arith.constant 5.000000e-01 : f32
    %1222 = vector.broadcast %cst_468 : f32 to vector<1x32xf32>
    %1223 = arith.addf %1221, %1222 : vector<1x32xf32>
    %1224 = arith.mulf %1213, %1149 : vector<1x32xf32>
    %1225 = arith.mulf %1205, %1215 : vector<1x32xf32>
    %1226 = arith.addf %1224, %1225 : vector<1x32xf32>
    %1227 = math.tanh %1226 : vector<1x32xf32>
    %1228 = arith.mulf %1223, %1227 : vector<1x32xf32>
    %1229 = vector.extract_strided_slice %1197 {offsets = [0, 0], sizes = [1, 32], strides = [1, 1]} : vector<1x128xf32> to vector<1x32xf32>
    %cst_469 = arith.constant 5.000000e-01 : f32
    %1230 = vector.broadcast %cst_469 : f32 to vector<1x32xf32>
    %1231 = arith.mulf %1230, %1229 : vector<1x32xf32>
    %1232 = math.tanh %1231 : vector<1x32xf32>
    %cst_470 = arith.constant 5.000000e-01 : f32
    %1233 = vector.broadcast %cst_470 : f32 to vector<1x32xf32>
    %1234 = arith.mulf %1233, %1232 : vector<1x32xf32>
    %cst_471 = arith.constant 5.000000e-01 : f32
    %1235 = vector.broadcast %cst_471 : f32 to vector<1x32xf32>
    %1236 = arith.addf %1234, %1235 : vector<1x32xf32>
    %1237 = vector.extract_strided_slice %1197 {offsets = [0, 32], sizes = [1, 32], strides = [1, 1]} : vector<1x128xf32> to vector<1x32xf32>
    %cst_472 = arith.constant 5.000000e-01 : f32
    %1238 = vector.broadcast %cst_472 : f32 to vector<1x32xf32>
    %1239 = arith.mulf %1238, %1237 : vector<1x32xf32>
    %1240 = math.tanh %1239 : vector<1x32xf32>
    %cst_473 = arith.constant 5.000000e-01 : f32
    %1241 = vector.broadcast %cst_473 : f32 to vector<1x32xf32>
    %1242 = arith.mulf %1241, %1240 : vector<1x32xf32>
    %cst_474 = arith.constant 5.000000e-01 : f32
    %1243 = vector.broadcast %cst_474 : f32 to vector<1x32xf32>
    %1244 = arith.addf %1242, %1243 : vector<1x32xf32>
    %1245 = vector.extract_strided_slice %1197 {offsets = [0, 64], sizes = [1, 32], strides = [1, 1]} : vector<1x128xf32> to vector<1x32xf32>
    %1246 = math.tanh %1245 : vector<1x32xf32>
    %1247 = vector.extract_strided_slice %1197 {offsets = [0, 96], sizes = [1, 32], strides = [1, 1]} : vector<1x128xf32> to vector<1x32xf32>
    %cst_475 = arith.constant 5.000000e-01 : f32
    %1248 = vector.broadcast %cst_475 : f32 to vector<1x32xf32>
    %1249 = arith.mulf %1248, %1247 : vector<1x32xf32>
    %1250 = math.tanh %1249 : vector<1x32xf32>
    %cst_476 = arith.constant 5.000000e-01 : f32
    %1251 = vector.broadcast %cst_476 : f32 to vector<1x32xf32>
    %1252 = arith.mulf %1251, %1250 : vector<1x32xf32>
    %cst_477 = arith.constant 5.000000e-01 : f32
    %1253 = vector.broadcast %cst_477 : f32 to vector<1x32xf32>
    %1254 = arith.addf %1252, %1253 : vector<1x32xf32>
    %1255 = arith.mulf %1244, %1180 : vector<1x32xf32>
    %1256 = arith.mulf %1236, %1246 : vector<1x32xf32>
    %1257 = arith.addf %1255, %1256 : vector<1x32xf32>
    %1258 = math.tanh %1257 : vector<1x32xf32>
    %1259 = arith.mulf %1254, %1258 : vector<1x32xf32>
    %c1_i32_478 = arith.constant 1 : i32
    %1260 = arith.addi %c7_i32_454, %c1_i32_478 : i32
    %1261 = arith.index_cast %1260 : i32 to index
    %c0_479 = arith.constant 0 : index
    %1262 = vector.load %arg27[%1261, %c0_479] : memref<9x64xf32, #tpu.memory_space<vmem>>, vector<1x32xf32>
    tpu.vector_store %arg27[%1261, %c0_479], %1228 {strides = array<i32>} : memref<9x64xf32, #tpu.memory_space<vmem>>, vector<1x32xf32>,
    %c1_i32_480 = arith.constant 1 : i32
    %1263 = arith.addi %1189, %c1_i32_480 : i32
    %1264 = arith.index_cast %1263 : i32 to index
    %c32_481 = arith.constant 32 : index
    %1265 = vector.load %arg27[%1264, %c32_481] : memref<9x64xf32, #tpu.memory_space<vmem>>, vector<1x32xf32>
    tpu.vector_store %arg27[%1264, %c32_481], %1259 {strides = array<i32>} : memref<9x64xf32, #tpu.memory_space<vmem>>, vector<1x32xf32>,
    %c8_i32_482 = arith.constant 8 : i32
    %c0_483 = arith.constant 0 : index
    %c0_484 = arith.constant 0 : index
    %1266 = vector.load %arg27[%c0_483, %c0_484] : memref<9x64xf32, #tpu.memory_space<vmem>>, vector<9x64xf32>
    %c0_485 = arith.constant 0 : index
    %c0_486 = arith.constant 0 : index
    %1267 = vector.load %arg14[%c0_485, %c0_486] : memref<64x32xf32, #tpu.memory_space<vmem>>, vector<64x32xf32>
    %cst_487 = arith.constant dense<0.000000e+00> : vector<9x32xf32>
    %1268 = tpu.matmul %1266, %1267, %cst_487 {dimension_numbers = #tpu.dot_dimension_numbers<[1], [0], [0], [1], [0, 0, 1, 1], [], []>} : vector<9x64xf32>, vector<64x32xf32>, vector<9x32xf32> -> vector<9x32xf32>
    %c0_488 = arith.constant 0 : index
    %c0_489 = arith.constant 0 : index
    %1269 = vector.load %arg15[%c0_488, %c0_489] : memref<64x32xf32, #tpu.memory_space<vmem>>, vector<64x32xf32>
    %cst_490 = arith.constant dense<0.000000e+00> : vector<9x32xf32>
    %1270 = tpu.matmul %1266, %1269, %cst_490 {dimension_numbers = #tpu.dot_dimension_numbers<[1], [0], [0], [1], [0, 0, 1, 1], [], []>} : vector<9x64xf32>, vector<64x32xf32>, vector<9x32xf32> -> vector<9x32xf32>
    %c0_491 = arith.constant 0 : index
    %c0_492 = arith.constant 0 : index
    %1271 = vector.load %arg16[%c0_491, %c0_492] : memref<1x32xf32, #tpu.memory_space<vmem>>, vector<1x32xf32>
    %c0_493 = arith.constant 0 : index
    %c0_494 = arith.constant 0 : index
    %1272 = vector.load %arg17[%c0_493, %c0_494] : memref<1x32xf32, #tpu.memory_space<vmem>>, vector<1x32xf32>
    %1273 = vector.extract_strided_slice %1270 {offsets = [0, 0], sizes = [1, 32], strides = [1, 1]} : vector<9x32xf32> to vector<1x32xf32>
    %1274 = vector.broadcast %1273 : vector<1x32xf32> to vector<9x32xf32>
    %1275 = arith.addf %1268, %1274 : vector<9x32xf32>
    %1276 = vector.broadcast %1271 : vector<1x32xf32> to vector<9x32xf32>
    %1277 = arith.addf %1275, %1276 : vector<9x32xf32>
    %1278 = math.tanh %1277 : vector<9x32xf32>
    %1279 = vector.broadcast %1272 : vector<1x32xf32> to vector<9x32xf32>
    %1280 = arith.mulf %1278, %1279 : vector<9x32xf32>
    %cst_495 = arith.constant dense<0.000000e+00> : vector<9xf32>
    %1281 = vector.multi_reduction <add>, %1280, %cst_495 [1] : vector<9x32xf32> to vector<9xf32>
    %1282 = vector.shape_cast %1281 : vector<9xf32> to vector<9x1xf32>
    %1283 = vector.extract_strided_slice %1270 {offsets = [1, 0], sizes = [1, 32], strides = [1, 1]} : vector<9x32xf32> to vector<1x32xf32>
    %1284 = vector.broadcast %1283 : vector<1x32xf32> to vector<9x32xf32>
    %1285 = arith.addf %1268, %1284 : vector<9x32xf32>
    %1286 = vector.broadcast %1271 : vector<1x32xf32> to vector<9x32xf32>
    %1287 = arith.addf %1285, %1286 : vector<9x32xf32>
    %1288 = math.tanh %1287 : vector<9x32xf32>
    %1289 = vector.broadcast %1272 : vector<1x32xf32> to vector<9x32xf32>
    %1290 = arith.mulf %1288, %1289 : vector<9x32xf32>
    %cst_496 = arith.constant dense<0.000000e+00> : vector<9xf32>
    %1291 = vector.multi_reduction <add>, %1290, %cst_496 [1] : vector<9x32xf32> to vector<9xf32>
    %1292 = vector.shape_cast %1291 : vector<9xf32> to vector<9x1xf32>
    %1293 = vector.extract_strided_slice %1270 {offsets = [2, 0], sizes = [1, 32], strides = [1, 1]} : vector<9x32xf32> to vector<1x32xf32>
    %1294 = vector.broadcast %1293 : vector<1x32xf32> to vector<9x32xf32>
    %1295 = arith.addf %1268, %1294 : vector<9x32xf32>
    %1296 = vector.broadcast %1271 : vector<1x32xf32> to vector<9x32xf32>
    %1297 = arith.addf %1295, %1296 : vector<9x32xf32>
    %1298 = math.tanh %1297 : vector<9x32xf32>
    %1299 = vector.broadcast %1272 : vector<1x32xf32> to vector<9x32xf32>
    %1300 = arith.mulf %1298, %1299 : vector<9x32xf32>
    %cst_497 = arith.constant dense<0.000000e+00> : vector<9xf32>
    %1301 = vector.multi_reduction <add>, %1300, %cst_497 [1] : vector<9x32xf32> to vector<9xf32>
    %1302 = vector.shape_cast %1301 : vector<9xf32> to vector<9x1xf32>
    %1303 = vector.extract_strided_slice %1270 {offsets = [3, 0], sizes = [1, 32], strides = [1, 1]} : vector<9x32xf32> to vector<1x32xf32>
    %1304 = vector.broadcast %1303 : vector<1x32xf32> to vector<9x32xf32>
    %1305 = arith.addf %1268, %1304 : vector<9x32xf32>
    %1306 = vector.broadcast %1271 : vector<1x32xf32> to vector<9x32xf32>
    %1307 = arith.addf %1305, %1306 : vector<9x32xf32>
    %1308 = math.tanh %1307 : vector<9x32xf32>
    %1309 = vector.broadcast %1272 : vector<1x32xf32> to vector<9x32xf32>
    %1310 = arith.mulf %1308, %1309 : vector<9x32xf32>
    %cst_498 = arith.constant dense<0.000000e+00> : vector<9xf32>
    %1311 = vector.multi_reduction <add>, %1310, %cst_498 [1] : vector<9x32xf32> to vector<9xf32>
    %1312 = vector.shape_cast %1311 : vector<9xf32> to vector<9x1xf32>
    %1313 = vector.extract_strided_slice %1270 {offsets = [4, 0], sizes = [1, 32], strides = [1, 1]} : vector<9x32xf32> to vector<1x32xf32>
    %1314 = vector.broadcast %1313 : vector<1x32xf32> to vector<9x32xf32>
    %1315 = arith.addf %1268, %1314 : vector<9x32xf32>
    %1316 = vector.broadcast %1271 : vector<1x32xf32> to vector<9x32xf32>
    %1317 = arith.addf %1315, %1316 : vector<9x32xf32>
    %1318 = math.tanh %1317 : vector<9x32xf32>
    %1319 = vector.broadcast %1272 : vector<1x32xf32> to vector<9x32xf32>
    %1320 = arith.mulf %1318, %1319 : vector<9x32xf32>
    %cst_499 = arith.constant dense<0.000000e+00> : vector<9xf32>
    %1321 = vector.multi_reduction <add>, %1320, %cst_499 [1] : vector<9x32xf32> to vector<9xf32>
    %1322 = vector.shape_cast %1321 : vector<9xf32> to vector<9x1xf32>
    %1323 = vector.extract_strided_slice %1270 {offsets = [5, 0], sizes = [1, 32], strides = [1, 1]} : vector<9x32xf32> to vector<1x32xf32>
    %1324 = vector.broadcast %1323 : vector<1x32xf32> to vector<9x32xf32>
    %1325 = arith.addf %1268, %1324 : vector<9x32xf32>
    %1326 = vector.broadcast %1271 : vector<1x32xf32> to vector<9x32xf32>
    %1327 = arith.addf %1325, %1326 : vector<9x32xf32>
    %1328 = math.tanh %1327 : vector<9x32xf32>
    %1329 = vector.broadcast %1272 : vector<1x32xf32> to vector<9x32xf32>
    %1330 = arith.mulf %1328, %1329 : vector<9x32xf32>
    %cst_500 = arith.constant dense<0.000000e+00> : vector<9xf32>
    %1331 = vector.multi_reduction <add>, %1330, %cst_500 [1] : vector<9x32xf32> to vector<9xf32>
    %1332 = vector.shape_cast %1331 : vector<9xf32> to vector<9x1xf32>
    %1333 = vector.extract_strided_slice %1270 {offsets = [6, 0], sizes = [1, 32], strides = [1, 1]} : vector<9x32xf32> to vector<1x32xf32>
    %1334 = vector.broadcast %1333 : vector<1x32xf32> to vector<9x32xf32>
    %1335 = arith.addf %1268, %1334 : vector<9x32xf32>
    %1336 = vector.broadcast %1271 : vector<1x32xf32> to vector<9x32xf32>
    %1337 = arith.addf %1335, %1336 : vector<9x32xf32>
    %1338 = math.tanh %1337 : vector<9x32xf32>
    %1339 = vector.broadcast %1272 : vector<1x32xf32> to vector<9x32xf32>
    %1340 = arith.mulf %1338, %1339 : vector<9x32xf32>
    %cst_501 = arith.constant dense<0.000000e+00> : vector<9xf32>
    %1341 = vector.multi_reduction <add>, %1340, %cst_501 [1] : vector<9x32xf32> to vector<9xf32>
    %1342 = vector.shape_cast %1341 : vector<9xf32> to vector<9x1xf32>
    %1343 = vector.extract_strided_slice %1270 {offsets = [7, 0], sizes = [1, 32], strides = [1, 1]} : vector<9x32xf32> to vector<1x32xf32>
    %1344 = vector.broadcast %1343 : vector<1x32xf32> to vector<9x32xf32>
    %1345 = arith.addf %1268, %1344 : vector<9x32xf32>
    %1346 = vector.broadcast %1271 : vector<1x32xf32> to vector<9x32xf32>
    %1347 = arith.addf %1345, %1346 : vector<9x32xf32>
    %1348 = math.tanh %1347 : vector<9x32xf32>
    %1349 = vector.broadcast %1272 : vector<1x32xf32> to vector<9x32xf32>
    %1350 = arith.mulf %1348, %1349 : vector<9x32xf32>
    %cst_502 = arith.constant dense<0.000000e+00> : vector<9xf32>
    %1351 = vector.multi_reduction <add>, %1350, %cst_502 [1] : vector<9x32xf32> to vector<9xf32>
    %1352 = vector.shape_cast %1351 : vector<9xf32> to vector<9x1xf32>
    %1353 = vector.extract_strided_slice %1270 {offsets = [8, 0], sizes = [1, 32], strides = [1, 1]} : vector<9x32xf32> to vector<1x32xf32>
    %1354 = vector.broadcast %1353 : vector<1x32xf32> to vector<9x32xf32>
    %1355 = arith.addf %1268, %1354 : vector<9x32xf32>
    %1356 = vector.broadcast %1271 : vector<1x32xf32> to vector<9x32xf32>
    %1357 = arith.addf %1355, %1356 : vector<9x32xf32>
    %1358 = math.tanh %1357 : vector<9x32xf32>
    %1359 = vector.broadcast %1272 : vector<1x32xf32> to vector<9x32xf32>
    %1360 = arith.mulf %1358, %1359 : vector<9x32xf32>
    %cst_503 = arith.constant dense<0.000000e+00> : vector<9xf32>
    %1361 = vector.multi_reduction <add>, %1360, %cst_503 [1] : vector<9x32xf32> to vector<9xf32>
    %1362 = vector.shape_cast %1361 : vector<9xf32> to vector<9x1xf32>
    %1363 = tpu.concatenate %1282, %1292, %1302, %1312, %1322, %1332, %1342, %1352, %1362 in 1 : vector<9x1xf32>, vector<9x1xf32>, vector<9x1xf32>, vector<9x1xf32>, vector<9x1xf32>, vector<9x1xf32>, vector<9x1xf32>, vector<9x1xf32>, vector<9x1xf32> -> vector<9x9xf32>
    %c0_504 = arith.constant 0 : index
    %c0_505 = arith.constant 0 : index
    %1364 = vector.load %arg18[%c0_504, %c0_505] : memref<1x1xf32, #tpu.memory_space<vmem>>, vector<1x1xf32>
    %1365 = vector.broadcast %1364 : vector<1x1xf32> to vector<9x9xf32>
    %1366 = arith.addf %1363, %1365 : vector<9x9xf32>
    %c0_506 = arith.constant 0 : index
    %c0_507 = arith.constant 0 : index
    %1367 = vector.load %arg24[%c0_506, %c0_507] : memref<9x9xf32, #tpu.memory_space<vmem>>, vector<9x9xf32>
    tpu.vector_store %arg24[%c0_506, %c0_507], %1366 {strides = array<i32>} : memref<9x9xf32, #tpu.memory_space<vmem>>, vector<9x9xf32>,
    %c0_508 = arith.constant 0 : index
    %c0_509 = arith.constant 0 : index
    %1368 = memref.load %arg0[%c0_508, %c0_509] : memref<8x2xi32, #tpu.memory_space<smem>>
    %c0_510 = arith.constant 0 : index
    %c1 = arith.constant 1 : index
    %1369 = memref.load %arg0[%c0_510, %c1] : memref<8x2xi32, #tpu.memory_space<smem>>
    %1370 = arith.index_cast %1368 : i32 to index
    %c0_511 = arith.constant 0 : index
    %1371 = vector.load %arg27[%1370, %c0_511] : memref<9x64xf32, #tpu.memory_space<vmem>>, vector<1x64xf32>
    %1372 = arith.index_cast %1369 : i32 to index
    %c0_512 = arith.constant 0 : index
    %1373 = vector.load %arg27[%1372, %c0_512] : memref<9x64xf32, #tpu.memory_space<vmem>>, vector<1x64xf32>
    %c1_513 = arith.constant 1 : index
    %c0_514 = arith.constant 0 : index
    %1374 = memref.load %arg0[%c1_513, %c0_514] : memref<8x2xi32, #tpu.memory_space<smem>>
    %c1_515 = arith.constant 1 : index
    %c1_516 = arith.constant 1 : index
    %1375 = memref.load %arg0[%c1_515, %c1_516] : memref<8x2xi32, #tpu.memory_space<smem>>
    %1376 = arith.index_cast %1374 : i32 to index
    %c0_517 = arith.constant 0 : index
    %1377 = vector.load %arg27[%1376, %c0_517] : memref<9x64xf32, #tpu.memory_space<vmem>>, vector<1x64xf32>
    %1378 = arith.index_cast %1375 : i32 to index
    %c0_518 = arith.constant 0 : index
    %1379 = vector.load %arg27[%1378, %c0_518] : memref<9x64xf32, #tpu.memory_space<vmem>>, vector<1x64xf32>
    %c2 = arith.constant 2 : index
    %c0_519 = arith.constant 0 : index
    %1380 = memref.load %arg0[%c2, %c0_519] : memref<8x2xi32, #tpu.memory_space<smem>>
    %c2_520 = arith.constant 2 : index
    %c1_521 = arith.constant 1 : index
    %1381 = memref.load %arg0[%c2_520, %c1_521] : memref<8x2xi32, #tpu.memory_space<smem>>
    %1382 = arith.index_cast %1380 : i32 to index
    %c0_522 = arith.constant 0 : index
    %1383 = vector.load %arg27[%1382, %c0_522] : memref<9x64xf32, #tpu.memory_space<vmem>>, vector<1x64xf32>
    %1384 = arith.index_cast %1381 : i32 to index
    %c0_523 = arith.constant 0 : index
    %1385 = vector.load %arg27[%1384, %c0_523] : memref<9x64xf32, #tpu.memory_space<vmem>>, vector<1x64xf32>
    %c3 = arith.constant 3 : index
    %c0_524 = arith.constant 0 : index
    %1386 = memref.load %arg0[%c3, %c0_524] : memref<8x2xi32, #tpu.memory_space<smem>>
    %c3_525 = arith.constant 3 : index
    %c1_526 = arith.constant 1 : index
    %1387 = memref.load %arg0[%c3_525, %c1_526] : memref<8x2xi32, #tpu.memory_space<smem>>
    %1388 = arith.index_cast %1386 : i32 to index
    %c0_527 = arith.constant 0 : index
    %1389 = vector.load %arg27[%1388, %c0_527] : memref<9x64xf32, #tpu.memory_space<vmem>>, vector<1x64xf32>
    %1390 = arith.index_cast %1387 : i32 to index
    %c0_528 = arith.constant 0 : index
    %1391 = vector.load %arg27[%1390, %c0_528] : memref<9x64xf32, #tpu.memory_space<vmem>>, vector<1x64xf32>
    %c4 = arith.constant 4 : index
    %c0_529 = arith.constant 0 : index
    %1392 = memref.load %arg0[%c4, %c0_529] : memref<8x2xi32, #tpu.memory_space<smem>>
    %c4_530 = arith.constant 4 : index
    %c1_531 = arith.constant 1 : index
    %1393 = memref.load %arg0[%c4_530, %c1_531] : memref<8x2xi32, #tpu.memory_space<smem>>
    %1394 = arith.index_cast %1392 : i32 to index
    %c0_532 = arith.constant 0 : index
    %1395 = vector.load %arg27[%1394, %c0_532] : memref<9x64xf32, #tpu.memory_space<vmem>>, vector<1x64xf32>
    %1396 = arith.index_cast %1393 : i32 to index
    %c0_533 = arith.constant 0 : index
    %1397 = vector.load %arg27[%1396, %c0_533] : memref<9x64xf32, #tpu.memory_space<vmem>>, vector<1x64xf32>
    %c5 = arith.constant 5 : index
    %c0_534 = arith.constant 0 : index
    %1398 = memref.load %arg0[%c5, %c0_534] : memref<8x2xi32, #tpu.memory_space<smem>>
    %c5_535 = arith.constant 5 : index
    %c1_536 = arith.constant 1 : index
    %1399 = memref.load %arg0[%c5_535, %c1_536] : memref<8x2xi32, #tpu.memory_space<smem>>
    %1400 = arith.index_cast %1398 : i32 to index
    %c0_537 = arith.constant 0 : index
    %1401 = vector.load %arg27[%1400, %c0_537] : memref<9x64xf32, #tpu.memory_space<vmem>>, vector<1x64xf32>
    %1402 = arith.index_cast %1399 : i32 to index
    %c0_538 = arith.constant 0 : index
    %1403 = vector.load %arg27[%1402, %c0_538] : memref<9x64xf32, #tpu.memory_space<vmem>>, vector<1x64xf32>
    %c6 = arith.constant 6 : index
    %c0_539 = arith.constant 0 : index
    %1404 = memref.load %arg0[%c6, %c0_539] : memref<8x2xi32, #tpu.memory_space<smem>>
    %c6_540 = arith.constant 6 : index
    %c1_541 = arith.constant 1 : index
    %1405 = memref.load %arg0[%c6_540, %c1_541] : memref<8x2xi32, #tpu.memory_space<smem>>
    %1406 = arith.index_cast %1404 : i32 to index
    %c0_542 = arith.constant 0 : index
    %1407 = vector.load %arg27[%1406, %c0_542] : memref<9x64xf32, #tpu.memory_space<vmem>>, vector<1x64xf32>
    %1408 = arith.index_cast %1405 : i32 to index
    %c0_543 = arith.constant 0 : index
    %1409 = vector.load %arg27[%1408, %c0_543] : memref<9x64xf32, #tpu.memory_space<vmem>>, vector<1x64xf32>
    %c7 = arith.constant 7 : index
    %c0_544 = arith.constant 0 : index
    %1410 = memref.load %arg0[%c7, %c0_544] : memref<8x2xi32, #tpu.memory_space<smem>>
    %c7_545 = arith.constant 7 : index
    %c1_546 = arith.constant 1 : index
    %1411 = memref.load %arg0[%c7_545, %c1_546] : memref<8x2xi32, #tpu.memory_space<smem>>
    %1412 = arith.index_cast %1410 : i32 to index
    %c0_547 = arith.constant 0 : index
    %1413 = vector.load %arg27[%1412, %c0_547] : memref<9x64xf32, #tpu.memory_space<vmem>>, vector<1x64xf32>
    %1414 = arith.index_cast %1411 : i32 to index
    %c0_548 = arith.constant 0 : index
    %1415 = vector.load %arg27[%1414, %c0_548] : memref<9x64xf32, #tpu.memory_space<vmem>>, vector<1x64xf32>
    %1416 = tpu.concatenate %1371, %1377, %1383, %1389, %1395, %1401, %1407, %1413 in 0 : vector<1x64xf32>, vector<1x64xf32>, vector<1x64xf32>, vector<1x64xf32>, vector<1x64xf32>, vector<1x64xf32>, vector<1x64xf32>, vector<1x64xf32> -> vector<8x64xf32>
    %1417 = tpu.concatenate %1373, %1379, %1385, %1391, %1397, %1403, %1409, %1415 in 0 : vector<1x64xf32>, vector<1x64xf32>, vector<1x64xf32>, vector<1x64xf32>, vector<1x64xf32>, vector<1x64xf32>, vector<1x64xf32>, vector<1x64xf32> -> vector<8x64xf32>
    %c0_549 = arith.constant 0 : index
    %c0_550 = arith.constant 0 : index
    %1418 = vector.load %arg19[%c0_549, %c0_550] : memref<64x32xf32, #tpu.memory_space<vmem>>, vector<64x32xf32>
    %cst_551 = arith.constant dense<0.000000e+00> : vector<8x32xf32>
    %1419 = tpu.matmul %1416, %1418, %cst_551 {dimension_numbers = #tpu.dot_dimension_numbers<[1], [0], [0], [1], [0, 0, 1, 1], [], []>} : vector<8x64xf32>, vector<64x32xf32>, vector<8x32xf32> -> vector<8x32xf32>
    %c0_552 = arith.constant 0 : index
    %c0_553 = arith.constant 0 : index
    %1420 = vector.load %arg20[%c0_552, %c0_553] : memref<64x32xf32, #tpu.memory_space<vmem>>, vector<64x32xf32>
    %cst_554 = arith.constant dense<0.000000e+00> : vector<8x32xf32>
    %1421 = tpu.matmul %1417, %1420, %cst_554 {dimension_numbers = #tpu.dot_dimension_numbers<[1], [0], [0], [1], [0, 0, 1, 1], [], []>} : vector<8x64xf32>, vector<64x32xf32>, vector<8x32xf32> -> vector<8x32xf32>
    %1422 = arith.addf %1419, %1421 : vector<8x32xf32>
    %c0_555 = arith.constant 0 : index
    %c0_556 = arith.constant 0 : index
    %1423 = vector.load %arg21[%c0_555, %c0_556] : memref<1x32xf32, #tpu.memory_space<vmem>>, vector<1x32xf32>
    %1424 = vector.broadcast %1423 : vector<1x32xf32> to vector<8x32xf32>
    %1425 = arith.addf %1422, %1424 : vector<8x32xf32>
    %1426 = math.tanh %1425 : vector<8x32xf32>
    %c0_557 = arith.constant 0 : index
    %c0_558 = arith.constant 0 : index
    %1427 = vector.load %arg22[%c0_557, %c0_558] : memref<32x128xf32, #tpu.memory_space<vmem>>, vector<32x128xf32>
    %cst_559 = arith.constant dense<0.000000e+00> : vector<8x128xf32>
    %1428 = tpu.matmul %1426, %1427, %cst_559 {dimension_numbers = #tpu.dot_dimension_numbers<[1], [0], [0], [1], [0, 0, 1, 1], [], []>} : vector<8x32xf32>, vector<32x128xf32>, vector<8x128xf32> -> vector<8x128xf32>
    %c0_560 = arith.constant 0 : index
    %c0_561 = arith.constant 0 : index
    %1429 = vector.load %arg23[%c0_560, %c0_561] : memref<1x128xf32, #tpu.memory_space<vmem>>, vector<1x128xf32>
    %1430 = vector.broadcast %1429 : vector<1x128xf32> to vector<8x128xf32>
    %1431 = arith.addf %1428, %1430 : vector<8x128xf32>
    %c0_562 = arith.constant 0 : index
    %c0_563 = arith.constant 0 : index
    %1432 = vector.load %arg25[%c0_562, %c0_563] : memref<8x128xf32, #tpu.memory_space<vmem>>, vector<8x128xf32>
    tpu.vector_store %arg25[%c0_562, %c0_563], %1431 {strides = array<i32>} : memref<8x128xf32, #tpu.memory_space<vmem>>, vector<8x128xf32>,
    return
  }
}

</mosaic_0001>

<bundles_post_ra>
// kernel: dep_parser_forward.1
= control target key start
LH: loop header
LB: loop body
LE: loop exit
PB: predicated region body
PF: predicated region fallthrough
CT: control target
= control target key end

     0   :  { %s7046_s0 = inlined_call_operand.vmem [shape: s32[8,2], index: 0, kind: input, shape index: {}]   ;;  %s7047_s1 = inlined_call_operand.vmem [shape: f32[8,32], index: 1, kind: input, shape index: {}]   ;;  %s7048_s2 = inlined_call_operand.vmem [shape: f32[32,128], index: 2, kind: input, shape index: {}]   ;;  %s7049_s3 = inlined_call_operand.vmem [shape: f32[32,128], index: 3, kind: input, shape index: {}]   ;;  %s7050_s4 = inlined_call_operand.vmem [shape: f32[1,128], index: 4, kind: input, shape index: {}]   ;;  %s7051_s5 = inlined_call_operand.vmem [shape: f32[32,128], index: 5, kind: input, shape index: {}]   ;;  %s7052_s6 = inlined_call_operand.vmem [shape: f32[32,128], index: 6, kind: input, shape index: {}]   ;;  %s7053_s7 = inlined_call_operand.vmem [shape: f32[1,128], index: 7, kind: input, shape index: {}]   ;;  %s7054_s8 = inlined_call_operand.vmem [shape: f32[64,128], index: 8, kind: input, shape index: {}]   ;;  %s7055_s9 = inlined_call_operand.vmem [shape: f32[32,128], index: 9, kind: input, shape index: {}]   ;;  %s7056_s10 = inlined_call_operand.vmem [shape: f32[1,128], index: 10, kind: input, shape index: {}]   ;;  %s7057_s11 = inlined_call_operand.vmem [shape: f32[64,128], index: 11, kind: input, shape index: {}]   ;;  %s7058_s12 = inlined_call_operand.vmem [shape: f32[32,128], index: 12, kind: input, shape index: {}]   ;;  %s7059_s13 = inlined_call_operand.vmem [shape: f32[1,128], index: 13, kind: input, shape index: {}]   ;;  %s7060_s14 = inlined_call_operand.vmem [shape: f32[64,32], index: 14, kind: input, shape index: {}]   ;;  %s7061_s15 = inlined_call_operand.vmem [shape: f32[64,32], index: 15, kind: input, shape index: {}]   ;;  %s7062_s16 = inlined_call_operand.vmem [shape: f32[1,32], index: 16, kind: input, shape index: {}]   ;;  %s7063_s17 = inlined_call_operand.vmem [shape: f32[1,32], index: 17, kind: input, shape index: {}]   ;;  %s7064_s18 = inlined_call_operand.<no memory space> [shape: f32[1,1], index: 18, kind: input, shape index: {}]   ;;  %s7065_s19 = inlined_call_operand.vmem [shape: f32[64,32], index: 19, kind: input, shape index: {}]   ;;  %s7066_s20 = inlined_call_operand.vmem [shape: f32[64,32], index: 20, kind: input, shape index: {}]   ;;  %s7067_s21 = inlined_call_operand.vmem [shape: f32[1,32], index: 21, kind: input, shape index: {}]   ;;  %s7068_s22 = inlined_call_operand.vmem [shape: f32[32,128], index: 22, kind: input, shape index: {}]   ;;  %s7069_s23 = inlined_call_operand.vmem [shape: f32[1,128], index: 23, kind: input, shape index: {}]   ;;  %s7070_s24 = inlined_call_operand.hbm [shape: f32[9,9], index: 24, kind: output, shape index: {0}]   ;;  %s7071_s25 = inlined_call_operand.hbm [shape: f32[8,128], index: 25, kind: output, shape index: {1}]  }
   0x1   :  { %7079 = sst [smem:[#allocation16_spill]] %s7046_s0  ;;  %v31_v0 = vstv %s7064_s18 }
   0x2   :  { %7080 = sst [smem:[#allocation17_spill]] %s7047_s1  ;;  %32 = vst [vmem:[#allocation6] sm:$0x1] %v31_v0 }
   0x3   :  { %7081 = sst [smem:[#allocation18_spill]] %s7048_s2 }
   0x4   :  { %7082 = sst [smem:[#allocation19_spill]] %s7049_s3 }
   0x5   :  { %7083 = sst [smem:[#allocation20_spill]] %s7050_s4 }
   0x6   :  { %7084 = sst [smem:[#allocation21_spill]] %s7051_s5 }
   0x7   :  { %7085 = sst [smem:[#allocation22_spill]] %s7052_s6 }
   0x8   :  { %7086 = sst [smem:[#allocation23_spill]] %s7053_s7 }
   0x9   :  { %7087 = sst [smem:[#allocation24_spill]] %s7054_s8 }
   0xa   :  { %7088 = sst [smem:[#allocation25_spill]] %s7055_s9 }
   0xb   :  { %7089 = sst [smem:[#allocation26_spill]] %s7071_s25 }
   0xc   :  { %33 = vsyncpa [#allocation9], 0 }
   0xd   :  { %34 = vsyncpa [#allocation8], 0 }
   0xe   :  { %35 = vsyncpa [#allocation12], 0  ;;  %s7090_s7 = sld [smem:[#allocation16_spill]] }
  0x14   :  { %s42_s3 = sshll.u32 %s7090_s7, 4  ;;  %s43_s3 = int_to_ptr.vmem [resolvable:$true] %s42_s3 }
  0x15   :  { %s5847_s26 = scalar_lea.vmem %s43_s3, 128  ;;  %p5852_p1 = scmp.lt.s32.totalorder %s43_s3, %s43_s3 }
  0x16   :  { %p5848_p0 = scmp.ne.s32.totalorder %s43_s3, %s5847_s26  ;;  %p5853_p2 = scmp.lt.s32.totalorder %s5847_s26, %s5847_s26 }
  0x18   :  { %p5854_p3 = por %p5853_p2, %p5852_p1 }
  0x1a   :  { %p5855_p4 = pnand %p5854_p3, %p5848_p0 }
  0x1c   :  { %5858 = shalt.err (!%p5855_p4)
}
  0x1d   :  { %s5909_s1 = smov [#allocation7]  }
  0x1e   :  { %45 = dma.vmem_to_smem %s43_s3, 128, %s5909_s1, [#allocation9]  }
  0x1f   :  { %5903 = dma.done.wait [#allocation9], 128  }
  0x20   :  { %5904 = vsyncadd [#allocation9], 4294967168 }
  0x21   :  { %95 = sfence }
  0x22   :  { %s7091_s27 = sld [smem:[#allocation18_spill]]  ;;  %s7092_s0 = sld [smem:[#allocation21_spill]]  ;;  %v5910_v4 = vmov 0.0|0.0   ;;  %vm5911_vm0 = vmmov 0   ;;  %v5912_v10 = vmov 0.0   ;;  %vm108_vm1 = vcmask 261120  }
  0x23   :  { %5314 = vmatprep.subr.bf16.mxu0 %v5910_v4  ;;  %5320 = vmatprep.subr.bf16.mxu1 %v5910_v4  ;;  %s7093_s28 = sld [smem:[#allocation19_spill]]  ;;  %s7094_s2 = sld [smem:[#allocation22_spill]]  ;;  %vm468_vm2 = vcmask 253952   ;;  %vm474_vm3 = vcmask 516352   ;;  %vm1922_vm4 = vcmask 523264   ;;  %vm1904_vm5 = vcmask 516096  }
  0x24   :  { %4823 = vmatprep.mubr.msk.f32.mxu0 %vm5911_vm0, %v5912_v10  ;;  %4834 = vmatprep.mubr.msk.f32.mxu1 %vm5911_vm0, %v5912_v10  ;;  %s7095_s26 = sld [smem:[#allocation17_spill]]  ;;  %s7097_s7 = sld [smem:[#allocation23_spill]]  ;;  %1905 = vst.msk [vmem:[#allocation3] sm:$0x1] %vm1904_vm5, %v5912_v10  ;;  %vm4176_vm6 = vcmask 1040384   ;;  %vm4178_vm7 = vcmask 1041408  }
  0x25   :  { %s5913_s3 = smov 64   ;;  %s7098_s8 = sld [smem:[#allocation24_spill]]  ;;  %vm4180_vm8 = vcmask 1042432   ;;  %vm4182_vm9 = vcmask 1043456   ;;  %vm4184_vm10 = vcmask 1044480   ;;  %vm4186_vm11 = vcmask 1045504  }
  0x26   :  { %s7099_s6 = sld [smem:[#allocation25_spill]]  ;;  %s6792_s29 = sld [smem:[#allocation7 + $0x381]]  ;;  %vm4188_vm12 = vcmask 1046528   ;;  %vm4067_vm13 = vcmask 7168   ;;  %vm4070_vm14 = vcmask 15360   ;;  %vm4073_vm15 = vcmask 23552  }
  0x27   :  { %s6837_s30 = sld [smem:[#allocation7 + $0x380]]  ;;  %vm4103_vm5 = vcmask 72704  }
  0x28   :  { %v97_v1 = vld [vmem:[%s7091_s27] sm:$0xff]  ;;  %v98_v2 = vld [vmem:[%s7091_s27 + $0x8] sm:$0xff]  ;;  %v99_v7 = vld [vmem:[%s7091_s27 + $0x10] sm:$0xff] }
  0x29   :  { %v183_v3 = vld [vmem:[%s7092_s0] sm:$0xff]  ;;  %v5315_v5 = vpack.c.bf16 %v98_v2, %v97_v1  ;;  %v184_v6 = vld [vmem:[%s7092_s0 + $0x8] sm:$0xff]  ;;  %v100_v8 = vld [vmem:[%s7091_s27 + $0x18] sm:$0xff]  ;;  %s6826_s27 = sld [smem:[#allocation7 + $0x300]] }
  0x2a   :  { %v5321_v9 = vpack.c.bf16 %v184_v6, %v183_v3  ;;  %v185_v11 = vld [vmem:[%s7092_s0 + $0x10] sm:$0xff]  ;;  %v186_v12 = vld [vmem:[%s7092_s0 + $0x18] sm:$0xff]  ;;  %v5318_v13 = vpack.c.bf16 %v100_v8, %v99_v7  ;;  %v265_v15 = vld [vmem:[%s7093_s28] sm:$0xff]  ;;  %s6788_s0 = sld [smem:[#allocation7 + $0x281]] }
  0x2b   :  { %5316 = vmatpush3.bf16.msra.mxu0 %v5315_v5  ;;  %v5324_v14 = vpack.c.bf16 %v186_v12, %v185_v11  ;;  %v266_v16 = vld [vmem:[%s7093_s28 + $0x8] sm:$0xff]  ;;  %v269_v17 = vld [vmem:[%s7094_s2] sm:$0xff]  ;;  %v267_v21 = vld [vmem:[%s7093_s28 + $0x10] sm:$0xff] }
  0x2c   :  { %5317 = vmatprep.subr.bf16.mxu0 %v5910_v4  ;;  %5322 = vmatpush3.bf16.msra.mxu1 %v5321_v9  ;;  %v270_v18 = vld [vmem:[%s7094_s2 + $0x8] sm:$0xff]  ;;  %v96_v19 = vld [vmem:[%s7095_s26] sm:$0xff]  ;;  %v6103_v20 = vpack.c.bf16 %v266_v16, %v265_v15  ;;  %v268_v22 = vld [vmem:[%s7093_s28 + $0x18] sm:$0xff]  ;;  %s5914_s26 = smov 32   ;;  %s6790_s28 = sld [smem:[#allocation7 + $0x301]] }
  0x2d   :  { %5323 = vmatprep.subr.bf16.mxu1 %v5910_v4  ;;  %v6112_v23 = vpack.c.bf16 %v270_v18, %v269_v17  ;;  %v271_v24 = vld [vmem:[%s7094_s2 + $0x10] sm:$0xff]  ;;  %v272_v25 = vld [vmem:[%s7094_s2 + $0x18] sm:$0xff]  ;;  %v6124_v26 = vpack.c.bf16 %v268_v22, %v267_v21  ;;  %s7096_s2 = sld [smem:[#allocation20_spill]]  ;;  %v4523_v29 = vld [vmem:[%s7097_s7] ss:$0 sm:$0xff]  ;;  %s6805_s7 = sld [smem:[#allocation7 + $0x180]] }
  0x2e   :  { %v6128_v27 = vpack.c.bf16 %v272_v25, %v271_v24 }
  0x2f   :  { %5319 = vmatpush3.bf16.msra.mxu0 %v5318_v13 }
  0x30   :  { %5325 = vmatpush3.bf16.msra.mxu1 %v5324_v14  ;;  %5326 = vmatprep.subr.bf16.mxu0 %v5910_v4  ;;  %s4141_s5 = scalar_lea.vmem [#allocation3], %s6788_s0 }
  0x31   :  { %5332 = vmatprep.subr.bf16.mxu1 %v5910_v4 }
  0x32   :  { %4824 = vmatmul.mubr.msk.f32.vlgmr.msra.gmra.mrb[0].mxu0 %vm108_vm1, %v96_v19 }
  0x33   :  { %5328 = vmatpush3.bf16.msra.mxu0 %v6103_v20  ;;  %4835 = vmatmul.mubr.msk.f32.vlgmr.msra.gmra.mrb[0].mxu1 %vm108_vm1, %v96_v19  ;;  %v4521_v28 = vld [vmem:[%s7096_s2] ss:$0 sm:$0xff]  ;;  %s6800_s2 = sld [smem:[#allocation7 + $0x100]] }
  0x34   :  { %5329 = vmatprep.subr.bf16.mxu0 %v5910_v4  ;;  %5334 = vmatpush3.bf16.msra.mxu1 %v6112_v23 }
  0x35   :  { %4845 = vmatprep.mubr.msk.f32.mxu0 %vm5911_vm0, %v5912_v10  ;;  %5335 = vmatprep.subr.bf16.mxu1 %v5910_v4 }
  0x36   :  { %4856 = vmatprep.mubr.msk.f32.mxu1 %vm5911_vm0, %v5912_v10 }
  0x37   :  { %5331 = vmatpush3.bf16.msra.mxu0 %v6124_v26 }
  0x38   :  { %5337 = vmatpush3.bf16.msra.mxu1 %v6128_v27  ;;  %5338 = vmatprep.subr.bf16.mxu0 %v5910_v4 }
  0x39   :  { %5344 = vmatprep.subr.bf16.mxu1 %v5910_v4 }
  0x3a   :  { %4846 = vmatmul.mubr.f32.vlgmr.msra.gmra.mrb[2].mxu0 %v5912_v10 }
  0x3b   :  { %4857 = vmatmul.mubr.f32.vlgmr.msra.gmra.mrb[2].mxu1 %v5912_v10  ;;  %5340 = vmatpush3.bf16.msra.mxu0 %v6103_v20 }
  0x3c   :  { %5341 = vmatprep.subr.bf16.mxu0 %v5910_v4  ;;  %5346 = vmatpush3.bf16.msra.mxu1 %v6112_v23 }
  0x3d   :  { %4867 = vmatprep.mubr.msk.f32.mxu0 %vm5911_vm0, %v5912_v10  ;;  %5347 = vmatprep.subr.bf16.mxu1 %v5910_v4 }
  0x3e   :  { %4878 = vmatprep.mubr.msk.f32.mxu1 %vm5911_vm0, %v5912_v10 }
  0x3f   :  { %5343 = vmatpush3.bf16.msra.mxu0 %v6124_v26 }
  0x40   :  { %5349 = vmatpush3.bf16.msra.mxu1 %v6128_v27  ;;  %5350 = vmatprep.subr.bf16.mxu0 %v5910_v4 }
  0x41   :  { %5356 = vmatprep.subr.bf16.mxu1 %v5910_v4 }
 0x105   :  { %v178_v30 = vpop.f32.mrb[0].mxu0 }
 0x106   :  { %v179_v31 = vadd.f32 %v4521_v28, %v178_v30  ;;  %v4825_v32 = vpop.f32.mrb[1].mxu0  ;;  %v260_v33 = vpop.f32.mrb[0].mxu1 }
 0x107   :  { %v261_v34 = vadd.f32 %v4523_v29, %v260_v33  ;;  %v4836_v35 = vpop.f32.mrb[1].mxu1 }
 0x108   :  { %182 = vst [vmem:[#allocation4] sm:$0xff] %v179_v31 }
 0x109   :  { %264 = vst [vmem:[#allocation5] sm:$0xff] %v261_v34 }
 0x10d   :  { %v343_v36 = vpop.f32.mrb[2].mxu0 }
 0x10e   :  { %v4847_v37 = vpop.f32.mrb[3].mxu0  ;;  %v415_v38 = vpop.f32.mrb[2].mxu1 }
 0x10f   :  { %v273_v39 = vld [vmem:[#allocation4] sm:$0x1]  ;;  %v4858_v40 = vpop.f32.mrb[3].mxu1  ;;  %v476_v9 = vld [vmem:[#allocation4 + $0x1] sm:$0x1] }
 0x110   :  { %v347_v41 = vadd.f32 %v343_v36, %v273_v39  ;;  %v348_v42 = vld [vmem:[#allocation5 + $0x7] sm:$0x1]  ;;  %v550_v14 = vld [vmem:[#allocation5 + $0x6] sm:$0x1] }
 0x111   :  { %v419_v43 = vadd.f32 %v415_v38, %v348_v42 }
 0x112   :  { %5617 = vtanh.f32 %v347_v41  ;;  %v420_v46 = vmul.f32 0.5, %v347_v41 }
 0x113   :  { %5619 = vtanh.f32 %v419_v43  ;;  %v442_v47 = vmul.f32 0.5, %v419_v43 }
 0x114   :  { %5621 = vtanh.f32 %v420_v46 }
 0x115   :  { %5623 = vtanh.f32 %v442_v47 }
 0x11c   :  { %v5618_v44 = vpop.eup %5617 }
 0x11d   :  { %427 = vrot.lane.b32.xlu0 %v5618_v44, %s5913_s3  ;;  %v5620_v45 = vpop.eup %5619 }
 0x11e   :  { %v5622_v48 = vpop.eup %5621 }
 0x11f   :  { %v422_v49 = vmul.f32 0.5, %v5622_v48  ;;  %v5624_v50 = vpop.eup %5623 }
 0x120   :  { %v444_v51 = vmul.f32 0.5, %v5624_v50  ;;  %v680_v50 = vld [vmem:[#allocation4 + $0x2] sm:$0x1] }
 0x121   :  { %449 = vrot.lane.b32.xlu0 %v5620_v45, %s5913_s3  ;;  %v423_v52 = vadd.f32 0.5, %v422_v49 }
 0x122   :  { %v445_v55 = vadd.f32 0.5, %v444_v51 }
 0x123   :  { %v425_v58 = vmul.f32 0.0, %v423_v52 }
 0x124   :  { %v447_v61 = vmul.f32 0.0, %v445_v55 }
 0x18f   :  { %v428_v53 = vpop.permute.xlu0 %427 }
 0x190   :  { %v430_v54 = vmul.f32 %v428_v53, %v423_v52 }
 0x192   :  { %432 = vrot.lane.b32.xlu1 %v430_v54, %s5914_s26  ;;  %v754_v54 = vld [vmem:[#allocation5 + $0x5] sm:$0x1] }
 0x193   :  { %v450_v56 = vpop.permute.xlu0 %449 }
 0x194   :  { %v452_v57 = vmul.f32 %v450_v56, %v445_v55 }
 0x196   :  { %454 = vrot.lane.b32.xlu1 %v452_v57, %s5914_s26 }
 0x204   :  { %v433_v59 = vpop.permute.xlu1 %432 }
 0x205   :  { %v435_v60 = vadd.f32 %v433_v59, %v425_v58 }
 0x207   :  { %5625 = vtanh.f32 %v435_v60 }
 0x208   :  { %v455_v62 = vpop.permute.xlu1 %454 }
 0x209   :  { %v457_v63 = vadd.f32 %v455_v62, %v447_v61 }
 0x20b   :  { %5627 = vtanh.f32 %v457_v63 }
 0x211   :  { %v5626_v0 = vpop.eup %5625 }
 0x212   :  { %438 = vrot.lane.b32.xlu0 %v5626_v0, %s5913_s3 }
 0x215   :  { %v5628_v1 = vpop.eup %5627 }
 0x216   :  { %460 = vrot.lane.b32.xlu1 %v5628_v1, %s5913_s3 }
 0x284   :  { %v439_v2 = vpop.permute.xlu0 %438 }
 0x285   :  { %v441_v3 = vmul.f32 %v439_v2, %v423_v52 }
 0x287   :  { %465 = vrot.lane.b32.xlu0 %v441_v3, %s5914_s26 }
 0x288   :  { %v461_v5 = vpop.permute.xlu1 %460 }
 0x289   :  { %v6166_v6 = vmul.f32 %v461_v5, %v445_v55 }
 0x28b   :  { %551 = vrot.lane.b32.xlu1 %v6166_v6, %s5914_s26 }
 0x2f9   :  { %v466_v7 = vpop.permute.xlu0 %465 }
 0x2fa   :  { %469 = vst.msk [vmem:[#allocation2] sm:$0x1] %vm468_vm2, %v466_v7  ;;  %4868 = vmatmul.mubr.msk.f32.vlgmr.msra.gmra.mrb[4].mxu0 %vm108_vm1, %v466_v7 }
 0x2fb   :  { %5352 = vmatpush3.bf16.msra.mxu0 %v6103_v20  ;;  %4889 = vmatprep.mubr.msk.f32.mxu0 %vm5911_vm0, %v5912_v10 }
 0x2fc   :  { %5353 = vmatprep.subr.bf16.mxu0 %v5910_v4 }
 0x2fd   :  { %v552_v8 = vpop.permute.xlu1 %551 }
 0x2fe   :  { %4879 = vmatmul.mubr.msk.f32.vlgmr.msra.gmra.mrb[4].mxu1 %vm108_vm1, %v552_v8 }
 0x2ff   :  { %5355 = vmatpush3.bf16.msra.mxu0 %v6124_v26  ;;  %5358 = vmatpush3.bf16.msra.mxu1 %v6112_v23 }
 0x300   :  { %5359 = vmatprep.subr.bf16.mxu1 %v5910_v4  ;;  %4900 = vmatprep.mubr.msk.f32.mxu1 %vm5911_vm0, %v5912_v10 }
 0x301   :  { %5362 = vmatprep.subr.bf16.mxu0 %v5910_v4 }
 0x303   :  { %5361 = vmatpush3.bf16.msra.mxu1 %v6128_v27 }
 0x304   :  { %5368 = vmatprep.subr.bf16.mxu1 %v5910_v4 }
 0x3cd   :  { %v545_v11 = vpop.f32.mrb[4].mxu0 }
 0x3ce   :  { %v549_v12 = vadd.f32 %v545_v11, %v476_v9  ;;  %v4869_v13 = vpop.f32.mrb[5].mxu0 }
 0x3d0   :  { %5629 = vtanh.f32 %v549_v12  ;;  %v626_v21 = vmul.f32 0.5, %v549_v12 }
 0x3d1   :  { %v621_v15 = vpop.f32.mrb[4].mxu1 }
 0x3d2   :  { %v625_v16 = vadd.f32 %v621_v15, %v550_v14  ;;  %v4880_v17 = vpop.f32.mrb[5].mxu1 }
 0x3d4   :  { %5631 = vtanh.f32 %v625_v16  ;;  %v648_v22 = vmul.f32 0.5, %v625_v16 }
 0x3d5   :  { %5633 = vtanh.f32 %v626_v21 }
 0x3d6   :  { %5635 = vtanh.f32 %v648_v22 }
 0x3da   :  { %v5630_v18 = vpop.eup %5629 }
 0x3db   :  { %633 = vrot.lane.b32.xlu0 %v5630_v18, %s5913_s3 }
 0x3de   :  { %v5632_v19 = vpop.eup %5631 }
 0x3df   :  { %655 = vrot.lane.b32.xlu1 %v5632_v19, %s5913_s3  ;;  %v5634_v24 = vpop.eup %5633 }
 0x3e0   :  { %v628_v25 = vmul.f32 0.5, %v5634_v24  ;;  %v5636_v28 = vpop.eup %5635 }
 0x3e1   :  { %v650_v29 = vmul.f32 0.5, %v5636_v28 }
 0x3e2   :  { %v629_v30 = vadd.f32 0.5, %v628_v25 }
 0x3e3   :  { %v651_v33 = vadd.f32 0.5, %v650_v29  ;;  %v884_v29 = vld [vmem:[#allocation4 + $0x3] sm:$0x1] }
 0x3e4   :  { %v631_v36 = vmul.f32 %v629_v30, %v435_v60 }
 0x3e5   :  { %v653_v39 = vmul.f32 %v651_v33, %v457_v63 }
 0x44d   :  { %v634_v31 = vpop.permute.xlu0 %633 }
 0x44e   :  { %v636_v32 = vmul.f32 %v634_v31, %v629_v30 }
 0x450   :  { %638 = vrot.lane.b32.xlu0 %v636_v32, %s5914_s26 }
 0x451   :  { %v656_v34 = vpop.permute.xlu1 %655 }
 0x452   :  { %v658_v35 = vmul.f32 %v656_v34, %v651_v33 }
 0x454   :  { %660 = vrot.lane.b32.xlu1 %v658_v35, %s5914_s26 }
 0x4c2   :  { %v639_v37 = vpop.permute.xlu0 %638 }
 0x4c3   :  { %v641_v38 = vadd.f32 %v639_v37, %v631_v36 }
 0x4c5   :  { %5637 = vtanh.f32 %v641_v38 }
 0x4c6   :  { %v661_v40 = vpop.permute.xlu1 %660 }
 0x4c7   :  { %v663_v41 = vadd.f32 %v661_v40, %v653_v39 }
 0x4c9   :  { %5639 = vtanh.f32 %v663_v41 }
 0x4cf   :  { %v5638_v42 = vpop.eup %5637 }
 0x4d0   :  { %644 = vrot.lane.b32.xlu0 %v5638_v42, %s5913_s3 }
 0x4d3   :  { %v5640_v43 = vpop.eup %5639 }
 0x4d4   :  { %666 = vrot.lane.b32.xlu1 %v5640_v43, %s5913_s3 }
 0x542   :  { %v645_v44 = vpop.permute.xlu0 %644 }
 0x543   :  { %v647_v45 = vmul.f32 %v645_v44, %v629_v30 }
 0x545   :  { %671 = vrot.lane.b32.xlu0 %v647_v45, %s5914_s26 }
 0x546   :  { %v667_v46 = vpop.permute.xlu1 %666 }
 0x547   :  { %v6192_v47 = vmul.f32 %v667_v46, %v651_v33  ;;  %v958_v33 = vld [vmem:[#allocation5 + $0x4] sm:$0x1] }
 0x549   :  { %755 = vrot.lane.b32.xlu1 %v6192_v47, %s5914_s26 }
 0x5b7   :  { %v672_v48 = vpop.permute.xlu0 %671 }
 0x5b8   :  { %674 = vst.msk [vmem:[#allocation2 + $0x1] sm:$0x1] %vm468_vm2, %v672_v48  ;;  %4890 = vmatmul.mubr.msk.f32.vlgmr.msra.gmra.mrb[6].mxu0 %vm108_vm1, %v672_v48 }
 0x5b9   :  { %5364 = vmatpush3.bf16.msra.mxu0 %v6103_v20  ;;  %4911 = vmatprep.mubr.msk.f32.mxu0 %vm5911_vm0, %v5912_v10 }
 0x5ba   :  { %5365 = vmatprep.subr.bf16.mxu0 %v5910_v4 }
 0x5bb   :  { %v756_v49 = vpop.permute.xlu1 %755 }
 0x5bc   :  { %4901 = vmatmul.mubr.msk.f32.vlgmr.msra.gmra.mrb[6].mxu1 %vm108_vm1, %v756_v49 }
 0x5bd   :  { %5367 = vmatpush3.bf16.msra.mxu0 %v6124_v26  ;;  %5370 = vmatpush3.bf16.msra.mxu1 %v6112_v23 }
 0x5be   :  { %5371 = vmatprep.subr.bf16.mxu1 %v5910_v4  ;;  %4922 = vmatprep.mubr.msk.f32.mxu1 %vm5911_vm0, %v5912_v10 }
 0x5bf   :  { %5374 = vmatprep.subr.bf16.mxu0 %v5910_v4 }
 0x5c1   :  { %5373 = vmatpush3.bf16.msra.mxu1 %v6128_v27 }
 0x5c2   :  { %5380 = vmatprep.subr.bf16.mxu1 %v5910_v4 }
 0x68b   :  { %v749_v51 = vpop.f32.mrb[6].mxu0 }
 0x68c   :  { %v753_v52 = vadd.f32 %v749_v51, %v680_v50  ;;  %v4891_v53 = vpop.f32.mrb[7].mxu0 }
 0x68e   :  { %5641 = vtanh.f32 %v753_v52  ;;  %v830_v60 = vmul.f32 0.5, %v753_v52 }
 0x68f   :  { %v825_v55 = vpop.f32.mrb[6].mxu1 }
 0x690   :  { %v829_v56 = vadd.f32 %v825_v55, %v754_v54  ;;  %v4902_v57 = vpop.f32.mrb[7].mxu1 }
 0x692   :  { %5643 = vtanh.f32 %v829_v56  ;;  %v852_v61 = vmul.f32 0.5, %v829_v56 }
 0x693   :  { %5645 = vtanh.f32 %v830_v60 }
 0x694   :  { %5647 = vtanh.f32 %v852_v61 }
 0x698   :  { %v5642_v58 = vpop.eup %5641 }
 0x699   :  { %837 = vrot.lane.b32.xlu0 %v5642_v58, %s5913_s3 }
 0x69c   :  { %v5644_v59 = vpop.eup %5643 }
 0x69d   :  { %859 = vrot.lane.b32.xlu1 %v5644_v59, %s5913_s3  ;;  %v5646_v62 = vpop.eup %5645 }
 0x69e   :  { %v832_v63 = vmul.f32 0.5, %v5646_v62  ;;  %v5648_v0 = vpop.eup %5647 }
 0x69f   :  { %v854_v1 = vmul.f32 0.5, %v5648_v0 }
 0x6a0   :  { %v833_v2 = vadd.f32 0.5, %v832_v63 }
 0x6a1   :  { %v855_v7 = vadd.f32 0.5, %v854_v1 }
 0x6a2   :  { %v835_v11 = vmul.f32 %v833_v2, %v641_v38 }
 0x6a3   :  { %v857_v14 = vmul.f32 %v855_v7, %v663_v41 }
 0x70b   :  { %v838_v3 = vpop.permute.xlu0 %837 }
 0x70c   :  { %v840_v5 = vmul.f32 %v838_v3, %v833_v2 }
 0x70e   :  { %842 = vrot.lane.b32.xlu0 %v840_v5, %s5914_s26 }
 0x70f   :  { %v860_v8 = vpop.permute.xlu1 %859 }
 0x710   :  { %v862_v9 = vmul.f32 %v860_v8, %v855_v7  ;;  %v1162_v8 = vld [vmem:[#allocation5 + $0x3] sm:$0x1] }
 0x712   :  { %864 = vrot.lane.b32.xlu1 %v862_v9, %s5914_s26 }
 0x780   :  { %v843_v12 = vpop.permute.xlu0 %842 }
 0x781   :  { %v845_v13 = vadd.f32 %v843_v12, %v835_v11 }
 0x783   :  { %5649 = vtanh.f32 %v845_v13 }
 0x784   :  { %v865_v15 = vpop.permute.xlu1 %864 }
 0x785   :  { %v867_v16 = vadd.f32 %v865_v15, %v857_v14 }
 0x787   :  { %5651 = vtanh.f32 %v867_v16 }
 0x78d   :  { %v5650_v17 = vpop.eup %5649 }
 0x78e   :  { %848 = vrot.lane.b32.xlu0 %v5650_v17, %s5913_s3 }
 0x791   :  { %v5652_v18 = vpop.eup %5651 }
 0x792   :  { %870 = vrot.lane.b32.xlu1 %v5652_v18, %s5913_s3 }
 0x800   :  { %v849_v19 = vpop.permute.xlu0 %848 }
 0x801   :  { %v851_v21 = vmul.f32 %v849_v19, %v833_v2  ;;  %v1088_v2 = vld [vmem:[#allocation4 + $0x4] sm:$0x1] }
 0x803   :  { %875 = vrot.lane.b32.xlu0 %v851_v21, %s5914_s26 }
 0x804   :  { %v871_v22 = vpop.permute.xlu1 %870 }
 0x805   :  { %v6218_v24 = vmul.f32 %v871_v22, %v855_v7 }
 0x807   :  { %959 = vrot.lane.b32.xlu1 %v6218_v24, %s5914_s26 }
 0x875   :  { %v876_v25 = vpop.permute.xlu0 %875 }
 0x876   :  { %878 = vst.msk [vmem:[#allocation2 + $0x2] sm:$0x1] %vm468_vm2, %v876_v25  ;;  %4912 = vmatmul.mubr.msk.f32.vlgmr.msra.gmra.mrb[8].mxu0 %vm108_vm1, %v876_v25 }
 0x877   :  { %5376 = vmatpush3.bf16.msra.mxu0 %v6103_v20  ;;  %4933 = vmatprep.mubr.msk.f32.mxu0 %vm5911_vm0, %v5912_v10 }
 0x878   :  { %5377 = vmatprep.subr.bf16.mxu0 %v5910_v4 }
 0x879   :  { %v960_v28 = vpop.permute.xlu1 %959 }
 0x87a   :  { %4923 = vmatmul.mubr.msk.f32.vlgmr.msra.gmra.mrb[8].mxu1 %vm108_vm1, %v960_v28 }
 0x87b   :  { %5379 = vmatpush3.bf16.msra.mxu0 %v6124_v26  ;;  %5382 = vmatpush3.bf16.msra.mxu1 %v6112_v23 }
 0x87c   :  { %5383 = vmatprep.subr.bf16.mxu1 %v5910_v4  ;;  %4944 = vmatprep.mubr.msk.f32.mxu1 %vm5911_vm0, %v5912_v10 }
 0x87d   :  { %5386 = vmatprep.subr.bf16.mxu0 %v5910_v4 }
 0x87f   :  { %5385 = vmatpush3.bf16.msra.mxu1 %v6128_v27 }
 0x880   :  { %5392 = vmatprep.subr.bf16.mxu1 %v5910_v4 }
 0x949   :  { %v953_v30 = vpop.f32.mrb[8].mxu0 }
 0x94a   :  { %v957_v31 = vadd.f32 %v953_v30, %v884_v29  ;;  %v4913_v32 = vpop.f32.mrb[9].mxu0 }
 0x94c   :  { %5653 = vtanh.f32 %v957_v31  ;;  %v1034_v39 = vmul.f32 0.5, %v957_v31 }
 0x94d   :  { %v1029_v34 = vpop.f32.mrb[8].mxu1 }
 0x94e   :  { %v1033_v35 = vadd.f32 %v1029_v34, %v958_v33  ;;  %v4924_v36 = vpop.f32.mrb[9].mxu1 }
 0x950   :  { %5655 = vtanh.f32 %v1033_v35  ;;  %v1056_v40 = vmul.f32 0.5, %v1033_v35 }
 0x951   :  { %5657 = vtanh.f32 %v1034_v39 }
 0x952   :  { %5659 = vtanh.f32 %v1056_v40 }
 0x956   :  { %v5654_v37 = vpop.eup %5653 }
 0x957   :  { %1041 = vrot.lane.b32.xlu0 %v5654_v37, %s5913_s3 }
 0x95a   :  { %v5656_v38 = vpop.eup %5655 }
 0x95b   :  { %1063 = vrot.lane.b32.xlu1 %v5656_v38, %s5913_s3  ;;  %v5658_v41 = vpop.eup %5657 }
 0x95c   :  { %v1036_v42 = vmul.f32 0.5, %v5658_v41  ;;  %v5660_v43 = vpop.eup %5659 }
 0x95d   :  { %v1058_v44 = vmul.f32 0.5, %v5660_v43 }
 0x95e   :  { %v1037_v45 = vadd.f32 0.5, %v1036_v42 }
 0x95f   :  { %v1059_v49 = vadd.f32 0.5, %v1058_v44 }
 0x960   :  { %v1039_v52 = vmul.f32 %v1037_v45, %v845_v13 }
 0x961   :  { %v1061_v55 = vmul.f32 %v1059_v49, %v867_v16 }
 0x9c9   :  { %v1042_v46 = vpop.permute.xlu0 %1041 }
 0x9ca   :  { %v1044_v48 = vmul.f32 %v1042_v46, %v1037_v45  ;;  %v1292_v46 = vld [vmem:[#allocation4 + $0x5] sm:$0x1] }
 0x9cc   :  { %1046 = vrot.lane.b32.xlu0 %v1044_v48, %s5914_s26 }
 0x9cd   :  { %v1064_v50 = vpop.permute.xlu1 %1063 }
 0x9ce   :  { %v1066_v51 = vmul.f32 %v1064_v50, %v1059_v49 }
 0x9d0   :  { %1068 = vrot.lane.b32.xlu1 %v1066_v51, %s5914_s26  ;;  %v1366_v51 = vld [vmem:[#allocation5 + $0x2] sm:$0x1] }
 0xa3e   :  { %v1047_v53 = vpop.permute.xlu0 %1046 }
 0xa3f   :  { %v1049_v54 = vadd.f32 %v1047_v53, %v1039_v52 }
 0xa41   :  { %5661 = vtanh.f32 %v1049_v54 }
 0xa42   :  { %v1069_v56 = vpop.permute.xlu1 %1068 }
 0xa43   :  { %v1071_v57 = vadd.f32 %v1069_v56, %v1061_v55 }
 0xa45   :  { %5663 = vtanh.f32 %v1071_v57 }
 0xa4b   :  { %v5662_v58 = vpop.eup %5661 }
 0xa4c   :  { %1052 = vrot.lane.b32.xlu0 %v5662_v58, %s5913_s3 }
 0xa4f   :  { %v5664_v59 = vpop.eup %5663 }
 0xa50   :  { %1074 = vrot.lane.b32.xlu1 %v5664_v59, %s5913_s3 }
 0xabe   :  { %v1053_v60 = vpop.permute.xlu0 %1052 }
 0xabf   :  { %v1055_v61 = vmul.f32 %v1053_v60, %v1037_v45 }
 0xac1   :  { %1079 = vrot.lane.b32.xlu0 %v1055_v61, %s5914_s26 }
 0xac2   :  { %v1075_v62 = vpop.permute.xlu1 %1074 }
 0xac3   :  { %v6244_v63 = vmul.f32 %v1075_v62, %v1059_v49 }
 0xac5   :  { %1163 = vrot.lane.b32.xlu1 %v6244_v63, %s5914_s26 }
 0xb33   :  { %v1080_v0 = vpop.permute.xlu0 %1079 }
 0xb34   :  { %1082 = vst.msk [vmem:[#allocation2 + $0x3] sm:$0x1] %vm468_vm2, %v1080_v0  ;;  %4934 = vmatmul.mubr.msk.f32.vlgmr.msra.gmra.mrb[10].mxu0 %vm108_vm1, %v1080_v0 }
 0xb35   :  { %5388 = vmatpush3.bf16.msra.mxu0 %v6103_v20  ;;  %4955 = vmatprep.mubr.msk.f32.mxu0 %vm5911_vm0, %v5912_v10 }
 0xb36   :  { %5389 = vmatprep.subr.bf16.mxu0 %v5910_v4 }
 0xb37   :  { %v1164_v1 = vpop.permute.xlu1 %1163 }
 0xb38   :  { %4945 = vmatmul.mubr.msk.f32.vlgmr.msra.gmra.mrb[10].mxu1 %vm108_vm1, %v1164_v1 }
 0xb39   :  { %5391 = vmatpush3.bf16.msra.mxu0 %v6124_v26  ;;  %5394 = vmatpush3.bf16.msra.mxu1 %v6112_v23 }
 0xb3a   :  { %5395 = vmatprep.subr.bf16.mxu1 %v5910_v4  ;;  %4966 = vmatprep.mubr.msk.f32.mxu1 %vm5911_vm0, %v5912_v10 }
 0xb3b   :  { %5398 = vmatprep.subr.bf16.mxu0 %v5910_v4 }
 0xb3d   :  { %5397 = vmatpush3.bf16.msra.mxu1 %v6128_v27 }
 0xb3e   :  { %5404 = vmatprep.subr.bf16.mxu1 %v5910_v4 }
 0xc07   :  { %v1157_v3 = vpop.f32.mrb[10].mxu0 }
 0xc08   :  { %v1161_v5 = vadd.f32 %v1157_v3, %v1088_v2  ;;  %v4935_v7 = vpop.f32.mrb[11].mxu0 }
 0xc0a   :  { %5665 = vtanh.f32 %v1161_v5  ;;  %v1238_v15 = vmul.f32 0.5, %v1161_v5 }
 0xc0b   :  { %v1233_v9 = vpop.f32.mrb[10].mxu1 }
 0xc0c   :  { %v1237_v11 = vadd.f32 %v1233_v9, %v1162_v8  ;;  %v4946_v12 = vpop.f32.mrb[11].mxu1 }
 0xc0e   :  { %5667 = vtanh.f32 %v1237_v11  ;;  %v1260_v16 = vmul.f32 0.5, %v1237_v11 }
 0xc0f   :  { %5669 = vtanh.f32 %v1238_v15 }
 0xc10   :  { %5671 = vtanh.f32 %v1260_v16 }
 0xc14   :  { %v5666_v13 = vpop.eup %5665 }
 0xc15   :  { %1245 = vrot.lane.b32.xlu0 %v5666_v13, %s5913_s3 }
 0xc18   :  { %v5668_v14 = vpop.eup %5667 }
 0xc19   :  { %1267 = vrot.lane.b32.xlu1 %v5668_v14, %s5913_s3  ;;  %v5670_v17 = vpop.eup %5669 }
 0xc1a   :  { %v1240_v18 = vmul.f32 0.5, %v5670_v17  ;;  %v5672_v19 = vpop.eup %5671 }
 0xc1b   :  { %v1262_v21 = vmul.f32 0.5, %v5672_v19 }
 0xc1c   :  { %v1241_v22 = vadd.f32 0.5, %v1240_v18 }
 0xc1d   :  { %v1263_v29 = vadd.f32 0.5, %v1262_v21 }
 0xc1e   :  { %v1243_v32 = vmul.f32 %v1241_v22, %v1049_v54 }
 0xc1f   :  { %v1265_v35 = vmul.f32 %v1263_v29, %v1071_v57 }
 0xc87   :  { %v1246_v25 = vpop.permute.xlu0 %1245 }
 0xc88   :  { %v1248_v28 = vmul.f32 %v1246_v25, %v1241_v22 }
 0xc8a   :  { %1250 = vrot.lane.b32.xlu0 %v1248_v28, %s5914_s26 }
 0xc8b   :  { %v1268_v30 = vpop.permute.xlu1 %1267 }
 0xc8c   :  { %v1270_v31 = vmul.f32 %v1268_v30, %v1263_v29 }
 0xc8e   :  { %1272 = vrot.lane.b32.xlu1 %v1270_v31, %s5914_s26  ;;  %v1570_v31 = vld [vmem:[#allocation5 + $0x1] sm:$0x1] }
 0xcfc   :  { %v1251_v33 = vpop.permute.xlu0 %1250 }
 0xcfd   :  { %v1253_v34 = vadd.f32 %v1251_v33, %v1243_v32 }
 0xcff   :  { %5673 = vtanh.f32 %v1253_v34 }
 0xd00   :  { %v1273_v36 = vpop.permute.xlu1 %1272 }
 0xd01   :  { %v1275_v37 = vadd.f32 %v1273_v36, %v1265_v35 }
 0xd03   :  { %5675 = vtanh.f32 %v1275_v37 }
 0xd09   :  { %v5674_v38 = vpop.eup %5673 }
 0xd0a   :  { %1256 = vrot.lane.b32.xlu0 %v5674_v38, %s5913_s3 }
 0xd0d   :  { %v5676_v39 = vpop.eup %5675 }
 0xd0e   :  { %1278 = vrot.lane.b32.xlu1 %v5676_v39, %s5913_s3 }
 0xd7c   :  { %v1257_v40 = vpop.permute.xlu0 %1256 }
 0xd7d   :  { %v1259_v41 = vmul.f32 %v1257_v40, %v1241_v22 }
 0xd7f   :  { %1283 = vrot.lane.b32.xlu0 %v1259_v41, %s5914_s26 }
 0xd80   :  { %v1279_v42 = vpop.permute.xlu1 %1278 }
 0xd81   :  { %v6270_v43 = vmul.f32 %v1279_v42, %v1263_v29 }
 0xd83   :  { %1367 = vrot.lane.b32.xlu1 %v6270_v43, %s5914_s26 }
 0xdf1   :  { %v6274_v44 = vpop.permute.xlu0 %1283 }
 0xdf2   :  { %4956 = vmatmul.mubr.msk.f32.vlgmr.msra.gmra.mrb[12].mxu0 %vm108_vm1, %v6274_v44 }
 0xdf3   :  { %5400 = vmatpush3.bf16.msra.mxu0 %v6103_v20  ;;  %4977 = vmatprep.mubr.msk.f32.mxu0 %vm5911_vm0, %v5912_v10 }
 0xdf4   :  { %5401 = vmatprep.subr.bf16.mxu0 %v5910_v4 }
 0xdf5   :  { %v1368_v45 = vpop.permute.xlu1 %1367 }
 0xdf6   :  { %4967 = vmatmul.mubr.msk.f32.vlgmr.msra.gmra.mrb[12].mxu1 %vm108_vm1, %v1368_v45 }
 0xdf7   :  { %5403 = vmatpush3.bf16.msra.mxu0 %v6124_v26  ;;  %5406 = vmatpush3.bf16.msra.mxu1 %v6112_v23 }
 0xdf8   :  { %5407 = vmatprep.subr.bf16.mxu1 %v5910_v4  ;;  %4988 = vmatprep.mubr.msk.f32.mxu1 %vm5911_vm0, %v5912_v10 }
 0xdf9   :  { %5410 = vmatprep.subr.bf16.mxu0 %v5910_v4 }
 0xdfb   :  { %5409 = vmatpush3.bf16.msra.mxu1 %v6128_v27 }
 0xdfc   :  { %5416 = vmatprep.subr.bf16.mxu1 %v5910_v4 }
 0xec5   :  { %v1361_v48 = vpop.f32.mrb[12].mxu0 }
 0xec6   :  { %v1365_v49 = vadd.f32 %v1361_v48, %v1292_v46  ;;  %v4957_v50 = vpop.f32.mrb[13].mxu0 }
 0xec8   :  { %5677 = vtanh.f32 %v1365_v49  ;;  %v1442_v57 = vmul.f32 0.5, %v1365_v49 }
 0xec9   :  { %v1437_v52 = vpop.f32.mrb[12].mxu1 }
 0xeca   :  { %v1441_v53 = vadd.f32 %v1437_v52, %v1366_v51  ;;  %v4968_v54 = vpop.f32.mrb[13].mxu1 }
 0xecc   :  { %5679 = vtanh.f32 %v1441_v53  ;;  %v1464_v58 = vmul.f32 0.5, %v1441_v53 }
 0xecd   :  { %5681 = vtanh.f32 %v1442_v57 }
 0xece   :  { %5683 = vtanh.f32 %v1464_v58 }
 0xed2   :  { %v5678_v55 = vpop.eup %5677 }
 0xed3   :  { %1449 = vrot.lane.b32.xlu0 %v5678_v55, %s5913_s3 }
 0xed6   :  { %v5680_v56 = vpop.eup %5679 }
 0xed7   :  { %1471 = vrot.lane.b32.xlu1 %v5680_v56, %s5913_s3  ;;  %v5682_v59 = vpop.eup %5681 }
 0xed8   :  { %v1444_v60 = vmul.f32 0.5, %v5682_v59  ;;  %v5684_v61 = vpop.eup %5683 }
 0xed9   :  { %v1466_v62 = vmul.f32 0.5, %v5684_v61 }
 0xeda   :  { %v1445_v0 = vadd.f32 0.5, %v1444_v60 }
 0xedb   :  { %v1467_v3 = vadd.f32 0.5, %v1466_v62 }
 0xedc   :  { %v1447_v8 = vmul.f32 %v1445_v0, %v1253_v34 }
 0xedd   :  { %v1469_v12 = vmul.f32 %v1467_v3, %v1275_v37 }
 0xf45   :  { %v1450_v1 = vpop.permute.xlu0 %1449 }
 0xf46   :  { %v1452_v2 = vmul.f32 %v1450_v1, %v1445_v0 }
 0xf48   :  { %1454 = vrot.lane.b32.xlu0 %v1452_v2, %s5914_s26 }
 0xf49   :  { %v1472_v5 = vpop.permute.xlu1 %1471 }
 0xf4a   :  { %v1474_v7 = vmul.f32 %v1472_v5, %v1467_v3  ;;  %v1774_v5 = vld [vmem:[#allocation5] sm:$0x1] }
 0xf4c   :  { %1476 = vrot.lane.b32.xlu1 %v1474_v7, %s5914_s26 }
 0xfba   :  { %v1455_v9 = vpop.permute.xlu0 %1454 }
 0xfbb   :  { %v1457_v11 = vadd.f32 %v1455_v9, %v1447_v8 }
 0xfbd   :  { %5685 = vtanh.f32 %v1457_v11 }
 0xfbe   :  { %v1477_v13 = vpop.permute.xlu1 %1476 }
 0xfbf   :  { %v1479_v14 = vadd.f32 %v1477_v13, %v1469_v12 }
 0xfc1   :  { %5687 = vtanh.f32 %v1479_v14 }
 0xfc7   :  { %v5686_v15 = vpop.eup %5685 }
 0xfc8   :  { %1460 = vrot.lane.b32.xlu0 %v5686_v15, %s5913_s3 }
 0xfcb   :  { %v5688_v16 = vpop.eup %5687 }
 0xfcc   :  { %1482 = vrot.lane.b32.xlu1 %v5688_v16, %s5913_s3 }
0x103a   :  { %v1461_v17 = vpop.permute.xlu0 %1460 }
0x103b   :  { %v1463_v18 = vmul.f32 %v1461_v17, %v1445_v0  ;;  %v1700_v0 = vld [vmem:[#allocation4 + $0x7] sm:$0x1] }
0x103d   :  { %1487 = vrot.lane.b32.xlu0 %v1463_v18, %s5914_s26 }
0x103e   :  { %v1483_v19 = vpop.permute.xlu1 %1482 }
0x103f   :  { %v6298_v21 = vmul.f32 %v1483_v19, %v1467_v3 }
0x1041   :  { %1571 = vrot.lane.b32.xlu1 %v6298_v21, %s5914_s26 }
0x10af   :  { %v6302_v22 = vpop.permute.xlu0 %1487 }
0x10b0   :  { %4978 = vmatmul.mubr.msk.f32.vlgmr.msra.gmra.mrb[14].mxu0 %vm108_vm1, %v6302_v22 }
0x10b1   :  { %5412 = vmatpush3.bf16.msra.mxu0 %v6103_v20  ;;  %4999 = vmatprep.mubr.msk.f32.mxu0 %vm5911_vm0, %v5912_v10  ;;  %v1496_v20 = vld [vmem:[#allocation4 + $0x6] sm:$0x1] }
0x10b2   :  { %5413 = vmatprep.subr.bf16.mxu0 %v5910_v4 }
0x10b3   :  { %v1572_v25 = vpop.permute.xlu1 %1571 }
0x10b4   :  { %4989 = vmatmul.mubr.msk.f32.vlgmr.msra.gmra.mrb[14].mxu1 %vm108_vm1, %v1572_v25 }
0x10b5   :  { %5415 = vmatpush3.bf16.msra.mxu0 %v6124_v26  ;;  %5418 = vmatpush3.bf16.msra.mxu1 %v6112_v23 }
0x10b6   :  { %5419 = vmatprep.subr.bf16.mxu1 %v5910_v4  ;;  %5010 = vmatprep.mubr.msk.f32.mxu1 %vm5911_vm0, %v5912_v10 }
0x10b7   :  { %5422 = vmatprep.subr.bf16.mxu0 %v5910_v4 }
0x10b9   :  { %5421 = vmatpush3.bf16.msra.mxu1 %v6128_v27 }
0x10ba   :  { %5434 = vmatprep.subr.bf16.mxu1 %v5910_v4 }
0x1183   :  { %v1565_v28 = vpop.f32.mrb[14].mxu0 }
0x1184   :  { %v1569_v29 = vadd.f32 %v1565_v28, %v1496_v20  ;;  %v4979_v30 = vpop.f32.mrb[15].mxu0 }
0x1186   :  { %5689 = vtanh.f32 %v1569_v29  ;;  %v1646_v35 = vmul.f32 0.5, %v1569_v29 }
0x1187   :  { %v1641_v26 = vpop.f32.mrb[14].mxu1 }
0x1188   :  { %v1645_v32 = vadd.f32 %v1641_v26, %v1570_v31  ;;  %v4990_v23 = vpop.f32.mrb[15].mxu1 }
0x118a   :  { %5691 = vtanh.f32 %v1645_v32  ;;  %v1668_v27 = vmul.f32 0.5, %v1645_v32 }
0x118b   :  { %5693 = vtanh.f32 %v1646_v35 }
0x118c   :  { %5695 = vtanh.f32 %v1668_v27 }
0x1190   :  { %v5690_v33 = vpop.eup %5689 }
0x1191   :  { %1653 = vrot.lane.b32.xlu0 %v5690_v33, %s5913_s3 }
0x1194   :  { %v5692_v34 = vpop.eup %5691 }
0x1195   :  { %1675 = vrot.lane.b32.xlu1 %v5692_v34, %s5913_s3  ;;  %v5694_v36 = vpop.eup %5693 }
0x1196   :  { %v1648_v37 = vmul.f32 0.5, %v5694_v36  ;;  %v5696_v38 = vpop.eup %5695  ;;  %v1907_v36 = vld [vmem:[%s7098_s8] sm:$0xff] }
0x1197   :  { %v1670_v39 = vmul.f32 0.5, %v5696_v38  ;;  %v1997_v38 = vld [vmem:[%s7057_s11] sm:$0xff] }
0x1198   :  { %v1649_v40 = vadd.f32 0.5, %v1648_v37  ;;  %v1908_v37 = vld [vmem:[%s7098_s8 + $0x8] sm:$0xff] }
0x1199   :  { %v1671_v45 = vadd.f32 0.5, %v1670_v39  ;;  %v5423_v39 = vpack.c.bf16 %v1908_v37, %v1907_v36 }
0x119a   :  { %v1651_v49 = vmul.f32 %v1649_v40, %v1457_v11 }
0x119b   :  { %v1673_v52 = vmul.f32 %v1671_v45, %v1479_v14 }
0x1203   :  { %v1654_v41 = vpop.permute.xlu0 %1653 }
0x1204   :  { %v1656_v42 = vmul.f32 %v1654_v41, %v1649_v40 }
0x1206   :  { %1658 = vrot.lane.b32.xlu0 %v1656_v42, %s5914_s26  ;;  %v1911_v42 = vld [vmem:[%s7098_s8 + $0x20] sm:$0xff] }
0x1207   :  { %v1676_v46 = vpop.permute.xlu1 %1675 }
0x1208   :  { %v1678_v48 = vmul.f32 %v1676_v46, %v1671_v45  ;;  %v2001_v46 = vld [vmem:[%s7057_s11 + $0x20] sm:$0xff] }
0x120a   :  { %1680 = vrot.lane.b32.xlu1 %v1678_v48, %s5914_s26 }
0x1278   :  { %v1659_v50 = vpop.permute.xlu0 %1658 }
0x1279   :  { %v1661_v51 = vadd.f32 %v1659_v50, %v1651_v49  ;;  %v2002_v49 = vld [vmem:[%s7057_s11 + $0x28] sm:$0xff]  ;;  %v1913_v50 = vld [vmem:[%s7098_s8 + $0x30] sm:$0xff] }
0x127b   :  { %5697 = vtanh.f32 %v1661_v51 }
0x127c   :  { %v1681_v53 = vpop.permute.xlu1 %1680 }
0x127d   :  { %v1683_v54 = vadd.f32 %v1681_v53, %v1673_v52  ;;  %v5441_v52 = vpack.c.bf16 %v2002_v49, %v2001_v46  ;;  %v2003_v53 = vld [vmem:[%s7057_s11 + $0x30] sm:$0xff] }
0x127f   :  { %5699 = vtanh.f32 %v1683_v54 }
0x1285   :  { %v5698_v55 = vpop.eup %5697 }
0x1286   :  { %1664 = vrot.lane.b32.xlu0 %v5698_v55, %s5913_s3 }
0x1289   :  { %v5700_v56 = vpop.eup %5699 }
0x128a   :  { %1686 = vrot.lane.b32.xlu1 %v5700_v56, %s5913_s3 }
0x12f8   :  { %v1665_v57 = vpop.permute.xlu0 %1664 }
0x12f9   :  { %v1667_v58 = vmul.f32 %v1665_v57, %v1649_v40  ;;  %v1998_v40 = vld [vmem:[%s7057_s11 + $0x8] sm:$0xff] }
0x12fa   :  { %v5435_v41 = vpack.c.bf16 %v1998_v40, %v1997_v38 }
0x12fb   :  { %1691 = vrot.lane.b32.xlu0 %v1667_v58, %s5914_s26 }
0x12fc   :  { %v1687_v59 = vpop.permute.xlu1 %1686 }
0x12fd   :  { %v6326_v60 = vmul.f32 %v1687_v59, %v1671_v45  ;;  %v1912_v45 = vld [vmem:[%s7098_s8 + $0x28] sm:$0xff] }
0x12fe   :  { %v5429_v48 = vpack.c.bf16 %v1912_v45, %v1911_v42 }
0x12ff   :  { %1775 = vrot.lane.b32.xlu1 %v6326_v60, %s5914_s26 }
0x136d   :  { %v6330_v61 = vpop.permute.xlu0 %1691 }
0x136e   :  { %5000 = vmatmul.mubr.msk.f32.vlgmr.msra.gmra.mrb[16].mxu0 %vm108_vm1, %v6330_v61 }
0x136f   :  { %5029 = vmatprep.mubr.msk.f32.mxu0 %vm5911_vm0, %v5912_v10  ;;  %5424 = vmatpush3.bf16.msra.mxu0 %v5423_v39 }
0x1370   :  { %5425 = vmatprep.subr.bf16.mxu0 %v5910_v4 }
0x1371   :  { %v1776_v62 = vpop.permute.xlu1 %1775 }
0x1372   :  { %5011 = vmatmul.mubr.msk.f32.vlgmr.msra.gmra.mrb[16].mxu1 %vm108_vm1, %v1776_v62 }
0x1373   :  { %5048 = vmatprep.mubr.msk.f32.mxu1 %vm5911_vm0, %v5912_v10  ;;  %5436 = vmatpush3.bf16.msra.mxu1 %v5435_v41 }
0x1374   :  { %5437 = vmatprep.subr.bf16.mxu1 %v5910_v4 }
0x1441   :  { %v1769_v1 = vpop.f32.mrb[16].mxu0 }
0x1442   :  { %v1773_v2 = vadd.f32 %v1769_v1, %v1700_v0  ;;  %v5001_v3 = vpop.f32.mrb[17].mxu0 }
0x1444   :  { %5701 = vtanh.f32 %v1773_v2  ;;  %v1850_v13 = vmul.f32 0.5, %v1773_v2 }
0x1445   :  { %v1845_v7 = vpop.f32.mrb[16].mxu1 }
0x1446   :  { %v1849_v8 = vadd.f32 %v1845_v7, %v1774_v5  ;;  %v5012_v9 = vpop.f32.mrb[17].mxu1 }
0x1447   :  { %v2083_v9 = vld [vmem:[%s7099_s6] sm:$0xff] }
0x1448   :  { %5703 = vtanh.f32 %v1849_v8  ;;  %v1872_v14 = vmul.f32 0.5, %v1849_v8 }
0x1449   :  { %5705 = vtanh.f32 %v1850_v13 }
0x144a   :  { %5707 = vtanh.f32 %v1872_v14  ;;  %v2089_v14 = vld [vmem:[%s7058_s12 + $0x10] sm:$0xff] }
0x144e   :  { %v5702_v11 = vpop.eup %5701 }
0x144f   :  { %1857 = vrot.lane.b32.xlu0 %v5702_v11, %s5913_s3  ;;  %v2084_v11 = vld [vmem:[%s7099_s6 + $0x8] sm:$0xff] }
0x1450   :  { %v6456_v13 = vpack.c.bf16 %v2084_v11, %v2083_v9 }
0x1452   :  { %v5704_v12 = vpop.eup %5703 }
0x1453   :  { %1879 = vrot.lane.b32.xlu1 %v5704_v12, %s5913_s3  ;;  %v5706_v15 = vpop.eup %5705 }
0x1454   :  { %v1852_v16 = vmul.f32 0.5, %v5706_v15  ;;  %v5708_v17 = vpop.eup %5707  ;;  %v2090_v15 = vld [vmem:[%s7058_s12 + $0x18] sm:$0xff] }
0x1455   :  { %v1874_v18 = vmul.f32 0.5, %v5708_v17  ;;  %v2086_v17 = vld [vmem:[%s7099_s6 + $0x18] sm:$0xff] }
0x1456   :  { %v6341_v19 = vadd.f32 0.5, %v1852_v16  ;;  %v2085_v16 = vld [vmem:[%s7099_s6 + $0x10] sm:$0xff] }
0x1457   :  { %v6345_v28 = vadd.f32 0.5, %v1874_v18 }
0x1458   :  { %v1855_v31 = vmul.f32 %v6341_v19, %v1661_v51  ;;  %v1914_v51 = vld [vmem:[%s7098_s8 + $0x38] sm:$0xff] }
0x1459   :  { %v1877_v23 = vmul.f32 %v6345_v28, %v1683_v54  ;;  %v2004_v54 = vld [vmem:[%s7057_s11 + $0x38] sm:$0xff]  ;;  %v5432_v55 = vpack.c.bf16 %v1914_v51, %v1913_v50 }
0x145a   :  { %v5444_v56 = vpack.c.bf16 %v2004_v54, %v2003_v53 }
0x14c1   :  { %v1858_v25 = vpop.permute.xlu0 %1857 }
0x14c2   :  { %v1860_v20 = vmul.f32 %v1858_v25, %v6341_v19  ;;  %v6476_v25 = vpack.c.bf16 %v2086_v17, %v2085_v16 }
0x14c4   :  { %1862 = vrot.lane.b32.xlu0 %v1860_v20, %s5914_s26  ;;  %v4539_v20 = vld [vmem:[%s7056_s10] ss:$0 sm:$0xff]  ;;  %s6795_s10 = sld [smem:[#allocation7]] }
0x14c5   :  { %v1880_v29 = vpop.permute.xlu1 %1879 }
0x14c6   :  { %v1882_v30 = vmul.f32 %v1880_v29, %v6345_v28 }
0x14c8   :  { %1884 = vrot.lane.b32.xlu1 %v1882_v30, %s5914_s26 }
0x1536   :  { %v1863_v26 = vpop.permute.xlu0 %1862 }
0x1537   :  { %v1865_v32 = vadd.f32 %v1863_v26, %v1855_v31 }
0x1539   :  { %5709 = vtanh.f32 %v1865_v32 }
0x153a   :  { %v1885_v33 = vpop.permute.xlu1 %1884 }
0x153b   :  { %v1887_v34 = vadd.f32 %v1885_v33, %v1877_v23 }
0x153d   :  { %5711 = vtanh.f32 %v1887_v34 }
0x1543   :  { %v5710_v35 = vpop.eup %5709 }
0x1544   :  { %1868 = vrot.lane.b32.xlu0 %v5710_v35, %s5913_s3 }
0x1547   :  { %v5712_v27 = vpop.eup %5711 }
0x1548   :  { %1890 = vrot.lane.b32.xlu1 %v5712_v27, %s5913_s3  ;;  %471 = vrot.lane.b32.xlu0 %v6166_v6, %s5913_s3  ;;  %v1909_v6 = vld [vmem:[%s7098_s8 + $0x10] sm:$0xff] }
0x154c   :  { %676 = vrot.lane.b32.xlu1 %v6192_v47, %s5913_s3  ;;  %880 = vrot.lane.b32.xlu0 %v6218_v24, %s5913_s3  ;;  %v1910_v47 = vld [vmem:[%s7098_s8 + $0x18] sm:$0xff]  ;;  %v1999_v24 = vld [vmem:[%s7057_s11 + $0x10] sm:$0xff]  ;;  %s6818_s8 = sld [smem:[#allocation7 + $0x280]] }
0x1550   :  { %1084 = vrot.lane.b32.xlu1 %v6244_v63, %s5913_s3  ;;  %1288 = vrot.lane.b32.xlu0 %v6270_v43, %s5913_s3  ;;  %v5426_v63 = vpack.c.bf16 %v1910_v47, %v1909_v6  ;;  %v2000_v43 = vld [vmem:[%s7057_s11 + $0x18] sm:$0xff]  ;;  %s6816_s11 = sld [smem:[#allocation7 + $0x200]] }
0x1552   :  { %5427 = vmatpush3.bf16.msra.mxu0 %v5426_v63 }
0x1553   :  { %5428 = vmatprep.subr.bf16.mxu0 %v5910_v4 }
0x1554   :  { %1492 = vrot.lane.b32.xlu1 %v6298_v21, %s5913_s3  ;;  %1696 = vrot.lane.b32.xlu0 %v6326_v60, %s5913_s3  ;;  %v5438_v21 = vpack.c.bf16 %v2000_v43, %v1999_v24 }
0x1556   :  { %5439 = vmatpush3.bf16.msra.mxu1 %v5438_v21  ;;  %5430 = vmatpush3.bf16.msra.mxu0 %v5429_v48  ;;  %s4133_s1 = scalar_lea.vmem [#allocation3], %s6816_s11  ;;  %s4151_s11 = scalar_lea.vmem [#allocation3], %s6837_s30 }
0x1557   :  { %5440 = vmatprep.subr.bf16.mxu1 %v5910_v4  ;;  %5431 = vmatprep.subr.bf16.mxu0 %v5910_v4 }
0x155a   :  { %5442 = vmatpush3.bf16.msra.mxu1 %v5441_v52  ;;  %5433 = vmatpush3.bf16.msra.mxu0 %v5432_v55 }
0x155b   :  { %5443 = vmatprep.subr.bf16.mxu1 %v5910_v4  ;;  %5446 = vmatprep.subr.bf16.mxu0 %v5910_v4 }
0x155e   :  { %5445 = vmatpush3.bf16.msra.mxu1 %v5444_v56 }
0x155f   :  { %5452 = vmatprep.subr.bf16.mxu1 %v5910_v4 }
0x15b6   :  { %v1869_v57 = vpop.permute.xlu0 %1868 }
0x15b7   :  { %v1871_v58 = vmul.f32 %v1869_v57, %v6341_v19  ;;  %v6474_v19 = vpack.c.bf16 %v2090_v15, %v2089_v14 }
0x15b9   :  { %1895 = vrot.lane.b32.xlu1 %v1871_v58, %s5914_s26 }
0x15ba   :  { %v1891_v59 = vpop.permute.xlu1 %1890  ;;  %v472_v60 = vpop.permute.xlu0 %471 }
0x15bb   :  { %v1893_v62 = vmul.f32 %v1891_v59, %v6345_v28  ;;  %475 = vst.msk [vmem:[#allocation2 + $0x7] sm:$0x1] %vm474_vm3, %v472_v60  ;;  %v4541_v28 = vld [vmem:[%s7059_s13] ss:$0 sm:$0xff]  ;;  %s6798_s13 = sld [smem:[#allocation7 + $0x80]] }
0x15bd   :  { %1900 = vrot.lane.b32.xlu0 %v1893_v62, %s5913_s3 }
0x15be   :  { %v677_v0 = vpop.permute.xlu1 %676  ;;  %v881_v1 = vpop.permute.xlu0 %880 }
0x15bf   :  { %679 = vst.msk [vmem:[#allocation2 + $0x6] sm:$0x1] %vm474_vm3, %v677_v0  ;;  %883 = vst.msk [vmem:[#allocation2 + $0x5] sm:$0x1] %vm474_vm3, %v881_v1 }
0x15c0   :  { %1694 = vst.msk [vmem:[#allocation2 + $0x6] sm:$0x1] %vm468_vm2, %v6330_v61  ;;  %1490 = vst.msk [vmem:[#allocation2 + $0x5] sm:$0x1] %vm468_vm2, %v6302_v22  ;;  %v2087_v22 = vld [vmem:[%s7058_s12] sm:$0xff] }
0x15c1   :  { %s4115_s9 = scalar_lea.vmem [#allocation3], %s6798_s13 }
0x15c2   :  { %v1085_v2 = vpop.permute.xlu1 %1084  ;;  %v1289_v3 = vpop.permute.xlu0 %1288 }
0x15c3   :  { %1087 = vst.msk [vmem:[#allocation2 + $0x4] sm:$0x1] %vm474_vm3, %v1085_v2  ;;  %1291 = vst.msk [vmem:[#allocation2 + $0x3] sm:$0x1] %vm474_vm3, %v1289_v3 }
0x15c4   :  { %1286 = vst.msk [vmem:[#allocation2 + $0x4] sm:$0x1] %vm468_vm2, %v6274_v44  ;;  %v2088_v44 = vld [vmem:[%s7058_s12 + $0x8] sm:$0xff]  ;;  %s6786_s12 = sld [smem:[#allocation7 + $0x201]] }
0x15c5   :  { %v6454_v12 = vpack.c.bf16 %v2088_v44, %v2087_v22 }
0x15c6   :  { %v1493_v5 = vpop.permute.xlu1 %1492  ;;  %v1697_v7 = vpop.permute.xlu0 %1696 }
0x15c7   :  { %1495 = vst.msk [vmem:[#allocation2 + $0x2] sm:$0x1] %vm474_vm3, %v1493_v5  ;;  %1699 = vst.msk [vmem:[#allocation2 + $0x1] sm:$0x1] %vm474_vm3, %v1697_v7 }
0x15ca   :  { %s4135_s18 = scalar_lea.vmem [#allocation3], %s6786_s12 }
0x162b   :  { %v1896_v8 = vpop.permute.xlu1 %1895 }
0x162c   :  { %1898 = vst.msk [vmem:[#allocation2 + $0x7] sm:$0x1] %vm468_vm2, %v1896_v8 }
0x162f   :  { %v1901_v61 = vpop.permute.xlu0 %1900 }
0x1630   :  { %1903 = vst.msk [vmem:[#allocation2] sm:$0x1] %vm474_vm3, %v1901_v61 }
0x1637   :  { %v1906_v18 = vld [vmem:[#allocation2] sm:$0xff] }
0x1638   :  { %5030 = vmatmul.mubr.msk.f32.vlgmr.msra.gmra.mrb[18].mxu0 %vm1922_vm4, %v1906_v18  ;;  %5049 = vmatmul.mubr.msk.f32.vlgmr.msra.gmra.mrb[18].mxu1 %vm1922_vm4, %v1906_v18 }
0x1639   :  { %5454 = vmatpush3.bf16.msra.mxu1 %v6454_v12  ;;  %5448 = vmatpush3.bf16.msra.mxu0 %v6456_v13 }
0x163a   :  { %5455 = vmatprep.subr.bf16.mxu1 %v5910_v4  ;;  %5449 = vmatprep.subr.bf16.mxu0 %v5910_v4 }
0x163b   :  { %5070 = vmatprep.mubr.msk.f32.mxu1 %vm5911_vm0, %v5912_v10  ;;  %5059 = vmatprep.mubr.msk.f32.mxu0 %vm5911_vm0, %v5912_v10 }
0x163d   :  { %5457 = vmatpush3.bf16.msra.mxu1 %v6474_v19  ;;  %5451 = vmatpush3.bf16.msra.mxu0 %v6476_v25 }
0x163e   :  { %5458 = vmatprep.subr.bf16.mxu0 %v5910_v4  ;;  %5464 = vmatprep.subr.bf16.mxu1 %v5910_v4 }
0x1640   :  { %5071 = vmatmul.mubr.f32.vlgmr.msra.gmra.mrb[20].mxu1 %v5912_v10  ;;  %5060 = vmatmul.mubr.f32.vlgmr.msra.gmra.mrb[20].mxu0 %v5912_v10 }
0x1641   :  { %5460 = vmatpush3.bf16.msra.mxu0 %v6456_v13  ;;  %5466 = vmatpush3.bf16.msra.mxu1 %v6454_v12 }
0x1642   :  { %5461 = vmatprep.subr.bf16.mxu0 %v5910_v4  ;;  %5467 = vmatprep.subr.bf16.mxu1 %v5910_v4 }
0x1643   :  { %5092 = vmatprep.mubr.msk.f32.mxu1 %vm5911_vm0, %v5912_v10  ;;  %5081 = vmatprep.mubr.msk.f32.mxu0 %vm5911_vm0, %v5912_v10 }
0x1645   :  { %5463 = vmatpush3.bf16.msra.mxu0 %v6476_v25  ;;  %5469 = vmatpush3.bf16.msra.mxu1 %v6474_v19 }
0x1646   :  { %5470 = vmatprep.subr.bf16.mxu0 %v5910_v4  ;;  %5476 = vmatprep.subr.bf16.mxu1 %v5910_v4 }
0x170b   :  { %v1992_v29 = vpop.f32.mrb[18].mxu0  ;;  %v2078_v30 = vpop.f32.mrb[18].mxu1 }
0x170c   :  { %v1993_v31 = vadd.f32 %v4539_v20, %v1992_v29  ;;  %v2079_v26 = vadd.f32 %v4541_v28, %v2078_v30  ;;  %v5031_v32 = vpop.f32.mrb[19].mxu0  ;;  %v5050_v23 = vpop.f32.mrb[19].mxu1 }
0x170e   :  { %1996 = vst [vmem:[#allocation4] sm:$0xff] %v1993_v31  ;;  %2082 = vst [vmem:[#allocation5] sm:$0xff] %v2079_v26 }
0x1713   :  { %v2230_v33 = vpop.f32.mrb[20].mxu1  ;;  %v2158_v34 = vpop.f32.mrb[20].mxu0 }
0x1714   :  { %v5072_v35 = vpop.f32.mrb[21].mxu1  ;;  %v5061_v27 = vpop.f32.mrb[21].mxu0 }
0x1715   :  { %v2163_v36 = vld [vmem:[#allocation5 + $0x7] sm:$0x1]  ;;  %v2091_v37 = vld [vmem:[#allocation4] sm:$0x1]  ;;  %v2363_v3 = vld [vmem:[#allocation5 + $0x6] sm:$0x1] }
0x1716   :  { %v2234_v38 = vadd.f32 %v2230_v33, %v2163_v36  ;;  %v2162_v39 = vadd.f32 %v2158_v34, %v2091_v37  ;;  %v2289_v7 = vld [vmem:[#allocation4 + $0x1] sm:$0x1] }
0x1718   :  { %5713 = vtanh.f32 %v2234_v38  ;;  %v2257_v6 = vmul.f32 0.5, %v2234_v38  ;;  %v2235_v47 = vmul.f32 0.5, %v2162_v39 }
0x1719   :  { %5715 = vtanh.f32 %v2162_v39 }
0x171a   :  { %5717 = vtanh.f32 %v2257_v6 }
0x171b   :  { %5719 = vtanh.f32 %v2235_v47 }
0x1722   :  { %v5714_v40 = vpop.eup %5713 }
0x1723   :  { %v5716_v41 = vpop.eup %5715  ;;  %2264 = vrot.lane.b32.xlu1 %v5714_v40, %s5913_s3 }
0x1724   :  { %2242 = vrot.lane.b32.xlu0 %v5716_v41, %s5913_s3  ;;  %v5718_v24 = vpop.eup %5717 }
0x1725   :  { %v5720_v63 = vpop.eup %5719  ;;  %v2259_v43 = vmul.f32 0.5, %v5718_v24 }
0x1726   :  { %v2237_v21 = vmul.f32 0.5, %v5720_v63 }
0x1727   :  { %v2260_v42 = vadd.f32 0.5, %v2259_v43  ;;  %v2567_v43 = vld [vmem:[#allocation5 + $0x5] sm:$0x1] }
0x1728   :  { %v2238_v46 = vadd.f32 0.5, %v2237_v21 }
0x1729   :  { %v2262_v51 = vmul.f32 0.0, %v2260_v42 }
0x172a   :  { %v2240_v53 = vmul.f32 0.0, %v2238_v46 }
0x1795   :  { %v2265_v45 = vpop.permute.xlu1 %2264 }
0x1796   :  { %v2267_v48 = vmul.f32 %v2265_v45, %v2260_v42  ;;  %v2243_v49 = vpop.permute.xlu0 %2242 }
0x1797   :  { %v2245_v50 = vmul.f32 %v2243_v49, %v2238_v46 }
0x1798   :  { %2269 = vrot.lane.b32.xlu1 %v2267_v48, %s5914_s26 }
0x1799   :  { %2247 = vrot.lane.b32.xlu0 %v2245_v50, %s5914_s26 }
0x180a   :  { %v2270_v52 = vpop.permute.xlu1 %2269 }
0x180b   :  { %v2272_v54 = vadd.f32 %v2270_v52, %v2262_v51  ;;  %v2248_v55 = vpop.permute.xlu0 %2247 }
0x180c   :  { %v2250_v56 = vadd.f32 %v2248_v55, %v2240_v53 }
0x180d   :  { %5721 = vtanh.f32 %v2272_v54 }
0x180e   :  { %5723 = vtanh.f32 %v2250_v56 }
0x1817   :  { %v5722_v57 = vpop.eup %5721 }
0x1818   :  { %v5724_v58 = vpop.eup %5723  ;;  %2275 = vrot.lane.b32.xlu1 %v5722_v57, %s5913_s3 }
0x1819   :  { %2253 = vrot.lane.b32.xlu0 %v5724_v58, %s5913_s3 }
0x188a   :  { %v2276_v59 = vpop.permute.xlu1 %2275 }
0x188b   :  { %v6514_v60 = vmul.f32 %v2276_v59, %v2260_v42  ;;  %v2254_v62 = vpop.permute.xlu0 %2253  ;;  %v2493_v42 = vld [vmem:[#allocation4 + $0x2] sm:$0x1] }
0x188c   :  { %v2256_v0 = vmul.f32 %v2254_v62, %v2238_v46 }
0x188d   :  { %2364 = vrot.lane.b32.xlu1 %v6514_v60, %s5914_s26 }
0x188e   :  { %2280 = vrot.lane.b32.xlu0 %v2256_v0, %s5914_s26 }
0x18ff   :  { %v2365_v1 = vpop.permute.xlu1 %2364 }
0x1900   :  { %v2281_v2 = vpop.permute.xlu0 %2280  ;;  %5093 = vmatmul.mubr.msk.f32.vlgmr.msra.gmra.mrb[22].mxu1 %vm108_vm1, %v2365_v1 }
0x1901   :  { %2283 = vst.msk [vmem:[#allocation3 + $0x1] sm:$0x1] %vm468_vm2, %v2281_v2  ;;  %5082 = vmatmul.mubr.msk.f32.vlgmr.msra.gmra.mrb[22].mxu0 %vm108_vm1, %v2281_v2  ;;  %5478 = vmatpush3.bf16.msra.mxu1 %v6454_v12 }
0x1902   :  { %5472 = vmatpush3.bf16.msra.mxu0 %v6456_v13  ;;  %5479 = vmatprep.subr.bf16.mxu1 %v5910_v4 }
0x1903   :  { %5473 = vmatprep.subr.bf16.mxu0 %v5910_v4  ;;  %5114 = vmatprep.mubr.msk.f32.mxu1 %vm5911_vm0, %v5912_v10 }
0x1904   :  { %5103 = vmatprep.mubr.msk.f32.mxu0 %vm5911_vm0, %v5912_v10 }
0x1905   :  { %5481 = vmatpush3.bf16.msra.mxu1 %v6474_v19 }
0x1906   :  { %5475 = vmatpush3.bf16.msra.mxu0 %v6476_v25  ;;  %5488 = vmatprep.subr.bf16.mxu1 %v5910_v4 }
0x1907   :  { %5482 = vmatprep.subr.bf16.mxu0 %v5910_v4 }
0x19d3   :  { %v2434_v5 = vpop.f32.mrb[22].mxu1 }
0x19d4   :  { %v2358_v8 = vpop.f32.mrb[22].mxu0  ;;  %v2438_v61 = vadd.f32 %v2434_v5, %v2363_v3  ;;  %v5094_v22 = vpop.f32.mrb[23].mxu1 }
0x19d5   :  { %v2362_v44 = vadd.f32 %v2358_v8, %v2289_v7  ;;  %v5083_v9 = vpop.f32.mrb[23].mxu0 }
0x19d6   :  { %5725 = vtanh.f32 %v2438_v61  ;;  %v2461_v15 = vmul.f32 0.5, %v2438_v61 }
0x19d7   :  { %5727 = vtanh.f32 %v2362_v44  ;;  %v2439_v16 = vmul.f32 0.5, %v2362_v44 }
0x19d8   :  { %5729 = vtanh.f32 %v2461_v15 }
0x19d9   :  { %5731 = vtanh.f32 %v2439_v16 }
0x19e0   :  { %v5726_v11 = vpop.eup %5725 }
0x19e1   :  { %v5728_v14 = vpop.eup %5727  ;;  %2468 = vrot.lane.b32.xlu1 %v5726_v11, %s5913_s3 }
0x19e2   :  { %2446 = vrot.lane.b32.xlu0 %v5728_v14, %s5913_s3  ;;  %v5730_v17 = vpop.eup %5729 }
0x19e3   :  { %v5732_v18 = vpop.eup %5731  ;;  %v2463_v20 = vmul.f32 0.5, %v5730_v17 }
0x19e4   :  { %v2441_v28 = vmul.f32 0.5, %v5732_v18 }
0x19e5   :  { %v2464_v29 = vadd.f32 0.5, %v2463_v20 }
0x19e6   :  { %v2442_v31 = vadd.f32 0.5, %v2441_v28  ;;  %v2771_v28 = vld [vmem:[#allocation5 + $0x4] sm:$0x1] }
0x19e7   :  { %v2466_v33 = vmul.f32 %v2464_v29, %v2272_v54 }
0x19e8   :  { %v2444_v35 = vmul.f32 %v2442_v31, %v2250_v56 }
0x1a53   :  { %v2469_v30 = vpop.permute.xlu1 %2468 }
0x1a54   :  { %v2471_v26 = vmul.f32 %v2469_v30, %v2464_v29  ;;  %v2447_v32 = vpop.permute.xlu0 %2446  ;;  %v2697_v30 = vld [vmem:[#allocation4 + $0x3] sm:$0x1] }
0x1a55   :  { %v2449_v23 = vmul.f32 %v2447_v32, %v2442_v31 }
0x1a56   :  { %2473 = vrot.lane.b32.xlu1 %v2471_v26, %s5914_s26 }
0x1a57   :  { %2451 = vrot.lane.b32.xlu0 %v2449_v23, %s5914_s26 }
0x1ac8   :  { %v2474_v34 = vpop.permute.xlu1 %2473 }
0x1ac9   :  { %v2476_v27 = vadd.f32 %v2474_v34, %v2466_v33  ;;  %v2452_v36 = vpop.permute.xlu0 %2451 }
0x1aca   :  { %v2454_v37 = vadd.f32 %v2452_v36, %v2444_v35 }
0x1acb   :  { %5733 = vtanh.f32 %v2476_v27 }
0x1acc   :  { %5735 = vtanh.f32 %v2454_v37 }
0x1ad5   :  { %v5734_v38 = vpop.eup %5733 }
0x1ad6   :  { %v5736_v39 = vpop.eup %5735  ;;  %2479 = vrot.lane.b32.xlu1 %v5734_v38, %s5913_s3 }
0x1ad7   :  { %2457 = vrot.lane.b32.xlu0 %v5736_v39, %s5913_s3 }
0x1b48   :  { %v2480_v40 = vpop.permute.xlu1 %2479 }
0x1b49   :  { %v6540_v41 = vmul.f32 %v2480_v40, %v2464_v29  ;;  %v2458_v6 = vpop.permute.xlu0 %2457 }
0x1b4a   :  { %v2460_v47 = vmul.f32 %v2458_v6, %v2442_v31 }
0x1b4b   :  { %2568 = vrot.lane.b32.xlu1 %v6540_v41, %s5914_s26 }
0x1b4c   :  { %2484 = vrot.lane.b32.xlu0 %v2460_v47, %s5914_s26 }
0x1bbd   :  { %v2569_v24 = vpop.permute.xlu1 %2568 }
0x1bbe   :  { %v2485_v63 = vpop.permute.xlu0 %2484  ;;  %5115 = vmatmul.mubr.msk.f32.vlgmr.msra.gmra.mrb[24].mxu1 %vm108_vm1, %v2569_v24 }
0x1bbf   :  { %2487 = vst.msk [vmem:[#allocation3 + $0x2] sm:$0x1] %vm468_vm2, %v2485_v63  ;;  %5104 = vmatmul.mubr.msk.f32.vlgmr.msra.gmra.mrb[24].mxu0 %vm108_vm1, %v2485_v63  ;;  %5490 = vmatpush3.bf16.msra.mxu1 %v6454_v12 }
0x1bc0   :  { %5484 = vmatpush3.bf16.msra.mxu0 %v6456_v13  ;;  %5491 = vmatprep.subr.bf16.mxu1 %v5910_v4 }
0x1bc1   :  { %5485 = vmatprep.subr.bf16.mxu0 %v5910_v4  ;;  %5136 = vmatprep.mubr.msk.f32.mxu1 %vm5911_vm0, %v5912_v10 }
0x1bc2   :  { %5125 = vmatprep.mubr.msk.f32.mxu0 %vm5911_vm0, %v5912_v10 }
0x1bc3   :  { %5493 = vmatpush3.bf16.msra.mxu1 %v6474_v19 }
0x1bc4   :  { %5487 = vmatpush3.bf16.msra.mxu0 %v6476_v25  ;;  %5500 = vmatprep.subr.bf16.mxu1 %v5910_v4 }
0x1bc5   :  { %5494 = vmatprep.subr.bf16.mxu0 %v5910_v4 }
0x1c91   :  { %v2638_v21 = vpop.f32.mrb[24].mxu1 }
0x1c92   :  { %v2562_v45 = vpop.f32.mrb[24].mxu0  ;;  %v2642_v46 = vadd.f32 %v2638_v21, %v2567_v43  ;;  %v5116_v48 = vpop.f32.mrb[25].mxu1 }
0x1c93   :  { %v2566_v49 = vadd.f32 %v2562_v45, %v2493_v42  ;;  %v5105_v50 = vpop.f32.mrb[25].mxu0 }
0x1c94   :  { %5737 = vtanh.f32 %v2642_v46  ;;  %v2665_v53 = vmul.f32 0.5, %v2642_v46 }
0x1c95   :  { %5739 = vtanh.f32 %v2566_v49  ;;  %v2643_v54 = vmul.f32 0.5, %v2566_v49 }
0x1c96   :  { %5741 = vtanh.f32 %v2665_v53 }
0x1c97   :  { %5743 = vtanh.f32 %v2643_v54 }
0x1c9e   :  { %v5738_v51 = vpop.eup %5737 }
0x1c9f   :  { %v5740_v52 = vpop.eup %5739  ;;  %2672 = vrot.lane.b32.xlu1 %v5738_v51, %s5913_s3 }
0x1ca0   :  { %2650 = vrot.lane.b32.xlu0 %v5740_v52, %s5913_s3  ;;  %v5742_v55 = vpop.eup %5741 }
0x1ca1   :  { %v5744_v56 = vpop.eup %5743  ;;  %v2667_v57 = vmul.f32 0.5, %v5742_v55 }
0x1ca2   :  { %v2645_v58 = vmul.f32 0.5, %v5744_v56 }
0x1ca3   :  { %v2668_v59 = vadd.f32 0.5, %v2667_v57 }
0x1ca4   :  { %v2646_v0 = vadd.f32 0.5, %v2645_v58 }
0x1ca5   :  { %v2670_v5 = vmul.f32 %v2668_v59, %v2476_v27 }
0x1ca6   :  { %v2648_v8 = vmul.f32 %v2646_v0, %v2454_v37 }
0x1d11   :  { %v2673_v62 = vpop.permute.xlu1 %2672 }
0x1d12   :  { %v2675_v1 = vmul.f32 %v2673_v62, %v2668_v59  ;;  %v2651_v2 = vpop.permute.xlu0 %2650 }
0x1d13   :  { %v2653_v3 = vmul.f32 %v2651_v2, %v2646_v0 }
0x1d14   :  { %2677 = vrot.lane.b32.xlu1 %v2675_v1, %s5914_s26 }
0x1d15   :  { %2655 = vrot.lane.b32.xlu0 %v2653_v3, %s5914_s26 }
0x1d86   :  { %v2678_v7 = vpop.permute.xlu1 %2677 }
0x1d87   :  { %v2680_v61 = vadd.f32 %v2678_v7, %v2670_v5  ;;  %v2656_v22 = vpop.permute.xlu0 %2655 }
0x1d88   :  { %v2658_v44 = vadd.f32 %v2656_v22, %v2648_v8 }
0x1d89   :  { %5745 = vtanh.f32 %v2680_v61 }
0x1d8a   :  { %5747 = vtanh.f32 %v2658_v44 }
0x1d93   :  { %v5746_v9 = vpop.eup %5745 }
0x1d94   :  { %v5748_v11 = vpop.eup %5747  ;;  %2683 = vrot.lane.b32.xlu1 %v5746_v9, %s5913_s3 }
0x1d95   :  { %2661 = vrot.lane.b32.xlu0 %v5748_v11, %s5913_s3 }
0x1e06   :  { %v2684_v14 = vpop.permute.xlu1 %2683 }
0x1e07   :  { %v6566_v15 = vmul.f32 %v2684_v14, %v2668_v59  ;;  %v2662_v16 = vpop.permute.xlu0 %2661  ;;  %v2975_v59 = vld [vmem:[#allocation5 + $0x3] sm:$0x1] }
0x1e08   :  { %v2664_v17 = vmul.f32 %v2662_v16, %v2646_v0  ;;  %v2901_v0 = vld [vmem:[#allocation4 + $0x4] sm:$0x1] }
0x1e09   :  { %2772 = vrot.lane.b32.xlu1 %v6566_v15, %s5914_s26 }
0x1e0a   :  { %2688 = vrot.lane.b32.xlu0 %v2664_v17, %s5914_s26 }
0x1e7b   :  { %v2773_v18 = vpop.permute.xlu1 %2772 }
0x1e7c   :  { %v2689_v20 = vpop.permute.xlu0 %2688  ;;  %5137 = vmatmul.mubr.msk.f32.vlgmr.msra.gmra.mrb[26].mxu1 %vm108_vm1, %v2773_v18 }
0x1e7d   :  { %2691 = vst.msk [vmem:[#allocation3 + $0x3] sm:$0x1] %vm468_vm2, %v2689_v20  ;;  %5126 = vmatmul.mubr.msk.f32.vlgmr.msra.gmra.mrb[26].mxu0 %vm108_vm1, %v2689_v20  ;;  %5502 = vmatpush3.bf16.msra.mxu1 %v6454_v12 }
0x1e7e   :  { %5496 = vmatpush3.bf16.msra.mxu0 %v6456_v13  ;;  %5503 = vmatprep.subr.bf16.mxu1 %v5910_v4 }
0x1e7f   :  { %5497 = vmatprep.subr.bf16.mxu0 %v5910_v4  ;;  %5158 = vmatprep.mubr.msk.f32.mxu1 %vm5911_vm0, %v5912_v10 }
0x1e80   :  { %5147 = vmatprep.mubr.msk.f32.mxu0 %vm5911_vm0, %v5912_v10 }
0x1e81   :  { %5505 = vmatpush3.bf16.msra.mxu1 %v6474_v19 }
0x1e82   :  { %5499 = vmatpush3.bf16.msra.mxu0 %v6476_v25  ;;  %5512 = vmatprep.subr.bf16.mxu1 %v5910_v4 }
0x1e83   :  { %5506 = vmatprep.subr.bf16.mxu0 %v5910_v4 }
0x1f4f   :  { %v2842_v29 = vpop.f32.mrb[26].mxu1 }
0x1f50   :  { %v2766_v31 = vpop.f32.mrb[26].mxu0  ;;  %v2846_v26 = vadd.f32 %v2842_v29, %v2771_v28  ;;  %v5138_v32 = vpop.f32.mrb[27].mxu1 }
0x1f51   :  { %v2770_v23 = vadd.f32 %v2766_v31, %v2697_v30  ;;  %v5127_v33 = vpop.f32.mrb[27].mxu0 }
0x1f52   :  { %5749 = vtanh.f32 %v2846_v26  ;;  %v2869_v27 = vmul.f32 0.5, %v2846_v26 }
0x1f53   :  { %5751 = vtanh.f32 %v2770_v23  ;;  %v2847_v36 = vmul.f32 0.5, %v2770_v23 }
0x1f54   :  { %5753 = vtanh.f32 %v2869_v27 }
0x1f55   :  { %5755 = vtanh.f32 %v2847_v36 }
0x1f5c   :  { %v5750_v34 = vpop.eup %5749 }
0x1f5d   :  { %v5752_v35 = vpop.eup %5751  ;;  %2876 = vrot.lane.b32.xlu1 %v5750_v34, %s5913_s3 }
0x1f5e   :  { %2854 = vrot.lane.b32.xlu0 %v5752_v35, %s5913_s3  ;;  %v5754_v37 = vpop.eup %5753 }
0x1f5f   :  { %v5756_v38 = vpop.eup %5755  ;;  %v2871_v39 = vmul.f32 0.5, %v5754_v37 }
0x1f60   :  { %v2849_v40 = vmul.f32 0.5, %v5756_v38 }
0x1f61   :  { %v2872_v6 = vadd.f32 0.5, %v2871_v39 }
0x1f62   :  { %v2850_v24 = vadd.f32 0.5, %v2849_v40 }
0x1f63   :  { %v2874_v42 = vmul.f32 %v2872_v6, %v2680_v61 }
0x1f64   :  { %v2852_v46 = vmul.f32 %v2850_v24, %v2658_v44 }
0x1fcf   :  { %v2877_v47 = vpop.permute.xlu1 %2876 }
0x1fd0   :  { %v2879_v63 = vmul.f32 %v2877_v47, %v2872_v6  ;;  %v2855_v43 = vpop.permute.xlu0 %2854  ;;  %v3179_v47 = vld [vmem:[#allocation5 + $0x2] sm:$0x1] }
0x1fd1   :  { %v2857_v21 = vmul.f32 %v2855_v43, %v2850_v24 }
0x1fd2   :  { %2881 = vrot.lane.b32.xlu1 %v2879_v63, %s5914_s26  ;;  %v3105_v63 = vld [vmem:[#allocation4 + $0x5] sm:$0x1] }
0x1fd3   :  { %2859 = vrot.lane.b32.xlu0 %v2857_v21, %s5914_s26 }
0x2044   :  { %v2882_v45 = vpop.permute.xlu1 %2881 }
0x2045   :  { %v2884_v48 = vadd.f32 %v2882_v45, %v2874_v42  ;;  %v2860_v49 = vpop.permute.xlu0 %2859 }
0x2046   :  { %v2862_v50 = vadd.f32 %v2860_v49, %v2852_v46 }
0x2047   :  { %5757 = vtanh.f32 %v2884_v48 }
0x2048   :  { %5759 = vtanh.f32 %v2862_v50 }
0x2051   :  { %v5758_v51 = vpop.eup %5757 }
0x2052   :  { %v5760_v52 = vpop.eup %5759  ;;  %2887 = vrot.lane.b32.xlu1 %v5758_v51, %s5913_s3 }
0x2053   :  { %2865 = vrot.lane.b32.xlu0 %v5760_v52, %s5913_s3 }
0x20c4   :  { %v2888_v53 = vpop.permute.xlu1 %2887 }
0x20c5   :  { %v6592_v54 = vmul.f32 %v2888_v53, %v2872_v6  ;;  %v2866_v55 = vpop.permute.xlu0 %2865 }
0x20c6   :  { %v2868_v56 = vmul.f32 %v2866_v55, %v2850_v24 }
0x20c7   :  { %2976 = vrot.lane.b32.xlu1 %v6592_v54, %s5914_s26 }
0x20c8   :  { %2892 = vrot.lane.b32.xlu0 %v2868_v56, %s5914_s26 }
0x2139   :  { %v2977_v57 = vpop.permute.xlu1 %2976 }
0x213a   :  { %v2893_v58 = vpop.permute.xlu0 %2892  ;;  %5159 = vmatmul.mubr.msk.f32.vlgmr.msra.gmra.mrb[28].mxu1 %vm108_vm1, %v2977_v57 }
0x213b   :  { %2895 = vst.msk [vmem:[#allocation3 + $0x4] sm:$0x1] %vm468_vm2, %v2893_v58  ;;  %5148 = vmatmul.mubr.msk.f32.vlgmr.msra.gmra.mrb[28].mxu0 %vm108_vm1, %v2893_v58  ;;  %5514 = vmatpush3.bf16.msra.mxu1 %v6454_v12 }
0x213c   :  { %5508 = vmatpush3.bf16.msra.mxu0 %v6456_v13  ;;  %5515 = vmatprep.subr.bf16.mxu1 %v5910_v4 }
0x213d   :  { %5509 = vmatprep.subr.bf16.mxu0 %v5910_v4  ;;  %5180 = vmatprep.mubr.msk.f32.mxu1 %vm5911_vm0, %v5912_v10 }
0x213e   :  { %5169 = vmatprep.mubr.msk.f32.mxu0 %vm5911_vm0, %v5912_v10 }
0x213f   :  { %5517 = vmatpush3.bf16.msra.mxu1 %v6474_v19 }
0x2140   :  { %5511 = vmatpush3.bf16.msra.mxu0 %v6476_v25  ;;  %5524 = vmatprep.subr.bf16.mxu1 %v5910_v4 }
0x2141   :  { %5518 = vmatprep.subr.bf16.mxu0 %v5910_v4 }
0x220d   :  { %v3046_v62 = vpop.f32.mrb[28].mxu1 }
0x220e   :  { %v2970_v1 = vpop.f32.mrb[28].mxu0  ;;  %v3050_v2 = vadd.f32 %v3046_v62, %v2975_v59  ;;  %v5160_v3 = vpop.f32.mrb[29].mxu1 }
0x220f   :  { %v2974_v5 = vadd.f32 %v2970_v1, %v2901_v0  ;;  %v5149_v7 = vpop.f32.mrb[29].mxu0 }
0x2210   :  { %5761 = vtanh.f32 %v3050_v2  ;;  %v3073_v22 = vmul.f32 0.5, %v3050_v2 }
0x2211   :  { %5763 = vtanh.f32 %v2974_v5  ;;  %v3051_v44 = vmul.f32 0.5, %v2974_v5 }
0x2212   :  { %5765 = vtanh.f32 %v3073_v22 }
0x2213   :  { %5767 = vtanh.f32 %v3051_v44 }
0x221a   :  { %v5762_v8 = vpop.eup %5761 }
0x221b   :  { %v5764_v61 = vpop.eup %5763  ;;  %3080 = vrot.lane.b32.xlu1 %v5762_v8, %s5913_s3 }
0x221c   :  { %3058 = vrot.lane.b32.xlu0 %v5764_v61, %s5913_s3  ;;  %v5766_v9 = vpop.eup %5765 }
0x221d   :  { %v5768_v11 = vpop.eup %5767  ;;  %v3075_v14 = vmul.f32 0.5, %v5766_v9 }
0x221e   :  { %v3053_v16 = vmul.f32 0.5, %v5768_v11 }
0x221f   :  { %v3076_v17 = vadd.f32 0.5, %v3075_v14 }
0x2220   :  { %v3054_v20 = vadd.f32 0.5, %v3053_v16 }
0x2221   :  { %v3078_v31 = vmul.f32 %v3076_v17, %v2884_v48 }
0x2222   :  { %v3056_v32 = vmul.f32 %v3054_v20, %v2862_v50 }
0x228d   :  { %v3081_v18 = vpop.permute.xlu1 %3080 }
0x228e   :  { %v3083_v28 = vmul.f32 %v3081_v18, %v3076_v17  ;;  %v3059_v29 = vpop.permute.xlu0 %3058 }
0x228f   :  { %v3061_v30 = vmul.f32 %v3059_v29, %v3054_v20  ;;  %v3309_v29 = vld [vmem:[#allocation4 + $0x6] sm:$0x1] }
0x2290   :  { %3085 = vrot.lane.b32.xlu1 %v3083_v28, %s5914_s26 }
0x2291   :  { %3063 = vrot.lane.b32.xlu0 %v3061_v30, %s5914_s26 }
0x2302   :  { %v3086_v26 = vpop.permute.xlu1 %3085 }
0x2303   :  { %v3088_v23 = vadd.f32 %v3086_v26, %v3078_v31  ;;  %v3064_v33 = vpop.permute.xlu0 %3063 }
0x2304   :  { %v3066_v34 = vadd.f32 %v3064_v33, %v3056_v32 }
0x2305   :  { %5769 = vtanh.f32 %v3088_v23 }
0x2306   :  { %5771 = vtanh.f32 %v3066_v34 }
0x230f   :  { %v5770_v35 = vpop.eup %5769 }
0x2310   :  { %v5772_v27 = vpop.eup %5771  ;;  %3091 = vrot.lane.b32.xlu1 %v5770_v35, %s5913_s3 }
0x2311   :  { %3069 = vrot.lane.b32.xlu0 %v5772_v27, %s5913_s3 }
0x2382   :  { %v3092_v36 = vpop.permute.xlu1 %3091 }
0x2383   :  { %v6618_v37 = vmul.f32 %v3092_v36, %v3076_v17  ;;  %v3070_v38 = vpop.permute.xlu0 %3069 }
0x2384   :  { %v3072_v39 = vmul.f32 %v3070_v38, %v3054_v20  ;;  %v3383_v20 = vld [vmem:[#allocation5 + $0x1] sm:$0x1] }
0x2385   :  { %3180 = vrot.lane.b32.xlu1 %v6618_v37, %s5914_s26 }
0x2386   :  { %3096 = vrot.lane.b32.xlu0 %v3072_v39, %s5914_s26 }
0x23f7   :  { %v3181_v40 = vpop.permute.xlu1 %3180 }
0x23f8   :  { %v6623_v6 = vpop.permute.xlu0 %3096  ;;  %5181 = vmatmul.mubr.msk.f32.vlgmr.msra.gmra.mrb[30].mxu1 %vm108_vm1, %v3181_v40 }
0x23f9   :  { %5170 = vmatmul.mubr.msk.f32.vlgmr.msra.gmra.mrb[30].mxu0 %vm108_vm1, %v6623_v6  ;;  %5526 = vmatpush3.bf16.msra.mxu1 %v6454_v12 }
0x23fa   :  { %5520 = vmatpush3.bf16.msra.mxu0 %v6456_v13  ;;  %5527 = vmatprep.subr.bf16.mxu1 %v5910_v4 }
0x23fb   :  { %5521 = vmatprep.subr.bf16.mxu0 %v5910_v4  ;;  %5202 = vmatprep.mubr.msk.f32.mxu1 %vm5911_vm0, %v5912_v10 }
0x23fc   :  { %5191 = vmatprep.mubr.msk.f32.mxu0 %vm5911_vm0, %v5912_v10 }
0x23fd   :  { %5529 = vmatpush3.bf16.msra.mxu1 %v6474_v19 }
0x23fe   :  { %5523 = vmatpush3.bf16.msra.mxu0 %v6476_v25  ;;  %5536 = vmatprep.subr.bf16.mxu1 %v5910_v4 }
0x23ff   :  { %5530 = vmatprep.subr.bf16.mxu0 %v5910_v4 }
0x24cb   :  { %v3250_v24 = vpop.f32.mrb[30].mxu1 }
0x24cc   :  { %v3174_v43 = vpop.f32.mrb[30].mxu0  ;;  %v3254_v21 = vadd.f32 %v3250_v24, %v3179_v47  ;;  %v5182_v42 = vpop.f32.mrb[31].mxu1 }
0x24cd   :  { %v3178_v45 = vadd.f32 %v3174_v43, %v3105_v63  ;;  %v5171_v46 = vpop.f32.mrb[31].mxu0 }
0x24ce   :  { %5773 = vtanh.f32 %v3254_v21  ;;  %v3277_v50 = vmul.f32 0.5, %v3254_v21 }
0x24cf   :  { %5775 = vtanh.f32 %v3178_v45  ;;  %v3255_v51 = vmul.f32 0.5, %v3178_v45 }
0x24d0   :  { %5777 = vtanh.f32 %v3277_v50 }
0x24d1   :  { %5779 = vtanh.f32 %v3255_v51 }
0x24d8   :  { %v5774_v48 = vpop.eup %5773 }
0x24d9   :  { %v5776_v49 = vpop.eup %5775  ;;  %3284 = vrot.lane.b32.xlu1 %v5774_v48, %s5913_s3 }
0x24da   :  { %3262 = vrot.lane.b32.xlu0 %v5776_v49, %s5913_s3  ;;  %v5778_v52 = vpop.eup %5777 }
0x24db   :  { %v5780_v53 = vpop.eup %5779  ;;  %v3279_v55 = vmul.f32 0.5, %v5778_v52 }
0x24dc   :  { %v3257_v56 = vmul.f32 0.5, %v5780_v53 }
0x24dd   :  { %v3280_v57 = vadd.f32 0.5, %v3279_v55 }
0x24de   :  { %v3258_v59 = vadd.f32 0.5, %v3257_v56 }
0x24df   :  { %v3282_v2 = vmul.f32 %v3280_v57, %v3088_v23 }
0x24e0   :  { %v3260_v5 = vmul.f32 %v3258_v59, %v3066_v34 }
0x254b   :  { %v3285_v58 = vpop.permute.xlu1 %3284 }
0x254c   :  { %v3287_v62 = vmul.f32 %v3285_v58, %v3280_v57  ;;  %v3263_v0 = vpop.permute.xlu0 %3262 }
0x254d   :  { %v3265_v1 = vmul.f32 %v3263_v0, %v3258_v59 }
0x254e   :  { %3289 = vrot.lane.b32.xlu1 %v3287_v62, %s5914_s26 }
0x254f   :  { %3267 = vrot.lane.b32.xlu0 %v3265_v1, %s5914_s26 }
0x25c0   :  { %v3290_v3 = vpop.permute.xlu1 %3289 }
0x25c1   :  { %v3292_v7 = vadd.f32 %v3290_v3, %v3282_v2  ;;  %v3268_v8 = vpop.permute.xlu0 %3267 }
0x25c2   :  { %v3270_v61 = vadd.f32 %v3268_v8, %v3260_v5 }
0x25c3   :  { %5781 = vtanh.f32 %v3292_v7 }
0x25c4   :  { %5783 = vtanh.f32 %v3270_v61 }
0x25cd   :  { %v5782_v22 = vpop.eup %5781 }
0x25ce   :  { %v5784_v44 = vpop.eup %5783  ;;  %3295 = vrot.lane.b32.xlu1 %v5782_v22, %s5913_s3 }
0x25cf   :  { %3273 = vrot.lane.b32.xlu0 %v5784_v44, %s5913_s3 }
0x2640   :  { %v3296_v9 = vpop.permute.xlu1 %3295 }
0x2641   :  { %v6646_v11 = vmul.f32 %v3296_v9, %v3280_v57  ;;  %v3274_v14 = vpop.permute.xlu0 %3273  ;;  %v3587_v57 = vld [vmem:[#allocation5] sm:$0x1] }
0x2642   :  { %v3276_v16 = vmul.f32 %v3274_v14, %v3258_v59  ;;  %v3513_v59 = vld [vmem:[#allocation4 + $0x7] sm:$0x1] }
0x2643   :  { %3384 = vrot.lane.b32.xlu1 %v6646_v11, %s5914_s26 }
0x2644   :  { %3300 = vrot.lane.b32.xlu0 %v3276_v16, %s5914_s26 }
0x26b5   :  { %v3385_v17 = vpop.permute.xlu1 %3384 }
0x26b6   :  { %v6651_v18 = vpop.permute.xlu0 %3300  ;;  %5203 = vmatmul.mubr.msk.f32.vlgmr.msra.gmra.mrb[32].mxu1 %vm108_vm1, %v3385_v17 }
0x26b7   :  { %5192 = vmatmul.mubr.msk.f32.vlgmr.msra.gmra.mrb[32].mxu0 %vm108_vm1, %v6651_v18  ;;  %5538 = vmatpush3.bf16.msra.mxu1 %v6454_v12 }
0x26b8   :  { %5532 = vmatpush3.bf16.msra.mxu0 %v6456_v13  ;;  %5539 = vmatprep.subr.bf16.mxu1 %v5910_v4 }
0x26b9   :  { %5533 = vmatprep.subr.bf16.mxu0 %v5910_v4  ;;  %5224 = vmatprep.mubr.msk.f32.mxu1 %vm5911_vm0, %v5912_v10 }
0x26ba   :  { %5213 = vmatprep.mubr.msk.f32.mxu0 %vm5911_vm0, %v5912_v10 }
0x26bb   :  { %5541 = vmatpush3.bf16.msra.mxu1 %v6474_v19 }
0x26bc   :  { %5535 = vmatpush3.bf16.msra.mxu0 %v6476_v25 }
0x2789   :  { %v3454_v28 = vpop.f32.mrb[32].mxu1 }
0x278a   :  { %v3378_v12 = vpop.f32.mrb[32].mxu0  ;;  %v3458_v30 = vadd.f32 %v3454_v28, %v3383_v20  ;;  %v5204_v13 = vpop.f32.mrb[33].mxu1 }
0x278b   :  { %v3382_v31 = vadd.f32 %v3378_v12, %v3309_v29  ;;  %v5193_v26 = vpop.f32.mrb[33].mxu0 }
0x278c   :  { %5785 = vtanh.f32 %v3458_v30  ;;  %v3481_v33 = vmul.f32 0.5, %v3458_v30 }
0x278d   :  { %5787 = vtanh.f32 %v3382_v31  ;;  %v3459_v19 = vmul.f32 0.5, %v3382_v31 }
0x278e   :  { %5789 = vtanh.f32 %v3481_v33 }
0x278f   :  { %5791 = vtanh.f32 %v3459_v19 }
0x2796   :  { %v5786_v32 = vpop.eup %5785 }
0x2797   :  { %v5788_v23 = vpop.eup %5787  ;;  %3488 = vrot.lane.b32.xlu1 %v5786_v32, %s5913_s3 }
0x2798   :  { %3466 = vrot.lane.b32.xlu0 %v5788_v23, %s5913_s3  ;;  %v5790_v25 = vpop.eup %5789 }
0x2799   :  { %v5792_v34 = vpop.eup %5791  ;;  %v3483_v35 = vmul.f32 0.5, %v5790_v25  ;;  %v3719_v25 = vld [vmem:[%s7060_s14] sm:$0xff] }
0x279a   :  { %v3461_v27 = vmul.f32 0.5, %v5792_v34  ;;  %v3720_v34 = vld [vmem:[%s7060_s14 + $0x8] sm:$0xff] }
0x279b   :  { %v3484_v36 = vadd.f32 0.5, %v3483_v35  ;;  %v3808_v35 = vld [vmem:[%s7061_s15] sm:$0xff] }
0x279c   :  { %v3462_v39 = vadd.f32 0.5, %v3461_v27  ;;  %v5542_v27 = vpack.c.bf16 %v3720_v34, %v3719_v25  ;;  %v6870_v25 = vld [vmem:[%s7066_s20 + $0x38] sm:$0xff] }
0x279d   :  { %v3486_v63 = vmul.f32 %v3484_v36, %v3292_v7 }
0x279e   :  { %v3464_v21 = vmul.f32 %v3462_v39, %v3270_v61  ;;  %5543 = vmatprep.subr.bf16.mxu0 %v5542_v27 }
0x2809   :  { %v3489_v38 = vpop.permute.xlu1 %3488 }
0x280a   :  { %v3491_v40 = vmul.f32 %v3489_v38, %v3484_v36  ;;  %v3467_v47 = vpop.permute.xlu0 %3466  ;;  %v3721_v38 = vld [vmem:[%s7060_s14 + $0x10] sm:$0xff] }
0x280b   :  { %v3469_v24 = vmul.f32 %v3467_v47, %v3462_v39 }
0x280c   :  { %3493 = vrot.lane.b32.xlu1 %v3491_v40, %s5914_s26 }
0x280d   :  { %3471 = vrot.lane.b32.xlu0 %v3469_v24, %s5914_s26  ;;  %v3811_v24 = vld [vmem:[%s7061_s15 + $0x18] sm:$0xff] }
0x287e   :  { %v3494_v43 = vpop.permute.xlu1 %3493 }
0x287f   :  { %v3496_v42 = vadd.f32 %v3494_v43, %v3486_v63  ;;  %v3472_v45 = vpop.permute.xlu0 %3471  ;;  %v3725_v43 = vld [vmem:[%s7060_s14 + $0x30] sm:$0xff] }
0x2880   :  { %v3474_v46 = vadd.f32 %v3472_v45, %v3464_v21  ;;  %v3726_v21 = vld [vmem:[%s7060_s14 + $0x38] sm:$0xff] }
0x2881   :  { %5793 = vtanh.f32 %v3496_v42  ;;  %v5554_v45 = vpack.c.bf16 %v3726_v21, %v3725_v43 }
0x2882   :  { %5795 = vtanh.f32 %v3474_v46 }
0x288b   :  { %v5794_v48 = vpop.eup %5793 }
0x288c   :  { %v5796_v49 = vpop.eup %5795  ;;  %3499 = vrot.lane.b32.xlu1 %v5794_v48, %s5913_s3  ;;  %v3815_v48 = vld [vmem:[%s7061_s15 + $0x38] sm:$0xff] }
0x288d   :  { %3477 = vrot.lane.b32.xlu0 %v5796_v49, %s5913_s3 }
0x28fe   :  { %v3500_v50 = vpop.permute.xlu1 %3499 }
0x28ff   :  { %v6672_v51 = vmul.f32 %v3500_v50, %v3484_v36  ;;  %v3478_v52 = vpop.permute.xlu0 %3477  ;;  %v3809_v36 = vld [vmem:[%s7061_s15 + $0x8] sm:$0xff] }
0x2900   :  { %v3480_v53 = vmul.f32 %v3478_v52, %v3462_v39  ;;  %v3722_v39 = vld [vmem:[%s7060_s14 + $0x18] sm:$0xff]  ;;  %v5558_v40 = vpack.c.bf16 %v3809_v36, %v3808_v35 }
0x2901   :  { %3588 = vrot.lane.b32.xlu1 %v6672_v51, %s5914_s26  ;;  %v5546_v47 = vpack.c.bf16 %v3722_v39, %v3721_v38 }
0x2902   :  { %3504 = vrot.lane.b32.xlu0 %v3480_v53, %s5914_s26  ;;  %5559 = vmatprep.subr.bf16.mxu1 %v5558_v40 }
0x2973   :  { %v3589_v55 = vpop.permute.xlu1 %3588 }
0x2974   :  { %v6677_v56 = vpop.permute.xlu0 %3504  ;;  %5225 = vmatmul.mubr.msk.f32.vlgmr.msra.gmra.mrb[34].mxu1 %vm108_vm1, %v3589_v55 }
0x2975   :  { %5214 = vmatmul.mubr.msk.f32.vlgmr.msra.gmra.mrb[34].mxu0 %vm108_vm1, %v6677_v56  ;;  %5561 = vmatpush3.bf16.msra.mxu1 %v5558_v40 }
0x2976   :  { %5545 = vmatpush3.bf16.msra.mxu0 %v5542_v27 }
0x2977   :  { %5547 = vmatprep.subr.bf16.mxu0 %v5546_v47 }
0x297a   :  { %5549 = vmatpush3.bf16.msra.mxu0 %v5546_v47 }
0x2a47   :  { %v3658_v58 = vpop.f32.mrb[34].mxu1 }
0x2a48   :  { %v3582_v62 = vpop.f32.mrb[34].mxu0  ;;  %v3662_v0 = vadd.f32 %v3658_v58, %v3587_v57  ;;  %v5226_v1 = vpop.f32.mrb[35].mxu1 }
0x2a49   :  { %v3586_v2 = vadd.f32 %v3582_v62, %v3513_v59  ;;  %v5215_v3 = vpop.f32.mrb[35].mxu0  ;;  %v4226_v1 = vld [vmem:[%s7066_s20] sm:$0xff] }
0x2a4a   :  { %5797 = vtanh.f32 %v3662_v0  ;;  %v3685_v8 = vmul.f32 0.5, %v3662_v0  ;;  %v4218_v3 = vld [vmem:[%s7065_s19] sm:$0xff] }
0x2a4b   :  { %5799 = vtanh.f32 %v3586_v2  ;;  %v3663_v61 = vmul.f32 0.5, %v3586_v2  ;;  %v4227_v2 = vld [vmem:[%s7066_s20 + $0x8] sm:$0xff] }
0x2a4c   :  { %5801 = vtanh.f32 %v3685_v8 }
0x2a4d   :  { %5803 = vtanh.f32 %v3663_v61  ;;  %v4228_v61 = vld [vmem:[%s7066_s20 + $0x10] sm:$0xff] }
0x2a54   :  { %v5798_v5 = vpop.eup %5797 }
0x2a55   :  { %v5800_v7 = vpop.eup %5799  ;;  %3692 = vrot.lane.b32.xlu1 %v5798_v5, %s5913_s3  ;;  %v4219_v5 = vld [vmem:[%s7065_s19 + $0x8] sm:$0xff] }
0x2a56   :  { %3670 = vrot.lane.b32.xlu0 %v5800_v7, %s5913_s3  ;;  %v5802_v22 = vpop.eup %5801  ;;  %v5575_v7 = vpack.c.bf16 %v4227_v2, %v4226_v1  ;;  %v5587_v8 = vpack.c.bf16 %v4219_v5, %v4218_v3 }
0x2a57   :  { %v5804_v44 = vpop.eup %5803  ;;  %v3687_v9 = vmul.f32 0.5, %v5802_v22  ;;  %v4229_v22 = vld [vmem:[%s7066_s20 + $0x18] sm:$0xff] }
0x2a58   :  { %v3665_v14 = vmul.f32 0.5, %v5804_v44 }
0x2a59   :  { %v6684_v16 = vadd.f32 0.5, %v3687_v9  ;;  %v4220_v9 = vld [vmem:[%s7065_s19 + $0x10] sm:$0xff] }
0x2a5a   :  { %v6686_v20 = vadd.f32 0.5, %v3665_v14  ;;  %v4221_v14 = vld [vmem:[%s7065_s19 + $0x18] sm:$0xff] }
0x2a5b   :  { %v3690_v30 = vmul.f32 %v6684_v16, %v3496_v42 }
0x2a5c   :  { %v3668_v31 = vmul.f32 %v6686_v20, %v3474_v46  ;;  %v3814_v46 = vld [vmem:[%s7061_s15 + $0x30] sm:$0xff] }
0x2a5d   :  { %v5570_v49 = vpack.c.bf16 %v3815_v48, %v3814_v46 }
0x2ac7   :  { %v3693_v17 = vpop.permute.xlu1 %3692 }
0x2ac8   :  { %v3695_v28 = vmul.f32 %v3693_v17, %v6684_v16  ;;  %v3671_v29 = vpop.permute.xlu0 %3670 }
0x2ac9   :  { %v3673_v12 = vmul.f32 %v3671_v29, %v6686_v20 }
0x2aca   :  { %3697 = vrot.lane.b32.xlu1 %v3695_v28, %s5914_s26  ;;  %v6849_v28 = vld [vmem:[%s7066_s20 + $0x28] sm:$0xff] }
0x2acb   :  { %3675 = vrot.lane.b32.xlu0 %v3673_v12, %s5914_s26  ;;  %v5578_v12 = vpack.c.bf16 %v4229_v22, %v4228_v61 }
0x2b3c   :  { %v3698_v13 = vpop.permute.xlu1 %3697 }
0x2b3d   :  { %v3700_v26 = vadd.f32 %v3698_v13, %v3690_v30  ;;  %v3676_v32 = vpop.permute.xlu0 %3675  ;;  %v5590_v30 = vpack.c.bf16 %v4221_v14, %v4220_v9  ;;  %v4222_v13 = vld [vmem:[%s7065_s19 + $0x20] sm:$0xff]  ;;  %v4390_v9 = vld [vmem:[%s7068_s22 + $0x8] sm:$0xff] }
0x2b3e   :  { %v3678_v23 = vadd.f32 %v3676_v32, %v3668_v31 }
0x2b3f   :  { %5805 = vtanh.f32 %v3700_v26  ;;  %v4223_v26 = vld [vmem:[%s7065_s19 + $0x28] sm:$0xff] }
0x2b40   :  { %5807 = vtanh.f32 %v3678_v23  ;;  %v5593_v47 = vpack.c.bf16 %v4223_v26, %v4222_v13 }
0x2b49   :  { %v5806_v33 = vpop.eup %5805 }
0x2b4a   :  { %v5808_v19 = vpop.eup %5807  ;;  %3703 = vrot.lane.b32.xlu1 %v5806_v33, %s5913_s3 }
0x2b4b   :  { %3681 = vrot.lane.b32.xlu0 %v5808_v19, %s5913_s3  ;;  %v6865_v19 = vld [vmem:[%s7066_s20 + $0x30] sm:$0xff] }
0x2b4e   :  { %2489 = vrot.lane.b32.xlu1 %v6540_v41, %s5913_s3  ;;  %v3810_v41 = vld [vmem:[%s7061_s15 + $0x10] sm:$0xff] }
0x2b4f   :  { %2693 = vrot.lane.b32.xlu0 %v6566_v15, %s5913_s3  ;;  %v5562_v63 = vpack.c.bf16 %v3811_v24, %v3810_v41  ;;  %v3723_v15 = vld [vmem:[%s7060_s14 + $0x20] sm:$0xff]  ;;  %v4224_v41 = vld [vmem:[%s7065_s19 + $0x30] sm:$0xff]  ;;  %v4225_v24 = vld [vmem:[%s7065_s19 + $0x38] sm:$0xff]  ;;  %s4109_s19 = scalar_lea.vmem [#allocation3], %s6795_s10  ;;  %s4153_s10 = scalar_lea.vmem [#allocation3], %s6792_s29 }
0x2b51   :  { %5563 = vmatprep.subr.bf16.mxu1 %v5562_v63 }
0x2b52   :  { %2897 = vrot.lane.b32.xlu1 %v6592_v54, %s5913_s3  ;;  %5565 = vmatpush3.bf16.msra.mxu1 %v5562_v63  ;;  %v3812_v54 = vld [vmem:[%s7061_s15 + $0x20] sm:$0xff] }
0x2b53   :  { %2285 = vrot.lane.b32.xlu0 %v6514_v60, %s5913_s3  ;;  %v3724_v60 = vld [vmem:[%s7060_s14 + $0x28] sm:$0xff]  ;;  %s6778_s14 = sld [smem:[#allocation7 + $0x1]] }
0x2b56   :  { %3101 = vrot.lane.b32.xlu1 %v6618_v37, %s5913_s3  ;;  %v5550_v37 = vpack.c.bf16 %v3724_v60, %v3723_v15 }
0x2b57   :  { %3305 = vrot.lane.b32.xlu0 %v6646_v11, %s5913_s3  ;;  %v3813_v11 = vld [vmem:[%s7061_s15 + $0x28] sm:$0xff]  ;;  %s6780_s15 = sld [smem:[#allocation7 + $0x81]] }
0x2b58   :  { %v5566_v42 = vpack.c.bf16 %v3813_v11, %v3812_v54  ;;  %5551 = vmatprep.subr.bf16.mxu0 %v5550_v37 }
0x2b59   :  { %5553 = vmatpush3.bf16.msra.mxu0 %v5550_v37  ;;  %s4111_s12 = scalar_lea.vmem [#allocation3], %s6778_s14 }
0x2b5a   :  { %3509 = vrot.lane.b32.xlu1 %v6672_v51, %s5913_s3  ;;  %5567 = vmatprep.subr.bf16.mxu1 %v5566_v42 }
0x2b5b   :  { %5569 = vmatpush3.bf16.msra.mxu1 %v5566_v42  ;;  %5555 = vmatprep.subr.bf16.mxu0 %v5554_v45 }
0x2b5c   :  { %5571 = vmatprep.subr.bf16.mxu1 %v5570_v49 }
0x2b5d   :  { %5557 = vmatpush3.bf16.msra.mxu0 %v5554_v45  ;;  %s4117_s6 = scalar_lea.vmem [#allocation3], %s6780_s15 }
0x2b5e   :  { %5574 = vmatprep.subr.bf16.mxu0 %v5910_v4 }
0x2b5f   :  { %5573 = vmatpush3.bf16.msra.mxu1 %v5570_v49  ;;  %v5584_v49 = vpack.c.bf16 %v6870_v25, %v6865_v19 }
0x2b60   :  { %5586 = vmatprep.subr.bf16.mxu1 %v5910_v4 }
0x2bbc   :  { %v3704_v50 = vpop.permute.xlu1 %3703 }
0x2bbd   :  { %v3706_v51 = vmul.f32 %v3704_v50, %v6684_v16  ;;  %v3682_v52 = vpop.permute.xlu0 %3681 }
0x2bbe   :  { %v3684_v53 = vmul.f32 %v3682_v52, %v6686_v20  ;;  %v6844_v20 = vld [vmem:[%s7066_s20 + $0x20] sm:$0xff]  ;;  %s4121_s20 = scalar_lea.vmem [#allocation3], %s6800_s2  ;;  %s4127_s2 = scalar_lea.vmem [#allocation3], %s6805_s7 }
0x2bbf   :  { %3713 = vrot.lane.b32.xlu0 %v3706_v51, %s5913_s3  ;;  %s6782_s3 = sld [smem:[#allocation7 + $0x101]]  ;;  %v5581_v40 = vpack.c.bf16 %v6849_v28, %v6844_v20  ;;  %s4139_s7 = scalar_lea.vmem [#allocation3], %s6818_s8  ;;  %v5915_v20 = vmov 0   ;;  %v3893_v28 = vlaneseq }
0x2bc0   :  { %3708 = vrot.lane.b32.xlu1 %v3684_v53, %s5914_s26  ;;  %v2490_v55 = vpop.permute.xlu1 %2489  ;;  %s6784_s26 = sld [smem:[#allocation7 + $0x181]]  ;;  %v5596_v53 = vpack.c.bf16 %v4225_v24, %v4224_v41  ;;  %5616 = vset.pattern.permute.xlu0 %v5915_v20 }
0x2bc1   :  { %2492 = vst.msk [vmem:[#allocation3 + $0x7] sm:$0x1] %vm474_vm3, %v2490_v55  ;;  %v2694_v57 = vpop.permute.xlu0 %2693  ;;  %5615 = vset.pattern.permute.xlu1 %v5915_v20 }
0x2bc2   :  { %3507 = vst.msk [vmem:[#allocation3 + $0x7] sm:$0x1] %vm468_vm2, %v6677_v56 }
0x2bc3   :  { %2696 = vst.msk [vmem:[#allocation3 + $0x6] sm:$0x1] %vm474_vm3, %v2694_v57 }
0x2bc4   :  { %3303 = vst.msk [vmem:[#allocation3 + $0x6] sm:$0x1] %vm468_vm2, %v6651_v18  ;;  %v2898_v58 = vpop.permute.xlu1 %2897 }
0x2bc5   :  { %2900 = vst.msk [vmem:[#allocation3 + $0x5] sm:$0x1] %vm474_vm3, %v2898_v58  ;;  %v2286_v59 = vpop.permute.xlu0 %2285  ;;  %s4123_s15 = scalar_lea.vmem [#allocation3], %s6782_s3  ;;  %s4147_s3 = scalar_lea.vmem [#allocation3], %s6790_s28 }
0x2bc6   :  { %3099 = vst.msk [vmem:[#allocation3 + $0x5] sm:$0x1] %vm468_vm2, %v6623_v6  ;;  %s4145_s28 = scalar_lea.vmem [#allocation3], %s6826_s27 }
0x2bc7   :  { %2288 = vst.msk [vmem:[#allocation3 + $0x8] sm:$0x1] %vm474_vm3, %v2286_v59 }
0x2bc8   :  { %v3102_v62 = vpop.permute.xlu1 %3101 }
0x2bc9   :  { %3104 = vst.msk [vmem:[#allocation3 + $0x4] sm:$0x1] %vm474_vm3, %v3102_v62  ;;  %v3306_v0 = vpop.permute.xlu0 %3305 }
0x2bca   :  { %3308 = vst.msk [vmem:[#allocation3 + $0x3] sm:$0x1] %vm474_vm3, %v3306_v0 }
0x2bcc   :  { %v3510_v56 = vpop.permute.xlu1 %3509 }
0x2bcd   :  { %3512 = vst.msk [vmem:[#allocation3 + $0x2] sm:$0x1] %vm474_vm3, %v3510_v56 }
0x2c31   :  { %v3714_v6 = vpop.permute.xlu0 %3713 }
0x2c32   :  { %v3709_v18 = vpop.permute.xlu1 %3708  ;;  %3716 = vst.msk [vmem:[#allocation3 + $0x1] sm:$0x1] %vm474_vm3, %v3714_v6  ;;  %vm4085_vm3 = vcmask 56320  }
0x2c33   :  { %3711 = vst.msk [vmem:[#allocation3 + $0x8] sm:$0x1] %vm468_vm2, %v3709_v18 }
0x2c39   :  { %v3717_v44 = vld [vmem:[#allocation3] sm:$0xff] }
0x2c3a   :  { %5243 = vmatprep.mubr.msk.f32.mxu0 %vm1922_vm4, %v3717_v44  ;;  %5262 = vmatprep.mubr.msk.f32.mxu1 %vm1922_vm4, %v3717_v44  ;;  %v3718_v16 = vld [vmem:[#allocation3 + $0x8] sm:$0x1]  ;;  %v4118_v17 = vld [vmem:[%s4117_s6] sm:$0x1]  ;;  %s4129_s6 = scalar_lea.vmem [#allocation3], %s6784_s26 }
0x2c3b   :  { %5244 = vmatmul.mubr.msk.f32.vlgmr.msra.gmra.mrb[36].mxu0 %vm1922_vm4, %v3718_v16  ;;  %5263 = vmatmul.mubr.msk.f32.vlgmr.msra.gmra.mrb[36].mxu1 %vm1922_vm4, %v3718_v16  ;;  %v4124_v29 = vld [vmem:[%s4123_s15] sm:$0x1]  ;;  %v4191_v23 = vrot.slane %v4118_v17, 7  ;;  %v4391_v16 = vld [vmem:[%s7068_s22 + $0x10] sm:$0xff] }
0x2c3c   :  { %5576 = vmatpush3.bf16.msra.mxu0 %v5575_v7  ;;  %5588 = vmatpush3.bf16.msra.mxu1 %v5587_v8  ;;  %v4130_v31 = vld [vmem:[%s4129_s6] sm:$0x1]  ;;  %v4194_v33 = vrot.slane %v4124_v29, 6  ;;  %v3894_v29 = vshrl.u32 %v3893_v28, 7 }
0x2c3d   :  { %5577 = vmatprep.subr.bf16.mxu0 %v5910_v4  ;;  %5589 = vmatprep.subr.bf16.mxu1 %v5910_v4  ;;  %v4136_v32 = vld [vmem:[%s4135_s18] sm:$0x1]  ;;  %v4197_v36 = vrot.slane %v4130_v31, 5 }
0x2c3e   :  { %5281 = vmatprep.mubr.msk.f32.mxu0 %vm5911_vm0, %v5912_v10  ;;  %5300 = vmatprep.mubr.msk.f32.mxu1 %vm5911_vm0, %v5912_v10  ;;  %v4112_v34 = vld [vmem:[%s4111_s12] sm:$0x1]  ;;  %v4200_v63 = vrot.slane %v4136_v32, 4  ;;  %v3943_v13 = vsub.s32 2, %v3894_v29  ;;  %v3961_v31 = vsub.s32 3, %v3894_v29  ;;  %v3997_v26 = vsub.s32 5, %v3894_v29 }
0x2c3f   :  { %v4116_v35 = vld [vmem:[%s4115_s9] sm:$0x1]  ;;  %v4211_v38 = vsel %vm4176_vm6, %v4112_v34, %v4191_v23 }
0x2c40   :  { %v4142_v27 = vld [vmem:[%s4141_s5] sm:$0x1]  ;;  %5579 = vmatpush3.bf16.msra.mxu0 %v5578_v12  ;;  %5591 = vmatpush3.bf16.msra.mxu1 %v5590_v30  ;;  %v4212_v15 = vsel %vm4178_vm7, %v4211_v38, %v4194_v33  ;;  %v4156_v43 = vrot.slane %v4116_v35, 7  ;;  %v3895_v12 = vsub.s32 0, %v3894_v29  ;;  %v3925_v30 = vsub.s32 1, %v3894_v29 }
0x2c41   :  { %v4122_v39 = vld [vmem:[%s4121_s20] sm:$0x1]  ;;  %5580 = vmatprep.subr.bf16.mxu0 %v5910_v4  ;;  %5592 = vmatprep.subr.bf16.mxu1 %v5910_v4  ;;  %v4213_v37 = vsel %vm4180_vm8, %v4212_v15, %v4197_v36  ;;  %v4203_v42 = vrot.slane %v4142_v27, 3 }
0x2c42   :  { %v4128_v60 = vld [vmem:[%s4127_s2] sm:$0x1]  ;;  %v4159_v21 = vrot.slane %v4122_v39, 6  ;;  %v4214_v45 = vsel %vm4182_vm9, %v4213_v37, %v4200_v63 }
0x2c43   :  { %v4148_v54 = vld [vmem:[%s4147_s3] sm:$0x1]  ;;  %v4162_v51 = vrot.slane %v4128_v60, 5  ;;  %v4215_v55 = vsel %vm4184_vm10, %v4214_v45, %v4203_v42 }
0x2c44   :  { %v4134_v11 = vld [vmem:[%s4133_s1] sm:$0x1]  ;;  %5582 = vmatpush3.bf16.msra.mxu0 %v5581_v40  ;;  %5594 = vmatpush3.bf16.msra.mxu1 %v5593_v47  ;;  %v4206_v62 = vrot.slane %v4148_v54, 2 }
0x2c45   :  { %v4110_v46 = vld [vmem:[%s4109_s19] sm:$0x1]  ;;  %v4165_v57 = vrot.slane %v4134_v11, 4  ;;  %5583 = vmatprep.subr.bf16.mxu0 %v5910_v4  ;;  %5595 = vmatprep.subr.bf16.mxu1 %v5910_v4 }
0x2c46   :  { %v4140_v48 = vld [vmem:[%s4139_s7] sm:$0x1]  ;;  %v4177_v52 = vsel %vm4176_vm6, %v4110_v46, %v4156_v43  ;;  %v4216_v2 = vsel %vm4186_vm11, %v4215_v55, %v4206_v62  ;;  %v4015_v43 = vsub.s32 6, %v3894_v29  ;;  %vm4105_vm6 = vcmask 65536  }
0x2c47   :  { %v4146_v50 = vld [vmem:[%s4145_s28] sm:$0x1]  ;;  %v4179_v58 = vsel %vm4178_vm7, %v4177_v52, %v4159_v21  ;;  %v4168_v56 = vrot.slane %v4140_v48, 3 }
0x2c48   :  { %v4154_v59 = vld [vmem:[%s4153_s10] sm:$0x1]  ;;  %v4181_v6 = vsel %vm4180_vm8, %v4179_v58, %v4162_v51  ;;  %v4171_v18 = vrot.slane %v4146_v50, 2  ;;  %5585 = vmatpush3.bf16.msra.mxu0 %v5584_v49  ;;  %5597 = vmatpush3.bf16.msra.mxu1 %v5596_v53  ;;  %v4033_v49 = vsub.s32 7, %v3894_v29 }
0x2c49   :  { %v4152_v0 = vld [vmem:[%s4151_s11] sm:$0x1]  ;;  %v4183_v1 = vsel %vm4182_vm9, %v4181_v6, %v4165_v57  ;;  %v4209_v5 = vrot.slane %v4154_v59, 1  ;;  %5598 = vmatprep.subr.bf16.mxu0 %v5910_v4 }
0x2c4a   :  { %v4185_v3 = vsel %vm4184_vm10, %v4183_v1, %v4168_v56  ;;  %v4174_v7 = vrot.slane %v4152_v0, 1  ;;  %v4389_v44 = vld [vmem:[%s7068_s22] sm:$0xff] }
0x2c4b   :  { %v4187_v8 = vsel %vm4186_vm11, %v4185_v3, %v4171_v18  ;;  %v4217_v61 = vsel %vm4188_vm12, %v4216_v2, %v4209_v5  ;;  %v5599_v14 = vpack.c.bf16 %v4390_v9, %v4389_v44  ;;  %v6935_v34 = vld [vmem:[%s7062_s16] ss:$0 sm:$0xff] }
0x2c4c   :  { %v4189_v22 = vsel %vm4188_vm12, %v4187_v8, %v4174_v7  ;;  %5282 = vmatmul.mubr.msk.f32.vlgmr.msra.gmra.mrb[38].mxu0 %vm1922_vm4, %v4217_v61  ;;  %v4581_v7 = vld [vmem:[%s7067_s21] ss:$0 sm:$0xff] }
0x2c4d   :  { %5301 = vmatmul.mubr.msk.f32.vlgmr.msra.gmra.mrb[38].mxu1 %vm1922_vm4, %v4189_v22  ;;  %5311 = vmatprep.mubr.msk.f32.mxu0 %vm5911_vm0, %v5912_v10  ;;  %v4392_v10 = vld [vmem:[%s7068_s22 + $0x18] sm:$0xff]  ;;  %v6954_v8 = vld [vmem:[%s7063_s17] ss:$0 sm:$0xff]  ;;  %vm4076_vm0 = vcmask 31744   ;;  %vm4088_vm4 = vcmask 64512   ;;  %s5916_s17 = smov [#allocation10]  }
0x2c4e   :  { %5600 = vmatpush3.bf16.msra.mxu0 %v5599_v14  ;;  %v5602_v17 = vpack.c.bf16 %v4392_v10, %v4391_v16  ;;  %s4479_s21 = sshll.u32 %s5916_s17, 4  ;;  %s4480_s21 = int_to_ptr.vmem [resolvable:$true] %s4479_s21 }
0x2c4f   :  { %5601 = vmatprep.subr.bf16.mxu0 %v5910_v4  ;;  %v3979_v4 = vsub.s32 4, %v3894_v29  ;;  %s5859_s20 = scalar_lea.vmem %s4480_s21, 256  ;;  %p5864_p6 = scmp.lt.s32.totalorder %s4480_s21, %s4480_s21 }
0x2c50   :  { %p5860_p5 = scmp.ne.s32.totalorder %s4480_s21, %s5859_s20  ;;  %p5865_p7 = scmp.lt.s32.totalorder %s5859_s20, %s5859_s20 }
0x2c52   :  { %5603 = vmatpush3.bf16.msra.mxu0 %v5602_v17  ;;  %p5866_p8 = por %p5865_p7, %p5864_p6 }
0x2c54   :  { %p5867_p9 = pnand %p5866_p8, %p5860_p5 }
0x2d0e   :  { %v5245_v32 = vpop.f32.mrb[36].mxu0  ;;  %v5264_v23 = vpop.f32.mrb[36].mxu1 }
0x2d0f   :  { %v4052_v33 = vrot.slane %v5264_v23, %v3895_v12  ;;  %v3799_v19 = vpop.f32.mrb[37].mxu0  ;;  %v3882_v25 = vpop.f32.mrb[37].mxu1 }
0x2d10   :  { %v3896_v35 = vrot.slane %v3882_v25, %v3895_v12  ;;  %v3926_v27 = vrot.slane %v3882_v25, %v3925_v30  ;;  %v3944_v36 = vrot.slane %v3882_v25, %v3943_v13  ;;  %v3962_v38 = vrot.slane %v3882_v25, %v3961_v31 }
0x2d11   :  { %v6937_v39 = vadd.f32 %v5245_v32, %v4052_v33  ;;  %v4053_v40 = vadd.f32 %v4052_v33, %v3799_v19  ;;  %v3980_v47 = vrot.slane %v3882_v25, %v3979_v4  ;;  %v3998_v41 = vrot.slane %v3882_v25, %v3997_v26 }
0x2d12   :  { %v3897_v24 = vadd.f32 %v3896_v35, %v3799_v19  ;;  %v3898_v63 = vadd.f32 %v5245_v32, %v3896_v35  ;;  %v3927_v15 = vadd.f32 %v3926_v27, %v3799_v19  ;;  %v3945_v60 = vadd.f32 %v3944_v36, %v3799_v19 }
0x2d13   :  { %v4055_v54 = vadd.f32 %v6935_v34, %v4053_v40  ;;  %v3928_v37 = vadd.f32 %v5245_v32, %v3926_v27  ;;  %v3963_v11 = vadd.f32 %v3962_v38, %v3799_v19  ;;  %v3946_v48 = vadd.f32 %v5245_v32, %v3944_v36 }
0x2d14   :  { %v3905_v21 = vadd.f32 %v6935_v34, %v3897_v24  ;;  %v3906_v42 = vadd.f32 %v6935_v34, %v3898_v63  ;;  %v3929_v45 = vadd.f32 %v6935_v34, %v3927_v15  ;;  %v3947_v46 = vadd.f32 %v6935_v34, %v3945_v60 }
0x2d15   :  { %5809 = vtanh.f32 %v4055_v54  ;;  %v3981_v50 = vadd.f32 %v3980_v47, %v3799_v19  ;;  %v3964_v51 = vadd.f32 %v5245_v32, %v3962_v38  ;;  %v3999_v52 = vadd.f32 %v3998_v41, %v3799_v19 }
0x2d16   :  { %5811 = vtanh.f32 %v3905_v21  ;;  %v3930_v53 = vadd.f32 %v6935_v34, %v3928_v37  ;;  %v3982_v55 = vadd.f32 %v5245_v32, %v3980_v47  ;;  %v4016_v57 = vrot.slane %v3882_v25, %v4015_v43 }
0x2d17   :  { %5813 = vtanh.f32 %v3906_v42  ;;  %v4000_v59 = vadd.f32 %v5245_v32, %v3998_v41  ;;  %v3965_v62 = vadd.f32 %v6935_v34, %v3963_v11  ;;  %v4034_v0 = vrot.slane %v3882_v25, %v4033_v49 }
0x2d18   :  { %5815 = vtanh.f32 %v3929_v45  ;;  %v4017_v58 = vadd.f32 %v4016_v57, %v3799_v19  ;;  %v4018_v56 = vadd.f32 %v5245_v32, %v4016_v57  ;;  %v3948_v6 = vadd.f32 %v6935_v34, %v3946_v48 }
0x2d19   :  { %5817 = vtanh.f32 %v3947_v46  ;;  %v4035_v18 = vadd.f32 %v4034_v0, %v3799_v19  ;;  %v4036_v1 = vadd.f32 %v5245_v32, %v4034_v0  ;;  %v3983_v2 = vadd.f32 %v6935_v34, %v3981_v50 }
0x2d1a   :  { %5819 = vtanh.f32 %v3930_v53  ;;  %v3966_v61 = vadd.f32 %v6935_v34, %v3964_v51  ;;  %v4001_v29 = vadd.f32 %v6935_v34, %v3999_v52  ;;  %v3984_v31 = vadd.f32 %v6935_v34, %v3982_v55 }
0x2d1b   :  { %5821 = vtanh.f32 %v3965_v62  ;;  %v4019_v33 = vadd.f32 %v6935_v34, %v4017_v58  ;;  %v4002_v35 = vadd.f32 %v6935_v34, %v4000_v59  ;;  %v4037_v47 = vadd.f32 %v6935_v34, %v4035_v18 }
0x2d1c   :  { %5823 = vtanh.f32 %v3948_v6  ;;  %v4020_v15 = vadd.f32 %v6935_v34, %v4018_v56  ;;  %v4038_v42 = vadd.f32 %v6935_v34, %v4036_v1  ;;  %v4056_v50 = vadd.f32 %v6935_v34, %v6937_v39 }
0x2d1d   :  { %5825 = vtanh.f32 %v3983_v2 }
0x2d1e   :  { %5827 = vtanh.f32 %v3966_v61 }
0x2d1f   :  { %v4303_v3 = vpop.f32.mrb[38].mxu0  ;;  %v5810_v14 = vpop.eup %5809 }
0x2d20   :  { %v4376_v5 = vpop.f32.mrb[38].mxu1  ;;  %v5283_v44 = vpop.f32.mrb[39].mxu0  ;;  %v4059_v17 = vmul.f32 %v5810_v14, %v6954_v8 }
0x2d21   :  { %v4377_v22 = vadd.f32 %v4376_v5, %v4303_v3  ;;  %v5302_v9 = vpop.f32.mrb[39].mxu1  ;;  %v5812_v16 = vpop.eup %5811 }
0x2d22   :  { %v5814_v20 = vpop.eup %5813  ;;  %v3915_v28 = vmul.f32 %v5812_v16, %v6954_v8  ;;  %v4061_v30 = vsel %vm108_vm1, %v4059_v17, 0.0  ;;  %v4563_v16 = vld [vmem:[#allocation6] ss:$0 sm:$0xff] }
0x2d23   :  { %v4387_v10 = vadd.f32 %v4581_v7, %v4377_v22  ;;  %v5816_v12 = vpop.eup %5815  ;;  %v3916_v13 = vmul.f32 %v5814_v20, %v6954_v8  ;;  %4062 = vadd.xlane.f32.xlu1 %v4061_v30 }
0x2d24   :  { %v5818_v4 = vpop.eup %5817  ;;  %v3917_v26 = vsel %vm108_vm1, %v3915_v28, 0.0  ;;  %v3933_v32 = vmul.f32 %v5816_v12, %v6954_v8 }
0x2d25   :  { %5829 = vtanh.f32 %v4387_v10  ;;  %v5820_v23 = vpop.eup %5819  ;;  %3918 = vadd.xlane.f32.xlu0 %v3917_v26  ;;  %v3920_v19 = vsel %vm468_vm2, %v3916_v13, 0.0  ;;  %v3951_v25 = vmul.f32 %v5818_v4, %v6954_v8 }
0x2d26   :  { %5831 = vtanh.f32 %v4001_v29  ;;  %v5822_v27 = vpop.eup %5821  ;;  %v3935_v36 = vsel %vm108_vm1, %v3933_v32, 0.0  ;;  %v3934_v38 = vmul.f32 %v5820_v23, %v6954_v8 }
0x2d27   :  { %5833 = vtanh.f32 %v3984_v31  ;;  %3921 = vadd.xlane.f32.xlu1 %v3920_v19  ;;  %v5824_v40 = vpop.eup %5823  ;;  %v3953_v24 = vsel %vm108_vm1, %v3951_v25, 0.0  ;;  %v3969_v63 = vmul.f32 %v5822_v27, %v6954_v8 }
0x2d28   :  { %5835 = vtanh.f32 %v4019_v33  ;;  %v5826_v41 = vpop.eup %5825  ;;  %v3938_v54 = vsel %vm468_vm2, %v3934_v38, 0.0  ;;  %v3952_v37 = vmul.f32 %v5824_v40, %v6954_v8 }
0x2d29   :  { %3936 = vadd.xlane.f32.xlu0 %v3935_v36  ;;  %5837 = vtanh.f32 %v4002_v35  ;;  %v5828_v60 = vpop.eup %5827  ;;  %v3971_v43 = vsel %vm108_vm1, %v3969_v63, 0.0  ;;  %v3987_v21 = vmul.f32 %v5826_v41, %v6954_v8 }
0x2d2a   :  { %5839 = vtanh.f32 %v4037_v47  ;;  %v3956_v46 = vsel %vm468_vm2, %v3952_v37, 0.0  ;;  %v3970_v48 = vmul.f32 %v5828_v60, %v6954_v8 }
0x2d2b   :  { %3954 = vadd.xlane.f32.xlu1 %v3953_v24  ;;  %5841 = vtanh.f32 %v4020_v15  ;;  %v3989_v51 = vsel %vm108_vm1, %v3987_v21, 0.0 }
0x2d2c   :  { %5843 = vtanh.f32 %v4038_v42  ;;  %v3974_v55 = vsel %vm468_vm2, %v3970_v48, 0.0 }
0x2d2d   :  { %3939 = vadd.xlane.f32.xlu0 %v3938_v54  ;;  %5845 = vtanh.f32 %v4056_v50 }
0x2d2f   :  { %v5830_v11 = vpop.eup %5829  ;;  %3972 = vadd.xlane.f32.xlu1 %v3971_v43 }
0x2d30   :  { %5312 = vmatmul.mubr.msk.f32.vlgmr.msra.gmra.mrb[40].mxu0 %vm108_vm1, %v5830_v11  ;;  %v5832_v45 = vpop.eup %5831 }
0x2d31   :  { %v5834_v49 = vpop.eup %5833  ;;  %3957 = vadd.xlane.f32.xlu0 %v3956_v46  ;;  %v4005_v52 = vmul.f32 %v5832_v45, %v6954_v8 }
0x2d32   :  { %v5836_v53 = vpop.eup %5835  ;;  %v3988_v57 = vmul.f32 %v5834_v49, %v6954_v8 }
0x2d33   :  { %3990 = vadd.xlane.f32.xlu1 %v3989_v51  ;;  %v5838_v58 = vpop.eup %5837  ;;  %v4007_v59 = vsel %vm108_vm1, %v4005_v52, 0.0  ;;  %v4023_v62 = vmul.f32 %v5836_v53, %v6954_v8 }
0x2d34   :  { %v5840_v0 = vpop.eup %5839  ;;  %v3992_v34 = vsel %vm468_vm2, %v3988_v57, 0.0  ;;  %v4006_v39 = vmul.f32 %v5838_v58, %v6954_v8 }
0x2d35   :  { %3975 = vadd.xlane.f32.xlu0 %v3974_v55  ;;  %v5842_v56 = vpop.eup %5841  ;;  %v4025_v6 = vsel %vm108_vm1, %v4023_v62, 0.0  ;;  %v4041_v18 = vmul.f32 %v5840_v0, %v6954_v8 }
0x2d36   :  { %v4010_v1 = vsel %vm468_vm2, %v4006_v39, 0.0  ;;  %v4024_v2 = vmul.f32 %v5842_v56, %v6954_v8  ;;  %v5844_v3 = vpop.eup %5843 }
0x2d37   :  { %4008 = vadd.xlane.f32.xlu1 %v4007_v59  ;;  %v4043_v5 = vsel %vm108_vm1, %v4041_v18, 0.0  ;;  %v4042_v61 = vmul.f32 %v5844_v3, %v6954_v8  ;;  %v5846_v22 = vpop.eup %5845  ;;  %vm4079_vm1 = vcmask 39936  }
0x2d38   :  { %v4028_v7 = vsel %vm468_vm2, %v4024_v2, 0.0  ;;  %v4060_v9 = vmul.f32 %v5846_v22, %v6954_v8 }
0x2d39   :  { %3993 = vadd.xlane.f32.xlu0 %v3992_v34  ;;  %v4046_v44 = vsel %vm468_vm2, %v4042_v61, 0.0 }
0x2d3a   :  { %v4064_v14 = vsel %vm468_vm2, %v4060_v9, 0.0  ;;  %vm4082_vm2 = vcmask 48128  }
0x2d3b   :  { %4026 = vadd.xlane.f32.xlu1 %v4025_v6 }
0x2d3d   :  { %4011 = vadd.xlane.f32.xlu0 %v4010_v1 }
0x2d3f   :  { %4044 = vadd.xlane.f32.xlu1 %v4043_v5 }
0x2d41   :  { %4029 = vadd.xlane.f32.xlu0 %v4028_v7 }
0x2d45   :  { %4047 = vadd.xlane.f32.xlu0 %v4046_v44 }
0x2d49   :  { %4065 = vadd.xlane.f32.xlu0 %v4064_v14 }
0x2d50   :  { %4098 = vperm.xlu1 %5615, %v4563_v16  }
0x2db0   :  { %v4063_v10 = vpop.xlane.xlu1 %4062 }
0x2db2   :  { %v3919_v17 = vpop.xlane.xlu0 %3918 }
0x2db4   :  { %v3922_v20 = vpop.xlane.xlu1 %3921 }
0x2db6   :  { %v3937_v28 = vpop.xlane.xlu0 %3936 }
0x2db7   :  { %v4068_v32 = vsel %vm4067_vm13, %v3919_v17, %v3937_v28 }
0x2db8   :  { %v3955_v29 = vpop.xlane.xlu1 %3954 }
0x2db9   :  { %v4071_v23 = vsel %vm4070_vm14, %v4068_v32, %v3955_v29 }
0x2dba   :  { %v3940_v12 = vpop.xlane.xlu0 %3939 }
0x2dbb   :  { %v4069_v41 = vsel %vm4067_vm13, %v3922_v20, %v3940_v12 }
0x2dbc   :  { %v3973_v30 = vpop.xlane.xlu1 %3972 }
0x2dbd   :  { %v4074_v19 = vsel %vm4073_vm15, %v4071_v23, %v3973_v30 }
0x2dbe   :  { %v3958_v13 = vpop.xlane.xlu0 %3957 }
0x2dbf   :  { %v4072_v24 = vsel %vm4070_vm14, %v4069_v41, %v3958_v13 }
0x2dc0   :  { %v3991_v31 = vpop.xlane.xlu1 %3990 }
0x2dc1   :  { %v4077_v35 = vsel %vm4076_vm0, %v4074_v19, %v3991_v31 }
0x2dc2   :  { %v3976_v4 = vpop.xlane.xlu0 %3975 }
0x2dc3   :  { %v4075_v60 = vsel %vm4073_vm15, %v4072_v24, %v3976_v4 }
0x2dc4   :  { %v4009_v26 = vpop.xlane.xlu1 %4008 }
0x2dc5   :  { %v4080_v27 = vsel %vm4079_vm1, %v4077_v35, %v4009_v26 }
0x2dc6   :  { %v3994_v8 = vpop.xlane.xlu0 %3993 }
0x2dc7   :  { %v4078_v11 = vsel %vm4076_vm0, %v4075_v60, %v3994_v8 }
0x2dc8   :  { %v4027_v33 = vpop.xlane.xlu1 %4026 }
0x2dc9   :  { %v4083_v36 = vsel %vm4082_vm2, %v4080_v27, %v4027_v33 }
0x2dca   :  { %v4012_v25 = vpop.xlane.xlu0 %4011 }
0x2dcb   :  { %v4081_v43 = vsel %vm4079_vm1, %v4078_v11, %v4012_v25 }
0x2dcc   :  { %v4045_v38 = vpop.xlane.xlu1 %4044 }
0x2dcd   :  { %v4086_v40 = vsel %vm4085_vm3, %v4083_v36, %v4045_v38 }
0x2dce   :  { %v4030_v47 = vpop.xlane.xlu0 %4029  ;;  %v4089_v15 = vsel %vm4088_vm4, %v4086_v40, %v4063_v10 }
0x2dcf   :  { %v4084_v21 = vsel %vm4082_vm2, %v4081_v43, %v4030_v47 }
0x2dd0   :  { %v4099_v63 = vpop.permute.xlu1 %4098 }
0x2dd1   :  { %v4101_v54 = vadd.f32 %v4099_v63, %v4089_v15 }
0x2dd2   :  { %v4048_v37 = vpop.xlane.xlu0 %4047 }
0x2dd3   :  { %4104 = vst.msk [vmem:[#allocation10] sm:$0xff] %vm4103_vm5, %v4101_v54  ;;  %v4087_v42 = vsel %vm4085_vm3, %v4084_v21, %v4048_v37 }
0x2dd6   :  { %v4066_v45 = vpop.xlane.xlu0 %4065 }
0x2dd7   :  { %v4090_v46 = vsel %vm4088_vm4, %v4087_v42, %v4066_v45 }
0x2dd8   :  { %v4102_v48 = vadd.f32 %v4099_v63, %v4090_v46 }
0x2dda   :  { %4106 = vst.msk [vmem:[#allocation10 + $0x8] sm:$0x1] %vm4105_vm6, %v4102_v48 }
0x2ddb   :  { %5870 = shalt.err (!%p5867_p9)
}
0x2ddc   :  { %s5871_s13 = scalar_lea.hbm %s7070_s24, 256 }
0x2ddd   :  { %p5872_p10 = scmp.ne.s32.totalorder %s7070_s24, %s5871_s13  ;;  %p5875_p11 = scmp.lt.u32.totalorder %s5871_s13, %s7070_s24 }
0x2ddf   :  { %p5877_p12 = pnand %p5875_p11, %p5872_p10 }
0x2de1   :  { %5880 = shalt.err (!%p5877_p12)
}
0x2de2   :  { %s5917_s19 = smov 128   ;;  %s5918_s7 = smov 8   ;;  %v4582_v49 = vld [vmem:[%s7069_s23] ss:$0 sm:$0xff] }
0x2de3   :  { %4485 = dma.vmem_to_hbm [thread:$0]  %s4480_s21, 256, %s7070_s24, [#allocation8], %s5917_s19, %s5917_s19, %s5918_s7  }
0x2de4   :  { %s5919_s8 = smov [#allocation11]  }
0x2de5   :  { %s4492_s27 = sshll.u32 %s5919_s8, 4  ;;  %s4493_s27 = int_to_ptr.vmem [resolvable:$true] %s4492_s27 }
0x2de6   :  { %s5881_s30 = scalar_lea.vmem %s4493_s27, 128  ;;  %p5886_p0 = scmp.lt.s32.totalorder %s4493_s27, %s4493_s27 }
0x2de7   :  { %p5882_p13 = scmp.ne.s32.totalorder %s4493_s27, %s5881_s30  ;;  %p5887_p1 = scmp.lt.s32.totalorder %s5881_s30, %s5881_s30 }
0x2de9   :  { %p5888_p2 = por %p5887_p1, %p5886_p0 }
0x2deb   :  { %p5889_p3 = pnand %p5888_p2, %p5882_p13 }
0x2e03   :  { %v4469_v50 = vpop.f32.mrb[40].mxu0 }
0x2e04   :  { %v4470_v51 = vadd.f32 %v4582_v49, %v4469_v50  ;;  %v5313_v52 = vpop.f32.mrb[41].mxu0 }
0x2e06   :  { %4473 = vst [vmem:[#allocation11] sm:$0xff] %v4470_v51 }
0x2e07   :  { %5892 = shalt.err (!%p5889_p3)
}
0x2e08   :  { %s7100_s25 = sld [smem:[#allocation26_spill]] }
0x2e0e   :  { %s5893_s26 = scalar_lea.hbm %s7100_s25, 128 }
0x2e0f   :  { %p5894_p4 = scmp.ne.s32.totalorder %s7100_s25, %s5893_s26  ;;  %p5897_p5 = scmp.lt.u32.totalorder %s5893_s26, %s7100_s25 }
0x2e11   :  { %p5899_p6 = pnand %p5897_p5, %p5894_p4 }
0x2e13   :  { %5902 = shalt.err (!%p5899_p6)
}
0x2e14   :  { %4495 = dma.vmem_to_hbm [thread:$0]  %s4493_s27, 128, %s7100_s25, [#allocation12]  }
0x2e15   :  { %5905 = dma.done.wait [#allocation8], 256  }
0x2e16   :  { %5906 = vsyncadd [#allocation8], 4294967040 }
0x2e17   :  { %5907 = dma.done.wait [#allocation12], 128  }
0x2e18   :  { %5908 = vsyncadd [#allocation12], 4294967168 }
0x2e19   :  { %4502 = vsyncpa [#allocation8], 1 }
0x2e1a   :  { %4503 = vsyncpa [#allocation12], 1 }
0x2e1b   :  { %4504 = vsyncpa [#allocation9], 1 }

</bundles_post_ra>
